<compile_context>
chip_gen: v7x
topology: tpu7x:2x2x1
jax: 0.10.0
libtpu: 0.0.40
codegen_flags: <defaults>
</compile_context>

<pallas_src>
import math

import jax
import jax.numpy as jnp
from jax.experimental import pallas as pl
from jax.experimental.pallas import tpu as pltpu

# ---- model hyperparameters (small, consistent with the module's __init__) ----
WORDS = 50               # words_num_in_dict
WORDS_PAD = 64           # padded vocab rows (zeros beyond WORDS)
QUERY_SIZE = 16          # query_size (vm_id feature width)
EMB = 32                 # embedding_size
NHEAD = 4                # nhead
HIDDEN = 64              # hidden_size
SEQ = 8                  # config sequence length
HEAD_DIM = EMB // NHEAD  # 8
HS = NHEAD * SEQ         # 32 folded (head, key) columns per sample
LN_EPS = 1e-5

# ---- per-grid-step tile: TILE_B configs = 128 token rows (review item 1) ----
TILE_B = 16
TBS = TILE_B * SEQ       # 128 token rows per tile

SLAB_LANES = 128


def _round_up(n, m):
    return ((n + m - 1) // m) * m


# ---- bf16 weight slab (matmul operands; review items 2/3/4) ----
_W_SHAPES = (
    ("embed_inproj", (WORDS_PAD, 3 * EMB)),   # embedding folded into in_proj
    ("out_proj_w",   (EMB, EMB)),
    ("ffn1_w1",      (EMB, HIDDEN)),
    ("ffn1_w2",      (HIDDEN, EMB)),
    ("pa_w",         (QUERY_SIZE, EMB)),
    ("ffn2_w1",      (EMB, HIDDEN)),
    ("ffn2_w2",      (HIDDEN, EMB)),
    ("block_sum",    (HS, HS)),               # per-head softmax-denominator matrix
)

# ---- f32 vector/constant slab (biases, LN params, head mask) ----
_V_SHAPES = (
    ("in_proj_b",  (1, 3 * EMB)),
    ("out_proj_b", (1, EMB)),
    ("ffn1_b1",    (1, HIDDEN)),
    ("ffn1_b2",    (1, EMB)),
    ("ln1_g",      (1, EMB)),
    ("ln1_b",      (1, EMB)),
    ("pa_b",       (1, EMB)),
    ("ffn2_b1",    (1, HIDDEN)),
    ("ffn2_b2",    (1, EMB)),
    ("ln2_g",      (1, EMB)),
    ("ln2_b",      (1, EMB)),
    ("head_mask",  (HS, EMB)),                # block-diagonal head mask (0/1)
)


def _build_layout(shapes, align):
    layout, row = {}, 0
    for name, (r, c) in shapes:
        layout[name] = (row, r, c)
        row += _round_up(r, align)
    return layout, _round_up(row, align)


_W_LAYOUT, W_ROWS = _build_layout(_W_SHAPES, 16)   # bf16 sublane packing = 16
_V_LAYOUT, V_ROWS = _build_layout(_V_SHAPES, 8)    # f32 sublane tile = 8


def _w(ref, name):
    row, r, c = _W_LAYOUT[name]
    return ref[row:row + r, :c]            # static slice of the resident bf16 slab


def _v(ref, name):
    row, r, c = _V_LAYOUT[name]
    return ref[row:row + r, :c]            # static slice of the resident f32 slab


def _layernorm(x, gamma, beta):
    mu = jnp.mean(x, axis=-1, keepdims=True)
    var = jnp.mean((x - mu) ** 2, axis=-1, keepdims=True)
    return (x - mu) * jax.lax.rsqrt(var + LN_EPS) * gamma + beta


# --------------------------------- kernel ---------------------------------
def config_encoder_kernel(ids_ref, vm_ref, w_ref, v_ref, out_ref):
    f32, bf16 = jnp.float32, jnp.bfloat16

    # ---- embedding lookup fused with the QKV in-projection (one bf16 MXU matmul) ----
    ids = ids_ref[...]                                                     # (TBS, 1) i32
    word_iota = jax.lax.broadcasted_iota(jnp.int32, (TBS, WORDS_PAD), 1)
    onehot = (word_iota == ids).astype(bf16)                               # (TBS, 64)
    qkv = jnp.dot(onehot, _w(w_ref, "embed_inproj"),
                  preferred_element_type=f32) + _v(v_ref, "in_proj_b")     # (TBS, 3E) f32

    # ---- nn.MultiheadAttention (self-attn, batch_first), batched over samples ----
    q3 = qkv[:, 0:EMB].reshape(TILE_B, SEQ, EMB).astype(bf16)
    k3 = qkv[:, EMB:2 * EMB].reshape(TILE_B, SEQ, EMB)
    v3 = qkv[:, 2 * EMB:3 * EMB].reshape(TILE_B, SEQ, EMB)

    # block-diagonal (head-masked) K/V: row r of the HS axis is (head r//SEQ, key r%SEQ)
    head_mask = _v(v_ref, "head_mask")                                     # (HS, E) f32 0/1
    k_blk = (jnp.concatenate([k3] * NHEAD, axis=1) * head_mask).astype(bf16)   # (TB,HS,E)
    v_blk = (jnp.concatenate([v3] * NHEAD, axis=1) * head_mask).astype(bf16)   # (TB,HS,E)

    # scores[b, t, h*SEQ + u] = (q_h[b,t] . k_h[b,u]) / sqrt(Dh)
    s = jnp.einsum("bqd,bkd->bqk", q3, k_blk,
                   preferred_element_type=f32) * (1.0 / math.sqrt(HEAD_DIM))
    m = jnp.max(s, axis=-1, keepdims=True)           # shared stabilizer (cancels per head)
    p_un = jnp.exp(s - m)                                                  # (TB, SEQ, HS)
    denom = jnp.dot(p_un.reshape(TBS, HS).astype(bf16), _w(w_ref, "block_sum"),
                    preferred_element_type=f32).reshape(TILE_B, SEQ, HS)
    p = (p_un * pl.reciprocal(jnp.maximum(denom, 1e-20), approx=True)).astype(bf16)
    heads = jnp.einsum("bqk,bkd->bqd", p, v_blk,
                       preferred_element_type=f32)          # (TB, SEQ, E), heads concat'd
    attn1 = jnp.dot(heads.reshape(TBS, EMB).astype(bf16), _w(w_ref, "out_proj_w"),
                    preferred_element_type=f32) + _v(v_ref, "out_proj_b")  # (TBS, E) f32

    # ---- PoswiseFeedForwardNet #1 : LN(FFN(x) + x) ----
    h1 = jnp.maximum(jnp.dot(attn1.astype(bf16), _w(w_ref, "ffn1_w1"),
                             preferred_element_type=f32) + _v(v_ref, "ffn1_b1"), 0.0)
    f1 = jnp.dot(h1.astype(bf16), _w(w_ref, "ffn1_w2"),
                 preferred_element_type=f32) + _v(v_ref, "ffn1_b2")
    out1 = _layernorm(f1 + attn1, _v(v_ref, "ln1_g"), _v(v_ref, "ln1_b"))  # (TBS, E) f32

    # ---- PersonalizedAttention (per-sample softmax over its own SEQ tokens) ----
    vm = vm_ref[...].astype(bf16)                                          # (TILE_B, Q)
    qvec = jnp.tanh(jnp.dot(vm, _w(w_ref, "pa_w"),
                            preferred_element_type=f32) + _v(v_ref, "pa_b"))   # (TB, E)
    out13 = out1.reshape(TILE_B, SEQ, EMB)
    sc = jnp.sum(out13 * qvec[:, None, :], axis=-1, keepdims=True)         # (TB, SEQ, 1)
    m2 = jnp.max(sc, axis=1, keepdims=True)
    w_un = jnp.exp(sc - m2)
    w_att = w_un / jnp.sum(w_un, axis=1, keepdims=True)     # exact divide (review note)
    ctx = jnp.sum(w_att * out13, axis=1)                                   # (TILE_B, E)

    # ---- PoswiseFeedForwardNet #2 : LN(FFN(x) + x) ----
    h2 = jnp.maximum(jnp.dot(ctx.astype(bf16), _w(w_ref, "ffn2_w1"),
                             preferred_element_type=f32) + _v(v_ref, "ffn2_b1"), 0.0)
    f2 = jnp.dot(h2.astype(bf16), _w(w_ref, "ffn2_w2"),
                 preferred_element_type=f32) + _v(v_ref, "ffn2_b2")
    out_ref[...] = _layernorm(f2 + ctx, _v(v_ref, "ln2_g"), _v(v_ref, "ln2_b"))


# --------------------------------- wrapper ---------------------------------
def config_encoder_forward(config_input, vm_id, w_slab, v_slab):
    """config_input (B, SEQ) int, vm_id (B, QUERY_SIZE) -> (B, EMB) f32."""
    B = config_input.shape[0]
    B_pad = _round_up(max(B, 1), TILE_B)
    nt = B_pad // TILE_B
    ids = jnp.zeros((B_pad, SEQ), jnp.int32).at[:B].set(config_input.astype(jnp.int32))
    ids = ids.reshape(B_pad * SEQ, 1)
    vm = jnp.zeros((B_pad, QUERY_SIZE), jnp.float32).at[:B].set(vm_id.astype(jnp.float32))

    out = pl.pallas_call(
        config_encoder_kernel,
        out_shape=jax.ShapeDtypeStruct((B_pad, EMB), jnp.float32),
        grid=(nt,),
        in_specs=[
            pl.BlockSpec((TBS, 1), lambda i: (i, 0)),                 # token ids
            pl.BlockSpec((TILE_B, QUERY_SIZE), lambda i: (i, 0)),     # vm_id features
            pl.BlockSpec((W_ROWS, SLAB_LANES), lambda i: (0, 0)),     # bf16 weights (resident)
            pl.BlockSpec((V_ROWS, SLAB_LANES), lambda i: (0, 0)),     # f32 biases/consts
        ],
        out_specs=pl.BlockSpec((TILE_B, EMB), lambda i: (i, 0)),
        compiler_params=pltpu.CompilerParams(dimension_semantics=("parallel",)),
    )(ids, vm, w_slab, v_slab)
    return out[:B]


# ------------------------------ params / packing ------------------------------
def init_params(key):
    ks = jax.random.split(key, 16)
    n = lambda k, shape, s=0.1: (s * jax.random.normal(k, shape)).astype(jnp.float32)
    return {
        "embed": n(ks[0], (WORDS, EMB)),
        # MultiheadAttention: in_proj (3E,E) & out_proj (E,E), stored transposed (in, out)
        "in_proj_w": n(ks[1], (EMB, 3 * EMB)),
        "in_proj_b": n(ks[2], (1, 3 * EMB)),
        "out_proj_w": n(ks[3], (EMB, EMB)),
        "out_proj_b": n(ks[4], (1, EMB)),
        # PoswiseFeedForwardNet #1
        "ffn1_w1": n(ks[5], (EMB, HIDDEN)),
        "ffn1_b1": n(ks[6], (1, HIDDEN)),
        "ffn1_w2": n(ks[7], (HIDDEN, EMB)),
        "ffn1_b2": n(ks[8], (1, EMB)),
        "ln1_g": jnp.ones((1, EMB), jnp.float32),
        "ln1_b": jnp.zeros((1, EMB), jnp.float32),
        # PersonalizedAttention: Linear(query_size -> embedding_size)
        "pa_w": n(ks[9], (QUERY_SIZE, EMB)),
        "pa_b": n(ks[10], (1, EMB)),
        # PoswiseFeedForwardNet #2
        "ffn2_w1": n(ks[11], (EMB, HIDDEN)),
        "ffn2_b1": n(ks[12], (1, HIDDEN)),
        "ffn2_w2": n(ks[13], (HIDDEN, EMB)),
        "ffn2_b2": n(ks[14], (1, EMB)),
        "ln2_g": jnp.ones((1, EMB), jnp.float32),
        "ln2_b": jnp.zeros((1, EMB), jnp.float32),
    }


def pack_params(params):
    """Pack parameters + constant structure matrices into the two slabs (once, outside jit)."""
    f32 = jnp.float32
    arrs = dict(params)

    # fold the (padded) embedding table into the QKV in-projection (exact algebraic fold)
    embed_pad = jnp.zeros((WORDS_PAD, EMB), f32).at[:WORDS].set(params["embed"].astype(f32))
    arrs["embed_inproj"] = embed_pad @ params["in_proj_w"].astype(f32)            # (64, 96)

    # constant structure matrices (precomputed instead of in-kernel iota work)
    r = jnp.arange(HS)
    arrs["block_sum"] = (r[:, None] // SEQ == r[None, :] // SEQ).astype(f32)      # (HS, HS)
    arrs["head_mask"] = (r[:, None] // SEQ ==
                         jnp.arange(EMB)[None, :] // HEAD_DIM).astype(f32)        # (HS, E)

    w_slab = jnp.zeros((W_ROWS, SLAB_LANES), jnp.bfloat16)
    for name, (rr, cc) in _W_SHAPES:
        row = _W_LAYOUT[name][0]
        w_slab = w_slab.at[row:row + rr, :cc].set(
            arrs[name].astype(f32).reshape(rr, cc).astype(jnp.bfloat16))
    v_slab = jnp.zeros((V_ROWS, SLAB_LANES), jnp.float32)
    for name, (rr, cc) in _V_SHAPES:
        row = _V_LAYOUT[name][0]
        v_slab = v_slab.at[row:row + rr, :cc].set(arrs[name].astype(f32).reshape(rr, cc))
    return w_slab, v_slab


# ---------------------------- pure-JAX reference ----------------------------
def reference_forward(config_input, vm_id, p):
    def ln(x, g, b):
        mu = x.mean(-1, keepdims=True)
        var = ((x - mu) ** 2).mean(-1, keepdims=True)
        return (x - mu) / jnp.sqrt(var + LN_EPS) * g + b

    emb = p["embed"][config_input]                                # (B, S, E)
    outs = []
    for b in range(config_input.shape[0]):
        x = emb[b].astype(jnp.float32)
        qkv = x @ p["in_proj_w"] + p["in_proj_b"]
        q, k, v = qkv[:, :EMB], qkv[:, EMB:2 * EMB], qkv[:, 2 * EMB:]
        heads = []
        for h in range(NHEAD):
            sl = slice(h * HEAD_DIM, (h + 1) * HEAD_DIM)
            s = (q[:, sl] / math.sqrt(HEAD_DIM)) @ k[:, sl].T
            heads.append(jax.nn.softmax(s, axis=-1) @ v[:, sl])
        attn1 = jnp.concatenate(heads, -1) @ p["out_proj_w"] + p["out_proj_b"]
        f1 = (jnp.maximum(attn1 @ p["ffn1_w1"] + p["ffn1_b1"], 0.0)
              @ p["ffn1_w2"] + p["ffn1_b2"])
        out1 = ln(f1 + attn1, p["ln1_g"], p["ln1_b"])
        qvec = jnp.tanh(vm_id[b:b + 1] @ p["pa_w"] + p["pa_b"])   # (1, E)
        w = jax.nn.softmax(out1 @ qvec.T, axis=0)                 # (S, 1)
        ctx = jnp.sum(w * out1, axis=0, keepdims=True)            # (1, E)
        f2 = (jnp.maximum(ctx @ p["ffn2_w1"] + p["ffn2_b1"], 0.0)
              @ p["ffn2_w2"] + p["ffn2_b2"])
        outs.append(ln(f2 + ctx, p["ln2_g"], p["ln2_b"]))
    return jnp.concatenate(outs, axis=0)                          # (B, E)


if __name__ == "__main__":
    key = jax.random.PRNGKey(0)
    k_in, k_vm, k_par, k_in2, k_vm2 = jax.random.split(key, 5)

    params = init_params(k_par)
    w_slab, v_slab = jax.block_until_ready(pack_params(params))   # packed once, outside jit
    fwd = jax.jit(config_encoder_forward)

    # --- small-shape check: B=2 (one grid tile, padded) ---
    B = 2
    config_input = jax.random.randint(k_in, (B, SEQ), 0, WORDS, dtype=jnp.int32)
    vm_id = jax.random.normal(k_vm, (B, QUERY_SIZE), dtype=jnp.float32)
    out = jax.block_until_ready(fwd(config_input, vm_id, w_slab, v_slab))
    assert out.shape == (B, EMB) and out.dtype == jnp.float32
    assert bool(jnp.all(jnp.isfinite(out)))
    ref = reference_forward(config_input, vm_id, params)
    err = float(jnp.max(jnp.abs(out - ref)))
    # bf16 matmul operands + approx EUP reciprocal vs. the f32 reference -> ~1e-2 deviation
    assert bool(jnp.allclose(out, ref, atol=4e-2, rtol=4e-2)), f"max|diff|={err}"

    # --- multi-tile check: B=40 -> 3 parallel grid tiles (spot-check a few rows) ---
    B2 = 40
    cfg2 = jax.random.randint(k_in2, (B2, SEQ), 0, WORDS, dtype=jnp.int32)
    vm2 = jax.random.normal(k_vm2, (B2, QUERY_SIZE), dtype=jnp.float32)
    out2 = jax.block_until_ready(fwd(cfg2, vm2, w_slab, v_slab))
    assert out2.shape == (B2, EMB)
    idx = jnp.array([0, 17, 39])
    ref2 = reference_forward(cfg2[idx], vm2[idx], params)
    err2 = float(jnp.max(jnp.abs(out2[idx] - ref2)))
    assert bool(jnp.allclose(out2[idx], ref2, atol=4e-2, rtol=4e-2)), f"max|diff|={err2}"

    print("KERNEL_OK")
</pallas_src>

<mosaic_0001>
module attributes {stable_mosaic.version = 11 : i64} {
  func.func @config_encoder_kernel(%arg0: i32, %arg1: memref<128x1xi32, #tpu.memory_space<vmem>>, %arg2: memref<16x16xf32, #tpu.memory_space<vmem>>, %arg3: memref<336x128xbf16, #tpu.memory_space<vmem>>, %arg4: memref<120x128xf32, #tpu.memory_space<vmem>>, %arg5: memref<16x32xf32, #tpu.memory_space<vmem>>) attributes {dimension_semantics = [#tpu.dimension_semantics<parallel>], iteration_bounds = array<i64: 1>, scalar_prefetch = 0 : i64, scratch_operands = 0 : i64, tpu.core_type = #tpu.core_type<tc>, window_params = [{transform_indices = @transform_0, window_bounds = array<i64: 128, 1>}, {transform_indices = @transform_1, window_bounds = array<i64: 16, 16>}, {pipeline_mode = #tpu.pipeline_mode<synchronous>, transform_indices = @transform_2, window_bounds = array<i64: 336, 128>}, {pipeline_mode = #tpu.pipeline_mode<synchronous>, transform_indices = @transform_3, window_bounds = array<i64: 120, 128>}, {transform_indices = @transform_4, window_bounds = array<i64: 16, 32>}]} {
    %c0 = arith.constant 0 : index
    %c0_0 = arith.constant 0 : index
    %0 = vector.load %arg1[%c0, %c0_0] : memref<128x1xi32, #tpu.memory_space<vmem>>, vector<128x1xi32>
    %1 = tpu.iota {dimensions = array<i32: 1>} : vector<128x64xi32>
    %2 = vector.broadcast %0 : vector<128x1xi32> to vector<128x64xi32>
    %3 = arith.cmpi eq, %1, %2 : vector<128x64xi32>
    %4 = arith.extui %3 : vector<128x64xi1> to vector<128x64xi32>
    %5 = arith.sitofp %4 : vector<128x64xi32> to vector<128x64xf32>
    %6 = arith.truncf %5 : vector<128x64xf32> to vector<128x64xbf16>
    %c0_1 = arith.constant 0 : index
    %c0_2 = arith.constant 0 : index
    %7 = vector.load %arg3[%c0_1, %c0_2] : memref<336x128xbf16, #tpu.memory_space<vmem>>, vector<64x96xbf16>
    %cst = arith.constant dense<0.000000e+00> : vector<128x96xf32>
    %8 = tpu.matmul %6, %7, %cst {dimension_numbers = #tpu.dot_dimension_numbers<[1], [0], [0], [1], [0, 0, 1, 1], [], []>} : vector<128x64xbf16>, vector<64x96xbf16>, vector<128x96xf32> -> vector<128x96xf32>
    %c0_3 = arith.constant 0 : index
    %c0_4 = arith.constant 0 : index
    %9 = vector.load %arg4[%c0_3, %c0_4] : memref<120x128xf32, #tpu.memory_space<vmem>>, vector<1x96xf32>
    %10 = vector.broadcast %9 : vector<1x96xf32> to vector<128x96xf32>
    %11 = arith.addf %8, %10 : vector<128x96xf32>
    %12 = vector.extract_strided_slice %11 {offsets = [0, 0], sizes = [128, 32], strides = [1, 1]} : vector<128x96xf32> to vector<128x32xf32>
    %13 = vector.shape_cast %12 : vector<128x32xf32> to vector<16x8x32xf32>
    %14 = arith.truncf %13 : vector<16x8x32xf32> to vector<16x8x32xbf16>
    %15 = vector.extract_strided_slice %11 {offsets = [0, 32], sizes = [128, 32], strides = [1, 1]} : vector<128x96xf32> to vector<128x32xf32>
    %16 = vector.shape_cast %15 : vector<128x32xf32> to vector<16x8x32xf32>
    %17 = vector.extract_strided_slice %11 {offsets = [0, 64], sizes = [128, 32], strides = [1, 1]} : vector<128x96xf32> to vector<128x32xf32>
    %18 = vector.shape_cast %17 : vector<128x32xf32> to vector<16x8x32xf32>
    %c88 = arith.constant 88 : index
    %c0_5 = arith.constant 0 : index
    %19 = vector.load %arg4[%c88, %c0_5] : memref<120x128xf32, #tpu.memory_space<vmem>>, vector<32x32xf32>
    %20 = tpu.concatenate %16, %16, %16, %16 in 1 : vector<16x8x32xf32>, vector<16x8x32xf32>, vector<16x8x32xf32>, vector<16x8x32xf32> -> vector<16x32x32xf32>
    %21 = vector.shape_cast %19 : vector<32x32xf32> to vector<1x32x32xf32>
    %22 = vector.broadcast %21 : vector<1x32x32xf32> to vector<16x32x32xf32>
    %23 = arith.mulf %20, %22 : vector<16x32x32xf32>
    %24 = arith.truncf %23 : vector<16x32x32xf32> to vector<16x32x32xbf16>
    %25 = tpu.concatenate %18, %18, %18, %18 in 1 : vector<16x8x32xf32>, vector<16x8x32xf32>, vector<16x8x32xf32>, vector<16x8x32xf32> -> vector<16x32x32xf32>
    %26 = vector.shape_cast %19 : vector<32x32xf32> to vector<1x32x32xf32>
    %27 = vector.broadcast %26 : vector<1x32x32xf32> to vector<16x32x32xf32>
    %28 = arith.mulf %25, %27 : vector<16x32x32xf32>
    %29 = arith.truncf %28 : vector<16x32x32xf32> to vector<16x32x32xbf16>
    "tpu.trace_start"() <{level = 10 : i32, message = "bqd,bkd->bqk"}> : () -> ()
    %cst_6 = arith.constant dense<0.000000e+00> : vector<16x8x32xf32>
    %30 = tpu.matmul %14, %24, %cst_6 {dimension_numbers = #tpu.dot_dimension_numbers<[2], [2], [1], [1], [0, 0, 0, 1, 1, 1], [0], [0]>} : vector<16x8x32xbf16>, vector<16x32x32xbf16>, vector<16x8x32xf32> -> vector<16x8x32xf32>
    "tpu.trace_stop"() : () -> ()
    %cst_7 = arith.constant 0.353553385 : f32
    %31 = vector.broadcast %cst_7 : f32 to vector<16x8x32xf32>
    %32 = arith.mulf %30, %31 : vector<16x8x32xf32>
    %cst_8 = arith.constant dense<0xFF800000> : vector<16x8xf32>
    %33 = vector.multi_reduction <maximumf>, %32, %cst_8 [2] : vector<16x8x32xf32> to vector<16x8xf32>
    %34 = vector.shape_cast %33 : vector<16x8xf32> to vector<16x8x1xf32>
    %35 = vector.broadcast %34 : vector<16x8x1xf32> to vector<16x8x32xf32>
    %36 = arith.subf %32, %35 : vector<16x8x32xf32>
    %37 = math.exp %36 : vector<16x8x32xf32>
    %38 = vector.shape_cast %37 : vector<16x8x32xf32> to vector<128x32xf32>
    %39 = arith.truncf %38 : vector<128x32xf32> to vector<128x32xbf16>
    %c304 = arith.constant 304 : index
    %c0_9 = arith.constant 0 : index
    %40 = vector.load %arg3[%c304, %c0_9] : memref<336x128xbf16, #tpu.memory_space<vmem>>, vector<32x32xbf16>
    %cst_10 = arith.constant dense<0.000000e+00> : vector<128x32xf32>
    %41 = tpu.matmul %39, %40, %cst_10 {dimension_numbers = #tpu.dot_dimension_numbers<[1], [0], [0], [1], [0, 0, 1, 1], [], []>} : vector<128x32xbf16>, vector<32x32xbf16>, vector<128x32xf32> -> vector<128x32xf32>
    %42 = vector.shape_cast %41 : vector<128x32xf32> to vector<16x8x32xf32>
    %cst_11 = arith.constant 9.99999968E-21 : f32
    %43 = vector.broadcast %cst_11 : f32 to vector<16x8x32xf32>
    %44 = arith.maximumf %42, %43 : vector<16x8x32xf32>
    %45 = tpu.reciprocal %44 {approx = true} : vector<16x8x32xf32> -> vector<16x8x32xf32>
    %46 = arith.mulf %37, %45 : vector<16x8x32xf32>
    %47 = arith.truncf %46 : vector<16x8x32xf32> to vector<16x8x32xbf16>
    "tpu.trace_start"() <{level = 10 : i32, message = "bqk,bkd->bqd"}> : () -> ()
    %cst_12 = arith.constant dense<0.000000e+00> : vector<16x8x32xf32>
    %48 = tpu.matmul %47, %29, %cst_12 {dimension_numbers = #tpu.dot_dimension_numbers<[2], [1], [1], [2], [0, 0, 0, 1, 1, 2], [0], [0]>} : vector<16x8x32xbf16>, vector<16x32x32xbf16>, vector<16x8x32xf32> -> vector<16x8x32xf32>
    "tpu.trace_stop"() : () -> ()
    %49 = vector.shape_cast %48 : vector<16x8x32xf32> to vector<128x32xf32>
    %50 = arith.truncf %49 : vector<128x32xf32> to vector<128x32xbf16>
    %c64 = arith.constant 64 : index
    %c0_13 = arith.constant 0 : index
    %51 = vector.load %arg3[%c64, %c0_13] : memref<336x128xbf16, #tpu.memory_space<vmem>>, vector<32x32xbf16>
    %cst_14 = arith.constant dense<0.000000e+00> : vector<128x32xf32>
    %52 = tpu.matmul %50, %51, %cst_14 {dimension_numbers = #tpu.dot_dimension_numbers<[1], [0], [0], [1], [0, 0, 1, 1], [], []>} : vector<128x32xbf16>, vector<32x32xbf16>, vector<128x32xf32> -> vector<128x32xf32>
    %c8 = arith.constant 8 : index
    %c0_15 = arith.constant 0 : index
    %53 = vector.load %arg4[%c8, %c0_15] : memref<120x128xf32, #tpu.memory_space<vmem>>, vector<1x32xf32>
    %54 = vector.broadcast %53 : vector<1x32xf32> to vector<128x32xf32>
    %55 = arith.addf %52, %54 : vector<128x32xf32>
    %56 = arith.truncf %55 : vector<128x32xf32> to vector<128x32xbf16>
    %c96 = arith.constant 96 : index
    %c0_16 = arith.constant 0 : index
    %57 = vector.load %arg3[%c96, %c0_16] : memref<336x128xbf16, #tpu.memory_space<vmem>>, vector<32x64xbf16>
    %cst_17 = arith.constant dense<0.000000e+00> : vector<128x64xf32>
    %58 = tpu.matmul %56, %57, %cst_17 {dimension_numbers = #tpu.dot_dimension_numbers<[1], [0], [0], [1], [0, 0, 1, 1], [], []>} : vector<128x32xbf16>, vector<32x64xbf16>, vector<128x64xf32> -> vector<128x64xf32>
    %c16 = arith.constant 16 : index
    %c0_18 = arith.constant 0 : index
    %59 = vector.load %arg4[%c16, %c0_18] : memref<120x128xf32, #tpu.memory_space<vmem>>, vector<1x64xf32>
    %60 = vector.broadcast %59 : vector<1x64xf32> to vector<128x64xf32>
    %61 = arith.addf %58, %60 : vector<128x64xf32>
    %cst_19 = arith.constant 0.000000e+00 : f32
    %62 = vector.broadcast %cst_19 : f32 to vector<128x64xf32>
    %63 = arith.maximumf %61, %62 : vector<128x64xf32>
    %64 = arith.truncf %63 : vector<128x64xf32> to vector<128x64xbf16>
    %c128 = arith.constant 128 : index
    %c0_20 = arith.constant 0 : index
    %65 = vector.load %arg3[%c128, %c0_20] : memref<336x128xbf16, #tpu.memory_space<vmem>>, vector<64x32xbf16>
    %cst_21 = arith.constant dense<0.000000e+00> : vector<128x32xf32>
    %66 = tpu.matmul %64, %65, %cst_21 {dimension_numbers = #tpu.dot_dimension_numbers<[1], [0], [0], [1], [0, 0, 1, 1], [], []>} : vector<128x64xbf16>, vector<64x32xbf16>, vector<128x32xf32> -> vector<128x32xf32>
    %c24 = arith.constant 24 : index
    %c0_22 = arith.constant 0 : index
    %67 = vector.load %arg4[%c24, %c0_22] : memref<120x128xf32, #tpu.memory_space<vmem>>, vector<1x32xf32>
    %68 = vector.broadcast %67 : vector<1x32xf32> to vector<128x32xf32>
    %69 = arith.addf %66, %68 : vector<128x32xf32>
    %70 = arith.addf %69, %55 : vector<128x32xf32>
    %c32 = arith.constant 32 : index
    %c0_23 = arith.constant 0 : index
    %71 = vector.load %arg4[%c32, %c0_23] : memref<120x128xf32, #tpu.memory_space<vmem>>, vector<1x32xf32>
    %c40 = arith.constant 40 : index
    %c0_24 = arith.constant 0 : index
    %72 = vector.load %arg4[%c40, %c0_24] : memref<120x128xf32, #tpu.memory_space<vmem>>, vector<1x32xf32>
    %cst_25 = arith.constant dense<0.000000e+00> : vector<128xf32>
    %73 = vector.multi_reduction <add>, %70, %cst_25 [1] : vector<128x32xf32> to vector<128xf32>
    %74 = vector.shape_cast %73 : vector<128xf32> to vector<128x1xf32>
    %cst_26 = arith.constant 3.200000e+01 : f32
    %75 = vector.broadcast %cst_26 : f32 to vector<128x1xf32>
    %76 = arith.divf %74, %75 : vector<128x1xf32>
    %77 = vector.broadcast %76 : vector<128x1xf32> to vector<128x32xf32>
    %78 = arith.subf %70, %77 : vector<128x32xf32>
    %79 = arith.mulf %78, %78 : vector<128x32xf32>
    %cst_27 = arith.constant dense<0.000000e+00> : vector<128xf32>
    %80 = vector.multi_reduction <add>, %79, %cst_27 [1] : vector<128x32xf32> to vector<128xf32>
    %81 = vector.shape_cast %80 : vector<128xf32> to vector<128x1xf32>
    %cst_28 = arith.constant 3.200000e+01 : f32
    %82 = vector.broadcast %cst_28 : f32 to vector<128x1xf32>
    %83 = arith.divf %81, %82 : vector<128x1xf32>
    %84 = vector.broadcast %76 : vector<128x1xf32> to vector<128x32xf32>
    %85 = arith.subf %70, %84 : vector<128x32xf32>
    %cst_29 = arith.constant 9.99999974E-6 : f32
    %86 = vector.broadcast %cst_29 : f32 to vector<128x1xf32>
    %87 = arith.addf %83, %86 : vector<128x1xf32>
    %88 = math.rsqrt %87 : vector<128x1xf32>
    %89 = vector.broadcast %88 : vector<128x1xf32> to vector<128x32xf32>
    %90 = arith.mulf %85, %89 : vector<128x32xf32>
    %91 = vector.broadcast %71 : vector<1x32xf32> to vector<128x32xf32>
    %92 = arith.mulf %90, %91 : vector<128x32xf32>
    %93 = vector.broadcast %72 : vector<1x32xf32> to vector<128x32xf32>
    %94 = arith.addf %92, %93 : vector<128x32xf32>
    %c0_30 = arith.constant 0 : index
    %c0_31 = arith.constant 0 : index
    %95 = vector.load %arg2[%c0_30, %c0_31] : memref<16x16xf32, #tpu.memory_space<vmem>>, vector<16x16xf32>
    %96 = arith.truncf %95 : vector<16x16xf32> to vector<16x16xbf16>
    %c192 = arith.constant 192 : index
    %c0_32 = arith.constant 0 : index
    %97 = vector.load %arg3[%c192, %c0_32] : memref<336x128xbf16, #tpu.memory_space<vmem>>, vector<16x32xbf16>
    %cst_33 = arith.constant dense<0.000000e+00> : vector<16x32xf32>
    %98 = tpu.matmul %96, %97, %cst_33 {dimension_numbers = #tpu.dot_dimension_numbers<[1], [0], [0], [1], [0, 0, 1, 1], [], []>} : vector<16x16xbf16>, vector<16x32xbf16>, vector<16x32xf32> -> vector<16x32xf32>
    %c48 = arith.constant 48 : index
    %c0_34 = arith.constant 0 : index
    %99 = vector.load %arg4[%c48, %c0_34] : memref<120x128xf32, #tpu.memory_space<vmem>>, vector<1x32xf32>
    %100 = vector.broadcast %99 : vector<1x32xf32> to vector<16x32xf32>
    %101 = arith.addf %98, %100 : vector<16x32xf32>
    %102 = math.tanh %101 : vector<16x32xf32>
    %103 = vector.shape_cast %94 : vector<128x32xf32> to vector<16x8x32xf32>
    %104 = vector.shape_cast %102 : vector<16x32xf32> to vector<16x1x32xf32>
    %105 = vector.broadcast %104 : vector<16x1x32xf32> to vector<16x8x32xf32>
    %106 = arith.mulf %103, %105 : vector<16x8x32xf32>
    %cst_35 = arith.constant dense<0.000000e+00> : vector<16x8xf32>
    %107 = vector.multi_reduction <add>, %106, %cst_35 [2] : vector<16x8x32xf32> to vector<16x8xf32>
    %108 = vector.shape_cast %107 : vector<16x8xf32> to vector<16x8x1xf32>
    %cst_36 = arith.constant dense<0xFF800000> : vector<16x1xf32>
    %109 = vector.multi_reduction <maximumf>, %108, %cst_36 [1] : vector<16x8x1xf32> to vector<16x1xf32>
    %110 = vector.shape_cast %109 : vector<16x1xf32> to vector<16x1x1xf32>
    %111 = vector.broadcast %110 : vector<16x1x1xf32> to vector<16x8x1xf32>
    %112 = arith.subf %108, %111 : vector<16x8x1xf32>
    %113 = math.exp %112 : vector<16x8x1xf32>
    %cst_37 = arith.constant dense<0.000000e+00> : vector<16x1xf32>
    %114 = vector.multi_reduction <add>, %113, %cst_37 [1] : vector<16x8x1xf32> to vector<16x1xf32>
    %115 = vector.shape_cast %114 : vector<16x1xf32> to vector<16x1x1xf32>
    %116 = vector.broadcast %115 : vector<16x1x1xf32> to vector<16x8x1xf32>
    %117 = arith.divf %113, %116 : vector<16x8x1xf32>
    %118 = vector.broadcast %117 : vector<16x8x1xf32> to vector<16x8x32xf32>
    %119 = arith.mulf %118, %103 : vector<16x8x32xf32>
    %cst_38 = arith.constant dense<0.000000e+00> : vector<16x32xf32>
    %120 = vector.multi_reduction <add>, %119, %cst_38 [1] : vector<16x8x32xf32> to vector<16x32xf32>
    %121 = arith.truncf %120 : vector<16x32xf32> to vector<16x32xbf16>
    %c208 = arith.constant 208 : index
    %c0_39 = arith.constant 0 : index
    %122 = vector.load %arg3[%c208, %c0_39] : memref<336x128xbf16, #tpu.memory_space<vmem>>, vector<32x64xbf16>
    %cst_40 = arith.constant dense<0.000000e+00> : vector<16x64xf32>
    %123 = tpu.matmul %121, %122, %cst_40 {dimension_numbers = #tpu.dot_dimension_numbers<[1], [0], [0], [1], [0, 0, 1, 1], [], []>} : vector<16x32xbf16>, vector<32x64xbf16>, vector<16x64xf32> -> vector<16x64xf32>
    %c56 = arith.constant 56 : index
    %c0_41 = arith.constant 0 : index
    %124 = vector.load %arg4[%c56, %c0_41] : memref<120x128xf32, #tpu.memory_space<vmem>>, vector<1x64xf32>
    %125 = vector.broadcast %124 : vector<1x64xf32> to vector<16x64xf32>
    %126 = arith.addf %123, %125 : vector<16x64xf32>
    %cst_42 = arith.constant 0.000000e+00 : f32
    %127 = vector.broadcast %cst_42 : f32 to vector<16x64xf32>
    %128 = arith.maximumf %126, %127 : vector<16x64xf32>
    %129 = arith.truncf %128 : vector<16x64xf32> to vector<16x64xbf16>
    %c240 = arith.constant 240 : index
    %c0_43 = arith.constant 0 : index
    %130 = vector.load %arg3[%c240, %c0_43] : memref<336x128xbf16, #tpu.memory_space<vmem>>, vector<64x32xbf16>
    %cst_44 = arith.constant dense<0.000000e+00> : vector<16x32xf32>
    %131 = tpu.matmul %129, %130, %cst_44 {dimension_numbers = #tpu.dot_dimension_numbers<[1], [0], [0], [1], [0, 0, 1, 1], [], []>} : vector<16x64xbf16>, vector<64x32xbf16>, vector<16x32xf32> -> vector<16x32xf32>
    %c64_45 = arith.constant 64 : index
    %c0_46 = arith.constant 0 : index
    %132 = vector.load %arg4[%c64_45, %c0_46] : memref<120x128xf32, #tpu.memory_space<vmem>>, vector<1x32xf32>
    %133 = vector.broadcast %132 : vector<1x32xf32> to vector<16x32xf32>
    %134 = arith.addf %131, %133 : vector<16x32xf32>
    %135 = arith.addf %134, %120 : vector<16x32xf32>
    %c72 = arith.constant 72 : index
    %c0_47 = arith.constant 0 : index
    %136 = vector.load %arg4[%c72, %c0_47] : memref<120x128xf32, #tpu.memory_space<vmem>>, vector<1x32xf32>
    %c80 = arith.constant 80 : index
    %c0_48 = arith.constant 0 : index
    %137 = vector.load %arg4[%c80, %c0_48] : memref<120x128xf32, #tpu.memory_space<vmem>>, vector<1x32xf32>
    %cst_49 = arith.constant dense<0.000000e+00> : vector<16xf32>
    %138 = vector.multi_reduction <add>, %135, %cst_49 [1] : vector<16x32xf32> to vector<16xf32>
    %139 = vector.shape_cast %138 : vector<16xf32> to vector<16x1xf32>
    %cst_50 = arith.constant 3.200000e+01 : f32
    %140 = vector.broadcast %cst_50 : f32 to vector<16x1xf32>
    %141 = arith.divf %139, %140 : vector<16x1xf32>
    %142 = vector.broadcast %141 : vector<16x1xf32> to vector<16x32xf32>
    %143 = arith.subf %135, %142 : vector<16x32xf32>
    %144 = arith.mulf %143, %143 : vector<16x32xf32>
    %cst_51 = arith.constant dense<0.000000e+00> : vector<16xf32>
    %145 = vector.multi_reduction <add>, %144, %cst_51 [1] : vector<16x32xf32> to vector<16xf32>
    %146 = vector.shape_cast %145 : vector<16xf32> to vector<16x1xf32>
    %cst_52 = arith.constant 3.200000e+01 : f32
    %147 = vector.broadcast %cst_52 : f32 to vector<16x1xf32>
    %148 = arith.divf %146, %147 : vector<16x1xf32>
    %149 = vector.broadcast %141 : vector<16x1xf32> to vector<16x32xf32>
    %150 = arith.subf %135, %149 : vector<16x32xf32>
    %cst_53 = arith.constant 9.99999974E-6 : f32
    %151 = vector.broadcast %cst_53 : f32 to vector<16x1xf32>
    %152 = arith.addf %148, %151 : vector<16x1xf32>
    %153 = math.rsqrt %152 : vector<16x1xf32>
    %154 = vector.broadcast %153 : vector<16x1xf32> to vector<16x32xf32>
    %155 = arith.mulf %150, %154 : vector<16x32xf32>
    %156 = vector.broadcast %136 : vector<1x32xf32> to vector<16x32xf32>
    %157 = arith.mulf %155, %156 : vector<16x32xf32>
    %158 = vector.broadcast %137 : vector<1x32xf32> to vector<16x32xf32>
    %159 = arith.addf %157, %158 : vector<16x32xf32>
    %c0_54 = arith.constant 0 : index
    %c0_55 = arith.constant 0 : index
    %160 = vector.load %arg5[%c0_54, %c0_55] : memref<16x32xf32, #tpu.memory_space<vmem>>, vector<16x32xf32>
    tpu.vector_store %arg5[%c0_54, %c0_55], %159 {strides = array<i32>} : memref<16x32xf32, #tpu.memory_space<vmem>>, vector<16x32xf32>,
    return
  }
  func.func @transform_0(%arg0: i32) -> (i32, i32) {
    %c0_i32 = arith.constant 0 : i32
    %c0_i32_0 = arith.constant 0 : i32
    return %arg0, %c0_i32 : i32, i32
  }
  func.func @transform_1(%arg0: i32) -> (i32, i32) {
    %c0_i32 = arith.constant 0 : i32
    %c0_i32_0 = arith.constant 0 : i32
    return %arg0, %c0_i32 : i32, i32
  }
  func.func @transform_2(%arg0: i32) -> (i32, i32) {
    %c0_i32 = arith.constant 0 : i32
    %c0_i32_0 = arith.constant 0 : i32
    %c0_i32_1 = arith.constant 0 : i32
    return %c0_i32, %c0_i32_0 : i32, i32
  }
  func.func @transform_3(%arg0: i32) -> (i32, i32) {
    %c0_i32 = arith.constant 0 : i32
    %c0_i32_0 = arith.constant 0 : i32
    %c0_i32_1 = arith.constant 0 : i32
    return %c0_i32, %c0_i32_0 : i32, i32
  }
  func.func @transform_4(%arg0: i32) -> (i32, i32) {
    %c0_i32 = arith.constant 0 : i32
    %c0_i32_0 = arith.constant 0 : i32
    return %arg0, %c0_i32 : i32, i32
  }
}

</mosaic_0001>

<bundles_post_ra>
// kernel: config_encoder_forward.1
= control target key start
LH: loop header
LB: loop body
LE: loop exit
PB: predicated region body
PF: predicated region fallthrough
CT: control target
= control target key end

     0   :  { %9 = vsyncpa [#allocation3], 0  ;;  %s5229_s15 = smov [#allocation2]   ;;  %s6901_s0 = inlined_call_operand.vmem [shape: s32[128,1], index: 0, kind: input, shape index: {}]   ;;  %s6902_s1 = inlined_call_operand.vmem [shape: f32[16,16], index: 1, kind: input, shape index: {}]   ;;  %s6903_s2 = inlined_call_operand.vmem [shape: bf16[336,128], index: 2, kind: input, shape index: {}]   ;;  %s6904_s3 = inlined_call_operand.hbm [shape: f32[120,128], index: 3, kind: input, shape index: {}]   ;;  %s6905_s4 = inlined_call_operand.vmem [shape: f32[16,32], index: 4, kind: output, shape index: {}]  }
   0x1   :  { %s21_s16 = sshll.u32 %s5229_s15, 4  ;;  %s5205_s19 = scalar_lea.hbm %s6904_s3, 1920  ;;  %s22_s16 = int_to_ptr.vmem [resolvable:$true] %s21_s16 }
   0x2   :  { %p5206_p0 = scmp.ne.s32.totalorder %s6904_s3, %s5205_s19  ;;  %p5209_p1 = scmp.lt.u32.totalorder %s5205_s19, %s6904_s3 }
   0x4   :  { %p5211_p2 = pnand %p5209_p1, %p5206_p0 }
   0x6   :  { %5214 = shalt.err (!%p5211_p2)
}
   0x7   :  { %s5215_s24 = scalar_lea.vmem %s22_s16, 1920  ;;  %p5220_p4 = scmp.lt.s32.totalorder %s22_s16, %s22_s16 }
   0x8   :  { %p5216_p3 = scmp.ne.s32.totalorder %s22_s16, %s5215_s24  ;;  %p5221_p5 = scmp.lt.s32.totalorder %s5215_s24, %s5215_s24 }
   0xa   :  { %p5222_p6 = por %p5221_p5, %p5220_p4 }
   0xc   :  { %p5223_p7 = pnand %p5222_p6, %p5216_p3 }
   0xe   :  { %5226 = shalt.err (!%p5223_p7)
}
   0xf   :  { %s5230_s25 = smov 128   ;;  %s5231_s26 = smov 8  }
  0x10   :  { %27 = dma.hbm_to_vmem [thread:$0]  %s6904_s3, 1920, %s22_s16, [#allocation3], %s5230_s25, %s5230_s25, %s5231_s26  }
  0x11   :  { %5227 = dma.done.wait [#allocation3], 1920  }
  0x12   :  { %5228 = vsyncadd [#allocation3], 4294965376  ;;  %v5232_v0 = vmov 0   ;;  %v5233_v1 = vmov 0.0   ;;  %v34_v2 = vld [vmem:[%s6901_s0 + $0x10] sm:$0xff]  ;;  %v32_v3 = vld [vmem:[%s6901_s0] sm:$0xff]  ;;  %v48_v26 = vlaneseq }
  0x13   :  { %5011 = vset.pattern.permute.xlu1 %v5232_v0  ;;  %5010 = vset.pattern.permute.xlu0 %v5232_v0  ;;  %v35_v4 = vld [vmem:[%s6901_s0 + $0x18] sm:$0xff]  ;;  %v33_v5 = vld [vmem:[%s6901_s0 + $0x8] sm:$0xff]  ;;  %v36_v7 = vld [vmem:[%s6901_s0 + $0x20] sm:$0xff]  ;;  %s5234_s15 = smov 32   ;;  %vm191_vm4 = vcmask 523264   ;;  %s5237_s20 = smov 64  }
  0x14   :  { %4634 = vmatprep.subr.bf16.mxu1 %v5233_v1  ;;  %57 = vperm.xlu1 %5011, %v34_v2   ;;  %v37_v6 = vld [vmem:[%s6901_s0 + $0x28] sm:$0xff]  ;;  %v5012_v8 = vld [vmem:[%s6903_s2] sm:$0xff]   ;;  %v39_v10 = vld [vmem:[%s6901_s0 + $0x38] sm:$0xff]  ;;  %v5339_v27 = vand.u32 127, %v48_v26 }
  0x15   :  { %51 = vperm.xlu0 %5010, %v32_v3   ;;  %v5013_v9 = vld [vmem:[%s6903_s2 + $0x8] sm:$0xff]   ;;  %v38_v11 = vld [vmem:[%s6901_s0 + $0x30] sm:$0xff]  ;;  %4610 = vmatprep.subr.bf16.mxu0 %v5012_v8  ;;  %v40_v14 = vld [vmem:[%s6901_s0 + $0x40] sm:$0xff] }
  0x16   :  { %v5014_v12 = vld [vmem:[%s6903_s2 + $0x10] sm:$0xff]   ;;  %4611 = vmatpush3.bf16.msra.mxu0 %v5012_v8  ;;  %v41_v13 = vld [vmem:[%s6901_s0 + $0x48] sm:$0xff]  ;;  %v5015_v15 = vld [vmem:[%s6903_s2 + $0x18] sm:$0xff]  }
  0x17   :  { %4612 = vmatprep.subr.bf16.mxu0 %v5013_v9  ;;  %v43_v16 = vld [vmem:[%s6901_s0 + $0x58] sm:$0xff]  ;;  %v42_v17 = vld [vmem:[%s6901_s0 + $0x50] sm:$0xff]  ;;  %v45_v18 = vld [vmem:[%s6901_s0 + $0x68] sm:$0xff] }
  0x18   :  { %60 = vperm.xlu1 %5011, %v35_v4   ;;  %v44_v19 = vld [vmem:[%s6901_s0 + $0x60] sm:$0xff]  ;;  %v47_v20 = vld [vmem:[%s6901_s0 + $0x78] sm:$0xff]  ;;  %v46_v21 = vld [vmem:[%s6901_s0 + $0x70] sm:$0xff]  ;;  %s5235_s0 = smov 96  }
  0x19   :  { %54 = vperm.xlu0 %5010, %v33_v5   ;;  %v330_v22 = vld [vmem:[#allocation2 + $0x60] sm:$0xff]  ;;  %v329_v23 = vld [vmem:[#allocation2 + $0x58] sm:$0xff]  ;;  %v332_v24 = vld [vmem:[#allocation2 + $0x70] sm:$0xff] }
  0x1a   :  { %4613 = vmatpush3.bf16.msra.mxu0 %v5013_v9  ;;  %v331_v25 = vld [vmem:[#allocation2 + $0x68] sm:$0xff] }
  0x1b   :  { %4614 = vmatprep.subr.bf16.mxu0 %v5014_v12 }
  0x1c   :  { %66 = vperm.xlu1 %5011, %v37_v6  }
  0x1d   :  { %63 = vperm.xlu0 %5010, %v36_v7   ;;  %v5385_v7 = vld [vmem:[#allocation2] ss:$0 sm:$0xff] }
  0x1e   :  { %4615 = vmatpush3.bf16.msra.mxu0 %v5014_v12 }
  0x1f   :  { %4616 = vmatprep.subr.bf16.mxu0 %v5015_v15 }
  0x20   :  { %72 = vperm.xlu1 %5011, %v39_v10  }
  0x21   :  { %69 = vperm.xlu0 %5010, %v38_v11  }
  0x22   :  { %4617 = vmatpush3.bf16.msra.mxu0 %v5015_v15 }
  0x23   :  { %4650 = vmatprep.subr.bf16.mxu0 %v5233_v1 }
  0x24   :  { %78 = vperm.xlu1 %5011, %v41_v13  }
  0x25   :  { %75 = vperm.xlu0 %5010, %v40_v14  }
  0x28   :  { %84 = vperm.xlu1 %5011, %v43_v16  }
  0x29   :  { %81 = vperm.xlu0 %5010, %v42_v17  }
  0x2c   :  { %90 = vperm.xlu1 %5011, %v45_v18  }
  0x2d   :  { %87 = vperm.xlu0 %5010, %v44_v19  }
  0x30   :  { %96 = vperm.xlu1 %5011, %v47_v20  }
  0x31   :  { %93 = vperm.xlu0 %5010, %v46_v21  }
  0x34   :  { %339 = vrot.lane.b32.xlu1 %v330_v22, %s5234_s15 }
  0x35   :  { %337 = vrot.lane.b32.xlu0 %v329_v23, %s5234_s15 }
  0x38   :  { %343 = vrot.lane.b32.xlu1 %v332_v24, %s5234_s15 }
  0x39   :  { %341 = vrot.lane.b32.xlu0 %v331_v25, %s5234_s15 }
  0x93   :  { %v58_v28 = vpop.permute.xlu1 %57 }
  0x94   :  { %v52_v29 = vpop.permute.xlu0 %51  ;;  %vm100_vm0 = vcmp.eq.s32.totalorder %v5339_v27, %v58_v28 }
  0x95   :  { %vm98_vm1 = vcmp.eq.s32.totalorder %v5339_v27, %v52_v29  ;;  %v4329_v32 = vsel %vm100_vm0, 1.0, %v5233_v1 }
  0x96   :  { %v4327_v34 = vsel %vm98_vm1, 1.0, %v5233_v1  ;;  %vm5236_vm1 = vmmov 0  }
  0x97   :  { %v61_v30 = vpop.permute.xlu1 %60  ;;  %4638 = vmatprep.mubr.msk.bf16.mxu1 %vm5236_vm1, %v5233_v1 }
  0x98   :  { %v55_v31 = vpop.permute.xlu0 %54  ;;  %vm101_vm2 = vcmp.eq.s32.totalorder %v5339_v27, %v61_v30 }
  0x99   :  { %vm99_vm3 = vcmp.eq.s32.totalorder %v5339_v27, %v55_v31  ;;  %v4330_v33 = vsel %vm101_vm2, 1.0, %v5233_v1  ;;  %vm559_vm2 = vcmask 261120  }
  0x9a   :  { %v4328_v35 = vsel %vm99_vm3, 1.0, %v5233_v1  ;;  %v147_v36 = vpack.c.bf16 %v4330_v33, %v4329_v32  ;;  %vm3336_vm3 = vcmask 130048  }
  0x9b   :  { %v146_v37 = vpack.c.bf16 %v4328_v35, %v4327_v34  ;;  %v67_v38 = vpop.permute.xlu1 %66 }
  0x9c   :  { %v64_v39 = vpop.permute.xlu0 %63  ;;  %vm103_vm5 = vcmp.eq.s32.totalorder %v5339_v27, %v67_v38 }
  0x9d   :  { %vm102_vm6 = vcmp.eq.s32.totalorder %v5339_v27, %v64_v39  ;;  %4618 = vmatprep.mubr.msk.bf16.mxu0 %vm191_vm4, %v146_v37  ;;  %v4332_v40 = vsel %vm103_vm5, 1.0, %v5233_v1  ;;  %vm4084_vm5 = vcmask 1041409  }
  0x9e   :  { %v4331_v41 = vsel %vm102_vm6, 1.0, %v5233_v1  ;;  %4619 = vmatmul.mubr.msk.bf16.vlgmr.msra.gmra.mrb[0].mxu0 %vm191_vm4, %v147_v36  ;;  %vm4086_vm6 = vcmask 1042434  }
  0x9f   :  { %v148_v42 = vpack.c.bf16 %v4332_v40, %v4331_v41  ;;  %v73_v43 = vpop.permute.xlu1 %72 }
  0xa0   :  { %v70_v44 = vpop.permute.xlu0 %69  ;;  %vm105_vm7 = vcmp.eq.s32.totalorder %v5339_v27, %v73_v43 }
  0xa1   :  { %vm104_vm8 = vcmp.eq.s32.totalorder %v5339_v27, %v70_v44  ;;  %4622 = vmatprep.mubr.msk.bf16.mxu0 %vm191_vm4, %v148_v42  ;;  %v4334_v45 = vsel %vm105_vm7, 1.0, %v5233_v1  ;;  %vm4088_vm7 = vcmask 1043459  }
  0xa2   :  { %v4333_v46 = vsel %vm104_vm8, 1.0, %v5233_v1  ;;  %vm4090_vm8 = vcmask 1044484  }
  0xa3   :  { %v149_v47 = vpack.c.bf16 %v4334_v45, %v4333_v46  ;;  %v79_v48 = vpop.permute.xlu1 %78 }
  0xa4   :  { %v76_v49 = vpop.permute.xlu0 %75  ;;  %vm107_vm9 = vcmp.eq.s32.totalorder %v5339_v27, %v79_v48 }
  0xa5   :  { %vm106_vm10 = vcmp.eq.s32.totalorder %v5339_v27, %v76_v49  ;;  %v4336_v50 = vsel %vm107_vm9, 1.0, %v5233_v1  ;;  %vm4092_vm9 = vcmask 1045509  }
  0xa6   :  { %v4335_v51 = vsel %vm106_vm10, 1.0, %v5233_v1  ;;  %4623 = vmatmul.mubr.msk.bf16.gmra.mrb[4].mxu0 %vm191_vm4, %v149_v47  ;;  %vm4094_vm10 = vcmask 1046534  }
  0xa7   :  { %v150_v52 = vpack.c.bf16 %v4336_v50, %v4335_v51  ;;  %v85_v53 = vpop.permute.xlu1 %84 }
  0xa8   :  { %v82_v54 = vpop.permute.xlu0 %81  ;;  %vm109_vm11 = vcmp.eq.s32.totalorder %v5339_v27, %v85_v53 }
  0xa9   :  { %vm108_vm12 = vcmp.eq.s32.totalorder %v5339_v27, %v82_v54  ;;  %4626 = vmatprep.mubr.msk.bf16.mxu0 %vm191_vm4, %v150_v52  ;;  %v4338_v55 = vsel %vm109_vm11, 1.0, %v5233_v1  ;;  %vm4096_vm11 = vcmask 1047559  }
  0xaa   :  { %v4337_v56 = vsel %vm108_vm12, 1.0, %v5233_v1 }
  0xab   :  { %v151_v57 = vpack.c.bf16 %v4338_v55, %v4337_v56  ;;  %v91_v58 = vpop.permute.xlu1 %90 }
  0xac   :  { %v88_v59 = vpop.permute.xlu0 %87  ;;  %vm111_vm13 = vcmp.eq.s32.totalorder %v5339_v27, %v91_v58 }
  0xad   :  { %vm110_vm14 = vcmp.eq.s32.totalorder %v5339_v27, %v88_v59  ;;  %v4340_v60 = vsel %vm111_vm13, 1.0, %v5233_v1 }
  0xae   :  { %v4339_v61 = vsel %vm110_vm14, 1.0, %v5233_v1  ;;  %4627 = vmatmul.mubr.msk.bf16.gmra.mrb[8].mxu0 %vm191_vm4, %v151_v57 }
  0xaf   :  { %v152_v62 = vpack.c.bf16 %v4340_v60, %v4339_v61  ;;  %v97_v63 = vpop.permute.xlu1 %96 }
  0xb0   :  { %v94_v0 = vpop.permute.xlu0 %93  ;;  %vm113_vm15 = vcmp.eq.s32.totalorder %v5339_v27, %v97_v63 }
  0xb1   :  { %vm112_vm0 = vcmp.eq.s32.totalorder %v5339_v27, %v94_v0  ;;  %4630 = vmatprep.mubr.msk.bf16.mxu0 %vm191_vm4, %v152_v62  ;;  %v4342_v2 = vsel %vm113_vm15, 1.0, %v5233_v1 }
  0xb2   :  { %v4341_v3 = vsel %vm112_vm0, 1.0, %v5233_v1 }
  0xb3   :  { %v153_v4 = vpack.c.bf16 %v4342_v2, %v4341_v3  ;;  %v5383_v6 = vpop.permute.xlu1 %339 }
  0xb4   :  { %v5381_v5 = vpop.permute.xlu0 %337 }
  0xb6   :  { %4631 = vmatmul.mubr.msk.bf16.gmra.mrb[12].mxu0 %vm191_vm4, %v153_v4 }
  0xb7   :  { %v5392_v12 = vpop.permute.xlu1 %343  ;;  %4654 = vmatprep.mubr.msk.bf16.mxu0 %vm5236_vm1, %v5233_v1 }
  0xb8   :  { %v5387_v10 = vpop.permute.xlu0 %341 }
 0x171   :  { %v4620_v8 = vpop.f32.mrb[0].mxu0 }
 0x172   :  { %v250_v9 = vpop.f32.mrb[1].mxu0  ;;  %v5406_v20 = vadd.f32 %v4620_v8, %v5385_v7 }
 0x173   :  { %v5390_v11 = vadd.f32 %v5385_v7, %v250_v9  ;;  %v4621_v13 = vpop.f32.mrb[2].mxu0 }
 0x174   :  { %v253_v14 = vpop.f32.mrb[3].mxu0  ;;  %v5413_v24 = vadd.f32 %v4621_v13, %v5385_v7  ;;  %v357_v33 = vmul.f32 %v5381_v5, %v5406_v20  ;;  %v358_v34 = vmul.f32 %v5383_v6, %v5406_v20  ;;  %v359_v41 = vmul.f32 %v5387_v10, %v5406_v20 }
 0x175   :  { %v5395_v15 = vadd.f32 %v5385_v7, %v253_v14  ;;  %v349_v16 = vmul.f32 %v5381_v5, %v5390_v11  ;;  %v350_v17 = vmul.f32 %v5383_v6, %v5390_v11  ;;  %v351_v18 = vmul.f32 %v5387_v10, %v5390_v11 }
 0x176   :  { %v352_v19 = vmul.f32 %v5392_v12, %v5390_v11  ;;  %v361_v37 = vmul.f32 %v5381_v5, %v5413_v24  ;;  %v362_v38 = vmul.f32 %v5383_v6, %v5413_v24  ;;  %v417_v40 = vpack.c.bf16 %v358_v34, %v357_v33 }
 0x177   :  { %v413_v21 = vpack.c.bf16 %v350_v17, %v349_v16  ;;  %v353_v22 = vmul.f32 %v5381_v5, %v5395_v15  ;;  %v354_v23 = vmul.f32 %v5383_v6, %v5395_v15  ;;  %v355_v27 = vmul.f32 %v5387_v10, %v5395_v15 }
 0x178   :  { %v414_v25 = vpack.c.bf16 %v352_v19, %v351_v18  ;;  %v356_v28 = vmul.f32 %v5392_v12, %v5395_v15  ;;  %v360_v42 = vmul.f32 %v5392_v12, %v5406_v20  ;;  %v419_v44 = vpack.c.bf16 %v362_v38, %v361_v37 }
 0x179   :  { %v4624_v29 = vpop.f32.mrb[4].mxu0  ;;  %555 = vrot.lane.b32.xlu0 %v413_v21, %s5235_s0  ;;  %v415_v32 = vpack.c.bf16 %v354_v23, %v353_v22  ;;  %v363_v45 = vmul.f32 %v5387_v10, %v5413_v24  ;;  %v364_v46 = vmul.f32 %v5392_v12, %v5413_v24 }
 0x17a   :  { %557 = vrot.lane.b32.xlu1 %v414_v25, %s5235_s0  ;;  %v266_v30 = vpop.f32.mrb[5].mxu0  ;;  %v416_v36 = vpack.c.bf16 %v356_v28, %v355_v27  ;;  %v418_v50 = vpack.c.bf16 %v360_v42, %v359_v41  ;;  %v5462_v57 = vadd.f32 %v4624_v29, %v5385_v7 }
 0x17b   :  { %v4625_v31 = vpop.f32.mrb[6].mxu0  ;;  %v5436_v39 = vadd.f32 %v5385_v7, %v266_v30  ;;  %v420_v54 = vpack.c.bf16 %v364_v46, %v363_v45 }
 0x17c   :  { %v269_v35 = vpop.f32.mrb[7].mxu0  ;;  %v5469_v61 = vadd.f32 %v4625_v31, %v5385_v7  ;;  %v373_v9 = vmul.f32 %v5381_v5, %v5462_v57  ;;  %v374_v13 = vmul.f32 %v5383_v6, %v5462_v57  ;;  %v375_v22 = vmul.f32 %v5387_v10, %v5462_v57 }
 0x17d   :  { %611 = vrot.lane.b32.xlu0 %v415_v32, %s5235_s0  ;;  %v5443_v43 = vadd.f32 %v5385_v7, %v269_v35  ;;  %v365_v51 = vmul.f32 %v5381_v5, %v5436_v39  ;;  %v366_v52 = vmul.f32 %v5383_v6, %v5436_v39  ;;  %v367_v59 = vmul.f32 %v5387_v10, %v5436_v39 }
 0x17e   :  { %613 = vrot.lane.b32.xlu1 %v416_v36, %s5235_s0  ;;  %v368_v60 = vmul.f32 %v5392_v12, %v5436_v39  ;;  %v377_v17 = vmul.f32 %v5381_v5, %v5469_v61  ;;  %v378_v18 = vmul.f32 %v5383_v6, %v5469_v61  ;;  %v425_v21 = vpack.c.bf16 %v374_v13, %v373_v9 }
 0x17f   :  { %v369_v55 = vmul.f32 %v5381_v5, %v5443_v43  ;;  %v370_v56 = vmul.f32 %v5383_v6, %v5443_v43  ;;  %v421_v58 = vpack.c.bf16 %v366_v52, %v365_v51  ;;  %v371_v63 = vmul.f32 %v5387_v10, %v5443_v43 }
 0x180   :  { %v372_v0 = vmul.f32 %v5392_v12, %v5443_v43  ;;  %v422_v8 = vpack.c.bf16 %v368_v60, %v367_v59  ;;  %v376_v23 = vmul.f32 %v5392_v12, %v5462_v57  ;;  %v427_v27 = vpack.c.bf16 %v378_v18, %v377_v17 }
 0x181   :  { %v4628_v47 = vpop.f32.mrb[8].mxu0  ;;  %666 = vrot.lane.b32.xlu0 %v417_v40, %s5235_s0  ;;  %v423_v62 = vpack.c.bf16 %v370_v56, %v369_v55  ;;  %v379_v28 = vmul.f32 %v5387_v10, %v5469_v61  ;;  %v380_v29 = vmul.f32 %v5392_v12, %v5469_v61 }
 0x182   :  { %721 = vrot.lane.b32.xlu1 %v419_v44, %s5235_s0  ;;  %v282_v48 = vpop.f32.mrb[9].mxu0  ;;  %v424_v16 = vpack.c.bf16 %v372_v0, %v371_v63  ;;  %v426_v30 = vpack.c.bf16 %v376_v23, %v375_v22  ;;  %v5518_v36 = vadd.f32 %v4628_v47, %v5385_v7 }
 0x183   :  { %v4629_v49 = vpop.f32.mrb[10].mxu0  ;;  %v5492_v19 = vadd.f32 %v5385_v7, %v282_v48  ;;  %v428_v33 = vpack.c.bf16 %v380_v29, %v379_v28 }
 0x184   :  { %v285_v53 = vpop.f32.mrb[11].mxu0  ;;  %v5525_v41 = vadd.f32 %v4629_v49, %v5385_v7  ;;  %v389_v47 = vmul.f32 %v5381_v5, %v5518_v36  ;;  %v390_v48 = vmul.f32 %v5383_v6, %v5518_v36  ;;  %v392_v55 = vmul.f32 %v5392_v12, %v5518_v36 }
 0x185   :  { %668 = vrot.lane.b32.xlu0 %v418_v50, %s5235_s0  ;;  %v5499_v25 = vadd.f32 %v5385_v7, %v285_v53  ;;  %v381_v31 = vmul.f32 %v5381_v5, %v5492_v19  ;;  %v382_v32 = vmul.f32 %v5383_v6, %v5492_v19  ;;  %v383_v38 = vmul.f32 %v5387_v10, %v5492_v19 }
 0x186   :  { %723 = vrot.lane.b32.xlu1 %v420_v54, %s5235_s0  ;;  %v384_v40 = vmul.f32 %v5392_v12, %v5492_v19  ;;  %v393_v50 = vmul.f32 %v5381_v5, %v5525_v41  ;;  %v394_v51 = vmul.f32 %v5383_v6, %v5525_v41  ;;  %v433_v53 = vpack.c.bf16 %v390_v48, %v389_v47 }
 0x187   :  { %v385_v34 = vmul.f32 %v5381_v5, %v5499_v25  ;;  %v386_v35 = vmul.f32 %v5383_v6, %v5499_v25  ;;  %v429_v37 = vpack.c.bf16 %v382_v32, %v381_v31  ;;  %v387_v44 = vmul.f32 %v5387_v10, %v5499_v25 }
 0x188   :  { %v388_v45 = vmul.f32 %v5392_v12, %v5499_v25  ;;  %v430_v46 = vpack.c.bf16 %v384_v40, %v383_v38  ;;  %v391_v54 = vmul.f32 %v5387_v10, %v5518_v36  ;;  %v395_v59 = vmul.f32 %v5387_v10, %v5525_v41 }
 0x189   :  { %v5475_v2 = vpop.f32.mrb[12].mxu0  ;;  %776 = vrot.lane.b32.xlu0 %v421_v58, %s5235_s0  ;;  %v431_v42 = vpack.c.bf16 %v386_v35, %v385_v34  ;;  %v435_v58 = vpack.c.bf16 %v394_v51, %v393_v50  ;;  %v396_v60 = vmul.f32 %v5392_v12, %v5525_v41  ;;  %v315_v51 = vpack.c.bf16 %v5406_v20, %v5406_v20 }
 0x18a   :  { %831 = vrot.lane.b32.xlu1 %v423_v62, %s5235_s0  ;;  %v298_v3 = vpop.f32.mrb[13].mxu0  ;;  %v432_v49 = vpack.c.bf16 %v388_v45, %v387_v44  ;;  %v434_v62 = vpack.c.bf16 %v392_v55, %v391_v54  ;;  %v5571_v13 = vadd.f32 %v5475_v2, %v5385_v7 }
 0x18b   :  { %v5479_v4 = vpop.f32.mrb[14].mxu0  ;;  %v5544_v52 = vadd.f32 %v5385_v7, %v298_v3  ;;  %v436_v3 = vpack.c.bf16 %v396_v60, %v395_v59  ;;  %v314_v59 = vpack.c.bf16 %v5395_v15, %v5395_v15 }
 0x18c   :  { %v301_v14 = vpop.f32.mrb[15].mxu0  ;;  %v5579_v18 = vadd.f32 %v5479_v4, %v5385_v7  ;;  %v406_v28 = vmul.f32 %v5383_v6, %v5571_v13  ;;  %v407_v31 = vmul.f32 %v5387_v10, %v5571_v13  ;;  %v408_v32 = vmul.f32 %v5392_v12, %v5571_v13 }
 0x18d   :  { %778 = vrot.lane.b32.xlu0 %v422_v8, %s5235_s0  ;;  %v5551_v56 = vadd.f32 %v5385_v7, %v301_v14  ;;  %v397_v63 = vmul.f32 %v5381_v5, %v5544_v52  ;;  %v398_v0 = vmul.f32 %v5383_v6, %v5544_v52  ;;  %v400_v17 = vmul.f32 %v5392_v12, %v5544_v52 }
 0x18e   :  { %833 = vrot.lane.b32.xlu1 %v424_v16, %s5235_s0  ;;  %v399_v16 = vmul.f32 %v5387_v10, %v5544_v52  ;;  %v409_v4 = vmul.f32 %v5381_v5, %v5579_v18  ;;  %v410_v29 = vmul.f32 %v5383_v6, %v5579_v18  ;;  %v411_v34 = vmul.f32 %v5387_v10, %v5579_v18 }
 0x18f   :  { %v401_v8 = vmul.f32 %v5381_v5, %v5551_v56  ;;  %v402_v9 = vmul.f32 %v5383_v6, %v5551_v56  ;;  %v437_v14 = vpack.c.bf16 %v398_v0, %v397_v63  ;;  %v403_v22 = vmul.f32 %v5387_v10, %v5551_v56 }
 0x190   :  { %v404_v23 = vmul.f32 %v5392_v12, %v5551_v56  ;;  %v438_v2 = vpack.c.bf16 %v400_v17, %v399_v16  ;;  %v442_v6 = vpack.c.bf16 %v408_v32, %v407_v31  ;;  %v316_v17 = vpack.c.bf16 %v5413_v24, %v5413_v24 }
 0x191   :  { %886 = vrot.lane.b32.xlu0 %v425_v21, %s5235_s0  ;;  %v439_v21 = vpack.c.bf16 %v402_v9, %v401_v8 }
 0x192   :  { %941 = vrot.lane.b32.xlu1 %v427_v27, %s5235_s0  ;;  %v405_v27 = vmul.f32 %v5381_v5, %v5571_v13  ;;  %v440_v7 = vpack.c.bf16 %v404_v23, %v403_v22  ;;  %v412_v5 = vmul.f32 %v5392_v12, %v5579_v18 }
 0x194   :  { %v444_v35 = vpack.c.bf16 %v412_v5, %v411_v34  ;;  %v321_v5 = vpack.c.bf16 %v5492_v19, %v5492_v19 }
 0x195   :  { %888 = vrot.lane.b32.xlu0 %v426_v30, %s5235_s0  ;;  %v441_v30 = vpack.c.bf16 %v406_v28, %v405_v27  ;;  %v319_v27 = vpack.c.bf16 %v5462_v57, %v5462_v57 }
 0x196   :  { %943 = vrot.lane.b32.xlu1 %v428_v33, %s5235_s0  ;;  %v443_v33 = vpack.c.bf16 %v410_v29, %v409_v4 }
 0x199   :  { %996 = vrot.lane.b32.xlu0 %v429_v37, %s5235_s0 }
 0x19a   :  { %1051 = vrot.lane.b32.xlu1 %v431_v42, %s5235_s0 }
 0x19d   :  { %998 = vrot.lane.b32.xlu0 %v430_v46, %s5235_s0  ;;  %v313_v46 = vpack.c.bf16 %v5390_v11, %v5390_v11 }
 0x19e   :  { %1053 = vrot.lane.b32.xlu1 %v432_v49, %s5235_s0 }
 0x1a1   :  { %1106 = vrot.lane.b32.xlu0 %v433_v53, %s5235_s0 }
 0x1a2   :  { %1161 = vrot.lane.b32.xlu1 %v435_v58, %s5235_s0 }
 0x1a5   :  { %1108 = vrot.lane.b32.xlu0 %v434_v62, %s5235_s0 }
 0x1a6   :  { %1163 = vrot.lane.b32.xlu1 %v436_v3, %s5235_s0  ;;  %v317_v3 = vpack.c.bf16 %v5436_v39, %v5436_v39 }
 0x1a9   :  { %1216 = vrot.lane.b32.xlu0 %v437_v14, %s5235_s0 }
 0x1aa   :  { %1271 = vrot.lane.b32.xlu1 %v439_v21, %s5235_s0 }
 0x1ad   :  { %1218 = vrot.lane.b32.xlu0 %v438_v2, %s5235_s0 }
 0x1ae   :  { %1273 = vrot.lane.b32.xlu1 %v440_v7, %s5235_s0 }
 0x1b1   :  { %1326 = vrot.lane.b32.xlu0 %v441_v30, %s5235_s0  ;;  %v318_v30 = vpack.c.bf16 %v5443_v43, %v5443_v43 }
 0x1b2   :  { %1381 = vrot.lane.b32.xlu1 %v443_v33, %s5235_s0 }
 0x1b5   :  { %1328 = vrot.lane.b32.xlu0 %v442_v6, %s5235_s0 }
 0x1b6   :  { %1383 = vrot.lane.b32.xlu1 %v444_v35, %s5235_s0 }
 0x1eb   :  { %v556_v37 = vpop.permute.xlu0 %555 }
 0x1ec   :  { %v564_v38 = vsel %vm559_vm2, %v556_v37, 0  ;;  %v558_v40 = vpop.permute.xlu1 %557 }
 0x1ed   :  { %4635 = vmatpush3.bf16.xpose.msra.mxu1 %v564_v38  ;;  %v567_v44 = vsel %vm559_vm2, %v558_v40, 0 }
 0x1ee   :  { %4636 = vmatprep.subr.bf16.mxu1 %v5233_v1 }
 0x1ef   :  { %v612_v10 = vpop.permute.xlu0 %611 }
 0x1f0   :  { %v619_v47 = vsel %vm559_vm2, %v612_v10, 0  ;;  %v614_v49 = vpop.permute.xlu1 %613  ;;  %v320_v10 = vpack.c.bf16 %v5469_v61, %v5469_v61 }
 0x1f1   :  { %v622_v53 = vsel %vm559_vm2, %v614_v49, 0 }
 0x1f3   :  { %v667_v12 = vpop.permute.xlu0 %666 }
 0x1f4   :  { %v674_v42 = vsel %vm559_vm2, %v667_v12, 0  ;;  %v722_v55 = vpop.permute.xlu1 %721 }
 0x1f5   :  { %4637 = vmatpush3.bf16.xpose.msra.mxu1 %v567_v44  ;;  %4651 = vmatpush3.bf16.xpose.msra.mxu0 %v674_v42  ;;  %v729_v60 = vsel %vm559_vm2, %v722_v55, 0 }
 0x1f6   :  { %4642 = vmatprep.subr.bf16.mxu1 %v5233_v1  ;;  %4652 = vmatprep.subr.bf16.mxu0 %v5233_v1 }
 0x1f7   :  { %v669_v45 = vpop.permute.xlu0 %668 }
 0x1f8   :  { %v677_v48 = vsel %vm559_vm2, %v669_v45, 0  ;;  %v724_v63 = vpop.permute.xlu1 %723  ;;  %v323_v45 = vpack.c.bf16 %v5518_v36, %v5518_v36 }
 0x1f9   :  { %v732_v8 = vsel %vm559_vm2, %v724_v63, 0 }
 0x1fb   :  { %v777_v50 = vpop.permute.xlu0 %776 }
 0x1fc   :  { %4639 = vmatmul.mubr.msk.bf16.vlgmr.msra.gmra.mrb[0].mxu1 %vm559_vm2, %v313_v46  ;;  %v784_v54 = vsel %vm559_vm2, %v777_v50, 0  ;;  %v832_v14 = vpop.permute.xlu1 %831  ;;  %v322_v50 = vpack.c.bf16 %v5499_v25, %v5499_v25 }
 0x1fd   :  { %4643 = vmatpush3.bf16.xpose.msra.mxu1 %v619_v47  ;;  %4653 = vmatpush3.bf16.xpose.msra.mxu0 %v677_v48  ;;  %v839_v21 = vsel %vm559_vm2, %v832_v14, 0  ;;  %v327_v14 = vpack.c.bf16 %v5571_v13, %v5571_v13 }
 0x1fe   :  { %4644 = vmatprep.subr.bf16.mxu1 %v5233_v1  ;;  %4666 = vmatprep.subr.bf16.mxu0 %v5233_v1 }
 0x1ff   :  { %4646 = vmatprep.mubr.msk.bf16.mxu1 %vm5236_vm1, %v5233_v1  ;;  %v779_v58 = vpop.permute.xlu0 %778 }
 0x200   :  { %v787_v62 = vsel %vm559_vm2, %v779_v58, 0  ;;  %v834_v23 = vpop.permute.xlu1 %833  ;;  %v325_v58 = vpack.c.bf16 %v5544_v52, %v5544_v52 }
 0x201   :  { %v842_v28 = vsel %vm559_vm2, %v834_v23, 0 }
 0x203   :  { %v887_v0 = vpop.permute.xlu0 %886 }
 0x204   :  { %4655 = vmatmul.mubr.msk.bf16.vlgmr.msra.gmra.mrb[16].mxu0 %vm559_vm2, %v315_v51  ;;  %v894_v9 = vsel %vm559_vm2, %v887_v0, 0  ;;  %v942_v4 = vpop.permute.xlu1 %941  ;;  %v324_v0 = vpack.c.bf16 %v5525_v41, %v5525_v41 }
 0x205   :  { %4645 = vmatpush3.bf16.xpose.msra.mxu1 %v622_v53  ;;  %4667 = vmatpush3.bf16.xpose.msra.mxu0 %v784_v54  ;;  %v949_v31 = vsel %vm559_vm2, %v942_v4, 0 }
 0x206   :  { %4658 = vmatprep.subr.bf16.mxu1 %v5233_v1  ;;  %4668 = vmatprep.subr.bf16.mxu0 %v5233_v1 }
 0x207   :  { %4670 = vmatprep.mubr.msk.bf16.mxu0 %vm5236_vm1, %v5233_v1  ;;  %v889_v16 = vpop.permute.xlu0 %888 }
 0x208   :  { %v897_v22 = vsel %vm559_vm2, %v889_v16, 0  ;;  %v944_v33 = vpop.permute.xlu1 %943 }
 0x209   :  { %v952_v6 = vsel %vm559_vm2, %v944_v33, 0 }
 0x20b   :  { %v997_v2 = vpop.permute.xlu0 %996 }
 0x20c   :  { %4647 = vmatmul.mubr.msk.bf16.vlgmr.msra.gmra.mrb[4].mxu1 %vm559_vm2, %v314_v59  ;;  %v1004_v7 = vsel %vm559_vm2, %v997_v2, 0  ;;  %v1052_v37 = vpop.permute.xlu1 %1051 }
 0x20d   :  { %4659 = vmatpush3.bf16.xpose.msra.mxu1 %v729_v60  ;;  %4669 = vmatpush3.bf16.xpose.msra.mxu0 %v787_v62  ;;  %v1059_v40 = vsel %vm559_vm2, %v1052_v37, 0 }
 0x20e   :  { %4660 = vmatprep.subr.bf16.mxu1 %v5233_v1  ;;  %4682 = vmatprep.subr.bf16.mxu0 %v5233_v1 }
 0x20f   :  { %4662 = vmatprep.mubr.msk.bf16.mxu1 %vm5236_vm1, %v5233_v1  ;;  %v999_v29 = vpop.permute.xlu0 %998 }
 0x210   :  { %v1007_v32 = vsel %vm559_vm2, %v999_v29, 0  ;;  %v1054_v42 = vpop.permute.xlu1 %1053 }
 0x211   :  { %v1062_v46 = vsel %vm559_vm2, %v1054_v42, 0 }
 0x213   :  { %v1107_v34 = vpop.permute.xlu0 %1106 }
 0x214   :  { %4671 = vmatmul.mubr.msk.bf16.vlgmr.msra.gmra.mrb[20].mxu0 %vm559_vm2, %v317_v3  ;;  %v1114_v35 = vsel %vm559_vm2, %v1107_v34, 0  ;;  %v1162_v48 = vpop.permute.xlu1 %1161 }
 0x215   :  { %4661 = vmatpush3.bf16.xpose.msra.mxu1 %v732_v8  ;;  %4683 = vmatpush3.bf16.xpose.msra.mxu0 %v894_v9  ;;  %v1169_v51 = vsel %vm559_vm2, %v1162_v48, 0 }
 0x216   :  { %4674 = vmatprep.subr.bf16.mxu1 %v5233_v1  ;;  %4684 = vmatprep.subr.bf16.mxu0 %v5233_v1 }
 0x217   :  { %4686 = vmatprep.mubr.msk.bf16.mxu0 %vm5236_vm1, %v5233_v1  ;;  %v1109_v38 = vpop.permute.xlu0 %1108 }
 0x218   :  { %v1117_v12 = vsel %vm559_vm2, %v1109_v38, 0  ;;  %v1164_v54 = vpop.permute.xlu1 %1163 }
 0x219   :  { %v1172_v59 = vsel %vm559_vm2, %v1164_v54, 0 }
 0x21b   :  { %v1217_v44 = vpop.permute.xlu0 %1216 }
 0x21c   :  { %4663 = vmatmul.mubr.msk.bf16.vlgmr.msra.gmra.mrb[8].mxu1 %vm559_vm2, %v316_v17  ;;  %v1224_v47 = vsel %vm559_vm2, %v1217_v44, 0  ;;  %v1272_v62 = vpop.permute.xlu1 %1271 }
 0x21d   :  { %4675 = vmatpush3.bf16.xpose.msra.mxu1 %v839_v21  ;;  %4685 = vmatpush3.bf16.xpose.msra.mxu0 %v897_v22  ;;  %v1279_v3 = vsel %vm559_vm2, %v1272_v62, 0  ;;  %v326_v21 = vpack.c.bf16 %v5551_v56, %v5551_v56 }
 0x21e   :  { %4676 = vmatprep.subr.bf16.mxu1 %v5233_v1  ;;  %4698 = vmatprep.subr.bf16.mxu0 %v5233_v1 }
 0x21f   :  { %4678 = vmatprep.mubr.msk.bf16.mxu1 %vm5236_vm1, %v5233_v1  ;;  %v1219_v49 = vpop.permute.xlu0 %1218 }
 0x220   :  { %v1227_v53 = vsel %vm559_vm2, %v1219_v49, 0  ;;  %v1274_v9 = vpop.permute.xlu1 %1273 }
 0x221   :  { %v1282_v16 = vsel %vm559_vm2, %v1274_v9, 0 }
 0x223   :  { %v1327_v55 = vpop.permute.xlu0 %1326 }
 0x224   :  { %4687 = vmatmul.mubr.msk.bf16.vlgmr.msra.gmra.mrb[24].mxu0 %vm559_vm2, %v319_v27  ;;  %v1334_v60 = vsel %vm559_vm2, %v1327_v55, 0  ;;  %v1382_v17 = vpop.permute.xlu1 %1381  ;;  %v328_v27 = vpack.c.bf16 %v5579_v18, %v5579_v18 }
 0x225   :  { %4677 = vmatpush3.bf16.xpose.msra.mxu1 %v842_v28  ;;  %4699 = vmatpush3.bf16.xpose.msra.mxu0 %v1004_v7  ;;  %v1389_v22 = vsel %vm559_vm2, %v1382_v17, 0 }
 0x226   :  { %4690 = vmatprep.subr.bf16.mxu1 %v5233_v1  ;;  %4700 = vmatprep.subr.bf16.mxu0 %v5233_v1 }
 0x227   :  { %4702 = vmatprep.mubr.msk.bf16.mxu0 %vm5236_vm1, %v5233_v1  ;;  %v1329_v63 = vpop.permute.xlu0 %1328 }
 0x228   :  { %v1337_v8 = vsel %vm559_vm2, %v1329_v63, 0  ;;  %v1384_v23 = vpop.permute.xlu1 %1383 }
 0x229   :  { %v1392_v2 = vsel %vm559_vm2, %v1384_v23, 0 }
 0x22c   :  { %4679 = vmatmul.mubr.msk.bf16.vlgmr.msra.gmra.mrb[12].mxu1 %vm559_vm2, %v318_v30 }
 0x22d   :  { %4691 = vmatpush3.bf16.xpose.msra.mxu1 %v949_v31  ;;  %4701 = vmatpush3.bf16.xpose.msra.mxu0 %v1007_v32 }
 0x22e   :  { %4692 = vmatprep.subr.bf16.mxu1 %v5233_v1  ;;  %4714 = vmatprep.subr.bf16.mxu0 %v5233_v1 }
 0x22f   :  { %4694 = vmatprep.mubr.msk.bf16.mxu1 %vm5236_vm1, %v5233_v1 }
 0x234   :  { %4703 = vmatmul.mubr.msk.bf16.vlgmr.msra.gmra.mrb[28].mxu0 %vm559_vm2, %v321_v5 }
 0x235   :  { %4693 = vmatpush3.bf16.xpose.msra.mxu1 %v952_v6  ;;  %4715 = vmatpush3.bf16.xpose.msra.mxu0 %v1114_v35 }
 0x236   :  { %4706 = vmatprep.subr.bf16.mxu1 %v5233_v1  ;;  %4716 = vmatprep.subr.bf16.mxu0 %v5233_v1 }
 0x237   :  { %4718 = vmatprep.mubr.msk.bf16.mxu0 %vm5236_vm1, %v5233_v1 }
 0x23c   :  { %4695 = vmatmul.mubr.msk.bf16.vlgmr.msra.gmra.mrb[16].mxu1 %vm559_vm2, %v320_v10 }
 0x23d   :  { %4707 = vmatpush3.bf16.xpose.msra.mxu1 %v1059_v40  ;;  %4717 = vmatpush3.bf16.xpose.msra.mxu0 %v1117_v12 }
 0x23e   :  { %4708 = vmatprep.subr.bf16.mxu1 %v5233_v1  ;;  %4730 = vmatprep.subr.bf16.mxu0 %v5233_v1 }
 0x23f   :  { %4710 = vmatprep.mubr.msk.bf16.mxu1 %vm5236_vm1, %v5233_v1 }
 0x244   :  { %4719 = vmatmul.mubr.msk.bf16.vlgmr.msra.gmra.mrb[32].mxu0 %vm559_vm2, %v323_v45 }
 0x245   :  { %4709 = vmatpush3.bf16.xpose.msra.mxu1 %v1062_v46  ;;  %4731 = vmatpush3.bf16.xpose.msra.mxu0 %v1224_v47 }
 0x246   :  { %4722 = vmatprep.subr.bf16.mxu1 %v5233_v1  ;;  %4732 = vmatprep.subr.bf16.mxu0 %v5233_v1 }
 0x247   :  { %4734 = vmatprep.mubr.msk.bf16.mxu0 %vm5236_vm1, %v5233_v1 }
 0x24c   :  { %4711 = vmatmul.mubr.msk.bf16.vlgmr.msra.gmra.mrb[20].mxu1 %vm559_vm2, %v322_v50 }
 0x24d   :  { %4723 = vmatpush3.bf16.xpose.msra.mxu1 %v1169_v51  ;;  %4733 = vmatpush3.bf16.xpose.msra.mxu0 %v1227_v53 }
 0x24e   :  { %4724 = vmatprep.subr.bf16.mxu1 %v5233_v1  ;;  %4746 = vmatprep.subr.bf16.mxu0 %v5233_v1 }
 0x24f   :  { %4726 = vmatprep.mubr.msk.bf16.mxu1 %vm5236_vm1, %v5233_v1 }
 0x254   :  { %4735 = vmatmul.mubr.msk.bf16.vlgmr.msra.gmra.mrb[36].mxu0 %vm559_vm2, %v325_v58 }
 0x255   :  { %4725 = vmatpush3.bf16.xpose.msra.mxu1 %v1172_v59  ;;  %4747 = vmatpush3.bf16.xpose.msra.mxu0 %v1334_v60 }
 0x256   :  { %4738 = vmatprep.subr.bf16.mxu1 %v5233_v1  ;;  %4748 = vmatprep.subr.bf16.mxu0 %v5233_v1 }
 0x257   :  { %4750 = vmatprep.mubr.msk.bf16.mxu0 %vm5236_vm1, %v5233_v1 }
 0x25c   :  { %4727 = vmatmul.mubr.msk.bf16.vlgmr.msra.gmra.mrb[24].mxu1 %vm559_vm2, %v324_v0 }
 0x25d   :  { %4739 = vmatpush3.bf16.xpose.msra.mxu1 %v1279_v3  ;;  %4749 = vmatpush3.bf16.xpose.msra.mxu0 %v1337_v8 }
 0x25e   :  { %4740 = vmatprep.subr.bf16.mxu1 %v5233_v1  ;;  %4742 = vmatprep.mubr.msk.bf16.mxu1 %vm5236_vm1, %v5233_v1 }
 0x264   :  { %4751 = vmatmul.mubr.msk.bf16.vlgmr.msra.gmra.mrb[40].mxu0 %vm559_vm2, %v327_v14 }
 0x265   :  { %4741 = vmatpush3.bf16.xpose.msra.mxu1 %v1282_v16 }
 0x266   :  { %4754 = vmatprep.subr.bf16.mxu1 %v5233_v1 }
 0x26c   :  { %4743 = vmatmul.mubr.msk.bf16.vlgmr.msra.gmra.mrb[28].mxu1 %vm559_vm2, %v326_v21 }
 0x26d   :  { %4755 = vmatpush3.bf16.xpose.msra.mxu1 %v1389_v22  ;;  %4758 = vmatprep.mubr.msk.bf16.mxu1 %vm5236_vm1, %v5233_v1 }
 0x26e   :  { %4756 = vmatprep.subr.bf16.mxu1 %v5233_v1 }
 0x275   :  { %4757 = vmatpush3.bf16.xpose.msra.mxu1 %v1392_v2 }
 0x276   :  { %4782 = vmatprep.subr.bf16.mxu1 %v5233_v1 }
 0x27c   :  { %4759 = vmatmul.mubr.msk.bf16.vlgmr.msra.gmra.mrb[32].mxu1 %vm559_vm2, %v328_v27 }
 0x27d   :  { %4786 = vmatprep.mubr.msk.bf16.mxu1 %vm5236_vm1, %v5233_v1 }
 0x2cf   :  { %v603_v28 = vpop.f32.mrb[0].mxu1 }
 0x2d0   :  { %v5750_v7 = vmul.f32 0.35355338, %v603_v28  ;;  %v4640_v4 = vpop.f32.mrb[1].mxu1 }
 0x2d1   :  { %v606_v29 = vpop.f32.mrb[2].mxu1 }
 0x2d2   :  { %v4641_v30 = vpop.f32.mrb[3].mxu1  ;;  %v1450_v31 = vsel %vm559_vm2, %v5750_v7, -inf  ;;  %v5016_v29 = vld [vmem:[%s6903_s2 + $0x98] sm:$0xff]  }
 0x2d3   :  { %1451 = vmax.xlane.f32.xlu0 %v1450_v31  ;;  %v5017_v30 = vld [vmem:[%s6903_s2 + $0xa0] sm:$0xff]   ;;  %4762 = vmatprep.subr.bf16.mxu0 %v5016_v29 }
 0x2d4   :  { %4763 = vmatpush3.bf16.msra.mxu0 %v5016_v29 }
 0x2d5   :  { %4764 = vmatprep.subr.bf16.mxu0 %v5017_v30 }
 0x2d7   :  { %v713_v32 = vpop.f32.mrb[16].mxu0 }
 0x2d8   :  { %v5754_v33 = vmul.f32 0.35355338, %v713_v32  ;;  %v4656_v34 = vpop.f32.mrb[17].mxu0  ;;  %4765 = vmatpush3.bf16.msra.mxu0 %v5017_v30 }
 0x2d9   :  { %v716_v5 = vpop.f32.mrb[18].mxu0  ;;  %4814 = vmatprep.subr.bf16.mxu0 %v5233_v1 }
 0x2da   :  { %v4657_v6 = vpop.f32.mrb[19].mxu0  ;;  %v1456_v35 = vsel %vm559_vm2, %v5754_v33, -inf }
 0x2db   :  { %1457 = vmax.xlane.f32.xlu0 %v1456_v35 }
 0x2df   :  { %v658_v37 = vpop.f32.mrb[4].mxu1 }
 0x2e0   :  { %v5758_v38 = vmul.f32 0.35355338, %v658_v37  ;;  %v4648_v10 = vpop.f32.mrb[5].mxu1 }
 0x2e1   :  { %v661_v40 = vpop.f32.mrb[6].mxu1 }
 0x2e2   :  { %v4649_v12 = vpop.f32.mrb[7].mxu1  ;;  %v1453_v42 = vsel %vm559_vm2, %v5758_v38, -inf }
 0x2e3   :  { %1454 = vmax.xlane.f32.xlu1 %v1453_v42 }
 0x2e7   :  { %v823_v44 = vpop.f32.mrb[20].mxu0 }
 0x2e8   :  { %v5762_v45 = vmul.f32 0.35355338, %v823_v44  ;;  %v4672_v46 = vpop.f32.mrb[21].mxu0 }
 0x2e9   :  { %v826_v47 = vpop.f32.mrb[22].mxu0 }
 0x2ea   :  { %v4673_v48 = vpop.f32.mrb[23].mxu0  ;;  %v1462_v49 = vsel %vm559_vm2, %v5762_v45, -inf }
 0x2eb   :  { %1463 = vmax.xlane.f32.xlu1 %v1462_v49 }
 0x2ef   :  { %v768_v50 = vpop.f32.mrb[8].mxu1 }
 0x2f0   :  { %v5766_v51 = vmul.f32 0.35355338, %v768_v50  ;;  %v4664_v53 = vpop.f32.mrb[9].mxu1 }
 0x2f1   :  { %v771_v54 = vpop.f32.mrb[10].mxu1 }
 0x2f2   :  { %v4665_v55 = vpop.f32.mrb[11].mxu1  ;;  %v1459_v58 = vsel %vm559_vm2, %v5766_v51, -inf }
 0x2f3   :  { %1460 = vmax.xlane.f32.xlu0 %v1459_v58 }
 0x2f7   :  { %v933_v59 = vpop.f32.mrb[24].mxu0 }
 0x2f8   :  { %v5770_v60 = vmul.f32 0.35355338, %v933_v59  ;;  %v4688_v62 = vpop.f32.mrb[25].mxu0 }
 0x2f9   :  { %v936_v63 = vpop.f32.mrb[26].mxu0 }
 0x2fa   :  { %v4689_v0 = vpop.f32.mrb[27].mxu0  ;;  %v1468_v3 = vsel %vm559_vm2, %v5770_v60, -inf }
 0x2fb   :  { %1469 = vmax.xlane.f32.xlu1 %v1468_v3 }
 0x2ff   :  { %v878_v8 = vpop.f32.mrb[12].mxu1 }
 0x300   :  { %v5774_v9 = vmul.f32 0.35355338, %v878_v8  ;;  %v4680_v14 = vpop.f32.mrb[13].mxu1 }
 0x301   :  { %v881_v16 = vpop.f32.mrb[14].mxu1 }
 0x302   :  { %v4681_v17 = vpop.f32.mrb[15].mxu1  ;;  %v1465_v21 = vsel %vm559_vm2, %v5774_v9, -inf }
 0x303   :  { %1466 = vmax.xlane.f32.xlu0 %v1465_v21 }
 0x307   :  { %v1043_v22 = vpop.f32.mrb[28].mxu0 }
 0x308   :  { %v5778_v23 = vmul.f32 0.35355338, %v1043_v22  ;;  %v4704_v2 = vpop.f32.mrb[29].mxu0 }
 0x309   :  { %v1046_v27 = vpop.f32.mrb[30].mxu0 }
 0x30a   :  { %v4705_v28 = vpop.f32.mrb[31].mxu0  ;;  %v1474_v4 = vsel %vm559_vm2, %v5778_v23, -inf }
 0x30b   :  { %1475 = vmax.xlane.f32.xlu1 %v1474_v4 }
 0x30f   :  { %v988_v31 = vpop.f32.mrb[16].mxu1 }
 0x310   :  { %v5788_v32 = vmul.f32 0.35355338, %v988_v31  ;;  %v4696_v34 = vpop.f32.mrb[17].mxu1 }
 0x311   :  { %v991_v5 = vpop.f32.mrb[18].mxu1 }
 0x312   :  { %v4697_v6 = vpop.f32.mrb[19].mxu1  ;;  %v1471_v35 = vsel %vm559_vm2, %v5788_v32, -inf }
 0x313   :  { %1472 = vmax.xlane.f32.xlu0 %v1471_v35  ;;  %v5201_v35 = vld [vmem:[#allocation2 + $0x58] sm:$0xff] }
 0x317   :  { %v1153_v37 = vpop.f32.mrb[32].mxu0 }
 0x318   :  { %v5793_v10 = vmul.f32 0.35355338, %v1153_v37  ;;  %v4720_v40 = vpop.f32.mrb[33].mxu0 }
 0x319   :  { %v1156_v12 = vpop.f32.mrb[34].mxu0 }
 0x31a   :  { %v4721_v42 = vpop.f32.mrb[35].mxu0  ;;  %v1480_v44 = vsel %vm559_vm2, %v5793_v10, -inf }
 0x31b   :  { %1481 = vmax.xlane.f32.xlu1 %v1480_v44  ;;  %v5202_v42 = vld [vmem:[#allocation2 + $0x68] sm:$0xff] }
 0x31f   :  { %v1098_v46 = vpop.f32.mrb[20].mxu1 }
 0x320   :  { %v5797_v47 = vmul.f32 0.35355338, %v1098_v46  ;;  %v4712_v48 = vpop.f32.mrb[21].mxu1 }
 0x321   :  { %v1101_v49 = vpop.f32.mrb[22].mxu1 }
 0x322   :  { %v4713_v50 = vpop.f32.mrb[23].mxu1  ;;  %v1477_v53 = vsel %vm559_vm2, %v5797_v47, -inf  ;;  %v5203_v49 = vld [vmem:[#allocation2 + $0x70] sm:$0xff] }
 0x323   :  { %1478 = vmax.xlane.f32.xlu0 %v1477_v53  ;;  %v5204_v53 = vld [vmem:[#allocation2 + $0x60] sm:$0xff] }
 0x327   :  { %v1263_v54 = vpop.f32.mrb[36].mxu0 }
 0x328   :  { %v5801_v55 = vmul.f32 0.35355338, %v1263_v54  ;;  %v4736_v58 = vpop.f32.mrb[37].mxu0 }
 0x329   :  { %v1266_v59 = vpop.f32.mrb[38].mxu0 }
 0x32a   :  { %v4737_v62 = vpop.f32.mrb[39].mxu0  ;;  %v1486_v63 = vsel %vm559_vm2, %v5801_v55, -inf }
 0x32b   :  { %1487 = vmax.xlane.f32.xlu1 %v1486_v63 }
 0x32f   :  { %v1208_v0 = vpop.f32.mrb[24].mxu1 }
 0x330   :  { %v5805_v3 = vmul.f32 0.35355338, %v1208_v0  ;;  %v4728_v8 = vpop.f32.mrb[25].mxu1 }
 0x331   :  { %v1211_v14 = vpop.f32.mrb[26].mxu1 }
 0x332   :  { %v4729_v16 = vpop.f32.mrb[27].mxu1  ;;  %v1483_v17 = vsel %vm559_vm2, %v5805_v3, -inf }
 0x333   :  { %1484 = vmax.xlane.f32.xlu0 %v1483_v17 }
 0x337   :  { %v1373_v21 = vpop.f32.mrb[40].mxu0 }
 0x338   :  { %v5809_v22 = vmul.f32 0.35355338, %v1373_v21  ;;  %v4752_v2 = vpop.f32.mrb[41].mxu0 }
 0x339   :  { %v1376_v27 = vpop.f32.mrb[42].mxu0 }
 0x33a   :  { %v4753_v28 = vpop.f32.mrb[43].mxu0  ;;  %v1492_v4 = vsel %vm559_vm2, %v5809_v22, -inf }
 0x33b   :  { %1493 = vmax.xlane.f32.xlu1 %v1492_v4 }
 0x33f   :  { %v1318_v29 = vpop.f32.mrb[28].mxu1 }
 0x340   :  { %v5813_v30 = vmul.f32 0.35355338, %v1318_v29  ;;  %v4744_v31 = vpop.f32.mrb[29].mxu1 }
 0x341   :  { %v1321_v34 = vpop.f32.mrb[30].mxu1 }
 0x342   :  { %v4745_v5 = vpop.f32.mrb[31].mxu1  ;;  %v1489_v6 = vsel %vm559_vm2, %v5813_v30, -inf }
 0x343   :  { %1490 = vmax.xlane.f32.xlu0 %v1489_v6 }
 0x34c   :  { %445 = vrot.lane.b32.xlu1 %v5201_v35, %s5237_s20 }
 0x34f   :  { %v1428_v37 = vpop.f32.mrb[32].mxu1 }
 0x350   :  { %v5818_v40 = vmul.f32 0.35355338, %v1428_v37  ;;  %v4760_v12 = vpop.f32.mrb[33].mxu1  ;;  %449 = vrot.lane.b32.xlu1 %v5202_v42, %s5237_s20 }
 0x351   :  { %v1431_v44 = vpop.f32.mrb[34].mxu1 }
 0x352   :  { %v4761_v46 = vpop.f32.mrb[35].mxu1  ;;  %v1495_v48 = vsel %vm559_vm2, %v5818_v40, -inf }
 0x353   :  { %1496 = vmax.xlane.f32.xlu0 %v1495_v48 }
 0x354   :  { %451 = vrot.lane.b32.xlu1 %v5203_v49, %s5237_s20 }
 0x360   :  { %v1452_v50 = vpop.xlane.xlu0 %1451 }
 0x361   :  { %v1498_v54 = vsub.f32 %v5750_v7, %v1452_v50 }
 0x363   :  { %v1514_v58 = vmul.f32 1.442695, %v1498_v54 }
 0x365   :  { %5033 = vpow2.f32 %v1514_v58 }
 0x368   :  { %v1458_v0 = vpop.xlane.xlu0 %1457 }
 0x369   :  { %447 = vrot.lane.b32.xlu0 %v5204_v53, %s5237_s20  ;;  %v1500_v8 = vsub.f32 %v5754_v33, %v1458_v0 }
 0x36b   :  { %v1518_v17 = vmul.f32 1.442695, %v1500_v8 }
 0x36f   :  { %v5828_v14 = vpop.eup %5033 }
 0x370   :  { %v1455_v59 = vpop.xlane.xlu1 %1454 }
 0x371   :  { %v1499_v62 = vsub.f32 %v5758_v38, %v1455_v59 }
 0x373   :  { %v1516_v63 = vmul.f32 1.442695, %v1499_v62 }
 0x375   :  { %5035 = vpow2.f32 %v1516_v63 }
 0x376   :  { %5037 = vpow2.f32 %v1518_v17 }
 0x378   :  { %v1464_v27 = vpop.xlane.xlu1 %1463 }
 0x379   :  { %v1502_v28 = vsub.f32 %v5762_v45, %v1464_v27 }
 0x37b   :  { %v1522_v29 = vmul.f32 1.442695, %v1502_v28 }
 0x37f   :  { %v5830_v16 = vpop.eup %5035 }
 0x380   :  { %v1461_v21 = vpop.xlane.xlu0 %1460  ;;  %v1546_v2 = vpack.c.bf16 %v5830_v16, %v5828_v14  ;;  %v5837_v33 = vpop.eup %5037 }
 0x381   :  { %v1501_v7 = vsub.f32 %v5766_v51, %v1461_v21 }
 0x382   :  { %4766 = vmatprep.mubr.msk.bf16.mxu0 %vm559_vm2, %v1546_v2 }
 0x383   :  { %v1520_v38 = vmul.f32 1.442695, %v1501_v7 }
 0x385   :  { %5039 = vpow2.f32 %v1520_v38 }
 0x386   :  { %5041 = vpow2.f32 %v1522_v29 }
 0x388   :  { %v1470_v6 = vpop.xlane.xlu1 %1469 }
 0x389   :  { %v1504_v35 = vsub.f32 %v5770_v60, %v1470_v6 }
 0x38b   :  { %v1526_v12 = vmul.f32 1.442695, %v1504_v35 }
 0x38f   :  { %v5839_v4 = vpop.eup %5039 }
 0x390   :  { %v1467_v31 = vpop.xlane.xlu0 %1466  ;;  %v1547_v34 = vpack.c.bf16 %v5839_v4, %v5837_v33  ;;  %v5846_v45 = vpop.eup %5041 }
 0x391   :  { %v1503_v5 = vsub.f32 %v5774_v9, %v1467_v31 }
 0x392   :  { %4767 = vmatmul.mubr.msk.bf16.vlgmr.msra.gmra.mrb[44].mxu0 %vm559_vm2, %v1547_v34 }
 0x393   :  { %v1524_v51 = vmul.f32 1.442695, %v1503_v5 }
 0x395   :  { %5043 = vpow2.f32 %v1524_v51 }
 0x396   :  { %5045 = vpow2.f32 %v1526_v12 }
 0x398   :  { %v1476_v48 = vpop.xlane.xlu1 %1475 }
 0x399   :  { %v1506_v49 = vsub.f32 %v5778_v23, %v1476_v48 }
 0x39b   :  { %v1530_v53 = vmul.f32 1.442695, %v1506_v49 }
 0x39f   :  { %v5848_v37 = vpop.eup %5043 }
 0x3a0   :  { %v1473_v42 = vpop.xlane.xlu0 %1472  ;;  %v1548_v44 = vpack.c.bf16 %v5848_v37, %v5846_v45  ;;  %v5855_v60 = vpop.eup %5045 }
 0x3a1   :  { %v1505_v46 = vsub.f32 %v5788_v32, %v1473_v42 }
 0x3a2   :  { %4770 = vmatprep.mubr.msk.bf16.mxu0 %vm559_vm2, %v1548_v44 }
 0x3a3   :  { %v1528_v9 = vmul.f32 1.442695, %v1505_v46 }
 0x3a5   :  { %5047 = vpow2.f32 %v1528_v9 }
 0x3a6   :  { %5049 = vpow2.f32 %v1530_v53 }
 0x3a8   :  { %v1482_v62 = vpop.xlane.xlu1 %1481 }
 0x3a9   :  { %v1508_v63 = vsub.f32 %v5793_v10, %v1482_v62 }
 0x3ab   :  { %v1534_v8 = vmul.f32 1.442695, %v1508_v63 }
 0x3af   :  { %v5857_v50 = vpop.eup %5047 }
 0x3b0   :  { %v1479_v54 = vpop.xlane.xlu0 %1478  ;;  %v1549_v58 = vpack.c.bf16 %v5857_v50, %v5855_v60  ;;  %v5864_v23 = vpop.eup %5049 }
 0x3b1   :  { %v1507_v59 = vsub.f32 %v5797_v47, %v1479_v54 }
 0x3b2   :  { %4771 = vmatmul.mubr.msk.bf16.gmra.mrb[48].mxu0 %vm559_vm2, %v1549_v58 }
 0x3b3   :  { %v1532_v32 = vmul.f32 1.442695, %v1507_v59 }
 0x3b5   :  { %5051 = vpow2.f32 %v1532_v32 }
 0x3b6   :  { %5053 = vpow2.f32 %v1534_v8 }
 0x3b8   :  { %v1488_v7 = vpop.xlane.xlu1 %1487 }
 0x3b9   :  { %v1510_v10 = vsub.f32 %v5801_v55, %v1488_v7 }
 0x3bb   :  { %v1538_v31 = vmul.f32 1.442695, %v1510_v10 }
 0x3bf   :  { %v5866_v0 = vpop.eup %5051 }
 0x3c0   :  { %v1485_v17 = vpop.xlane.xlu0 %1484  ;;  %v1550_v21 = vpack.c.bf16 %v5866_v0, %v5864_v23  ;;  %v5875_v28 = vpop.eup %5053 }
 0x3c1   :  { %v1509_v2 = vsub.f32 %v5805_v3, %v1485_v17 }
 0x3c2   :  { %4774 = vmatprep.mubr.msk.bf16.mxu0 %vm559_vm2, %v1550_v21 }
 0x3c3   :  { %v1536_v47 = vmul.f32 1.442695, %v1509_v2 }
 0x3c5   :  { %5055 = vpow2.f32 %v1536_v47 }
 0x3c6   :  { %5057 = vpow2.f32 %v1538_v31 }
 0x3c8   :  { %v1494_v38 = vpop.xlane.xlu1 %1493 }
 0x3c9   :  { %v1512_v48 = vsub.f32 %v5809_v22, %v1494_v38 }
 0x3cb   :  { %v1542_v32 = vmul.f32 1.442695, %v1512_v48 }
 0x3cc   :  { %v5873_v27 = vpop.permute.xlu1 %445 }
 0x3cd   :  { %v477_v47 = vmul.f32 %v5873_v27, %v5443_v43  ;;  %v457_v7 = vmul.f32 %v5873_v27, %v5390_v11 }
 0x3cf   :  { %v5877_v29 = vpop.eup %5055 }
 0x3d0   :  { %v5879_v34 = vpop.permute.xlu1 %449  ;;  %v1491_v5 = vpop.xlane.xlu0 %1490  ;;  %v1551_v3 = vpack.c.bf16 %v5877_v29, %v5875_v28 }
 0x3d1   :  { %v1511_v51 = vsub.f32 %v5813_v30, %v1491_v5  ;;  %v459_v35 = vmul.f32 %v5879_v34, %v5390_v11  ;;  %v463_v30 = vmul.f32 %v5879_v34, %v5395_v15  ;;  %v467_v49 = vmul.f32 %v5879_v34, %v5406_v20  ;;  %v5902_v53 = vpop.eup %5057 }
 0x3d2   :  { %4775 = vmatmul.mubr.msk.bf16.gmra.mrb[52].mxu0 %vm559_vm2, %v1551_v3  ;;  %v471_v8 = vmul.f32 %v5879_v34, %v5413_v24 }
 0x3d3   :  { %v1540_v6 = vmul.f32 1.442695, %v1511_v51  ;;  %v479_v51 = vmul.f32 %v5879_v34, %v5443_v43 }
 0x3d4   :  { %v5885_v55 = vpop.permute.xlu1 %451 }
 0x3d5   :  { %5059 = vpow2.f32 %v1540_v6  ;;  %v460_v12 = vmul.f32 %v5885_v55, %v5390_v11  ;;  %v464_v44 = vmul.f32 %v5885_v55, %v5395_v15  ;;  %v468_v9 = vmul.f32 %v5885_v55, %v5406_v20 }
 0x3d6   :  { %v472_v59 = vmul.f32 %v5885_v55, %v5413_v24  ;;  %5061 = vpow2.f32 %v1542_v32  ;;  %v480_v5 = vmul.f32 %v5885_v55, %v5443_v43  ;;  %v461_v6 = vmul.f32 %v5873_v27, %v5395_v15 }
 0x3d7   :  { %v522_v42 = vpack.c.bf16 %v460_v12, %v459_v35  ;;  %v524_v46 = vpack.c.bf16 %v464_v44, %v463_v30  ;;  %v526_v58 = vpack.c.bf16 %v468_v9, %v467_v49  ;;  %v485_v44 = vmul.f32 %v5873_v27, %v5469_v61 }
 0x3d8   :  { %v528_v21 = vpack.c.bf16 %v472_v59, %v471_v8  ;;  %v532_v35 = vpack.c.bf16 %v480_v5, %v479_v51  ;;  %v488_v48 = vmul.f32 %v5885_v55, %v5469_v61  ;;  %v469_v59 = vmul.f32 %v5873_v27, %v5413_v24 }
 0x3d9   :  { %1759 = vrot.lane.b32.xlu1 %v522_v42, %s5237_s20 }
 0x3dd   :  { %1810 = vrot.lane.b32.xlu1 %v524_v46, %s5237_s20 }
 0x3df   :  { %v5904_v54 = vpop.eup %5059 }
 0x3e0   :  { %v1497_v62 = vpop.xlane.xlu0 %1496  ;;  %v1552_v63 = vpack.c.bf16 %v5904_v54, %v5902_v53  ;;  %v5946_v30 = vpop.eup %5061 }
 0x3e1   :  { %v1513_v22 = vsub.f32 %v5818_v40, %v1497_v62  ;;  %1861 = vrot.lane.b32.xlu1 %v526_v58, %s5237_s20 }
 0x3e2   :  { %4778 = vmatprep.mubr.msk.bf16.mxu0 %vm559_vm2, %v1552_v63 }
 0x3e3   :  { %v1544_v17 = vmul.f32 1.442695, %v1513_v22 }
 0x3e4   :  { %v5915_v2 = vpop.permute.xlu0 %447 }
 0x3e5   :  { %5063 = vpow2.f32 %v1544_v17  ;;  %1912 = vrot.lane.b32.xlu1 %v528_v21, %s5237_s20  ;;  %v478_v40 = vmul.f32 %v5915_v2, %v5443_v43  ;;  %v458_v38 = vmul.f32 %v5915_v2, %v5390_v11  ;;  %v462_v3 = vmul.f32 %v5915_v2, %v5395_v15 }
 0x3e6   :  { %v486_v12 = vmul.f32 %v5915_v2, %v5469_v61  ;;  %v466_v42 = vmul.f32 %v5915_v2, %v5406_v20  ;;  %v465_v43 = vmul.f32 %v5873_v27, %v5406_v20  ;;  %v470_v49 = vmul.f32 %v5915_v2, %v5413_v24 }
 0x3e7   :  { %v531_v10 = vpack.c.bf16 %v478_v40, %v477_v47  ;;  %v521_v31 = vpack.c.bf16 %v458_v38, %v457_v7  ;;  %v523_v11 = vpack.c.bf16 %v462_v3, %v461_v6  ;;  %v487_v20 = vmul.f32 %v5879_v34, %v5469_v61 }
 0x3e8   :  { %v535_v46 = vpack.c.bf16 %v486_v12, %v485_v44  ;;  %v525_v9 = vpack.c.bf16 %v466_v42, %v465_v43  ;;  %v527_v62 = vpack.c.bf16 %v470_v49, %v469_v59  ;;  %v494_v63 = vmul.f32 %v5915_v2, %v5499_v25 }
 0x3e9   :  { %2012 = vrot.lane.b32.xlu1 %v531_v10, %s5237_s20  ;;  %1757 = vrot.lane.b32.xlu0 %v521_v31, %s5237_s20  ;;  %v536_v32 = vpack.c.bf16 %v488_v48, %v487_v20  ;;  %v474_v22 = vmul.f32 %v5915_v2, %v5436_v39  ;;  %v493_v24 = vmul.f32 %v5873_v27, %v5499_v25 }
 0x3ea   :  { %v473_v61 = vmul.f32 %v5873_v27, %v5436_v39  ;;  %v496_v21 = vmul.f32 %v5885_v55, %v5499_v25  ;;  %v476_v47 = vmul.f32 %v5885_v55, %v5436_v39  ;;  %v495_v40 = vmul.f32 %v5879_v34, %v5499_v25 }
 0x3eb   :  { %v539_v8 = vpack.c.bf16 %v494_v63, %v493_v24  ;;  %v475_v7 = vmul.f32 %v5879_v34, %v5436_v39  ;;  %v502_v31 = vmul.f32 %v5915_v2, %v5525_v41  ;;  %v482_v5 = vmul.f32 %v5915_v2, %v5462_v57 }
 0x3ec   :  { %v529_v17 = vpack.c.bf16 %v474_v22, %v473_v61  ;;  %v540_v38 = vpack.c.bf16 %v496_v21, %v495_v40  ;;  %v501_v3 = vmul.f32 %v5873_v27, %v5525_v41  ;;  %v481_v25 = vmul.f32 %v5873_v27, %v5462_v57 }
 0x3ed   :  { %2014 = vrot.lane.b32.xlu1 %v532_v35, %s5237_s20  ;;  %1808 = vrot.lane.b32.xlu0 %v523_v11, %s5237_s20  ;;  %v530_v10 = vpack.c.bf16 %v476_v47, %v475_v7  ;;  %v504_v6 = vmul.f32 %v5885_v55, %v5525_v41  ;;  %v484_v35 = vmul.f32 %v5885_v55, %v5462_v57 }
 0x3ee   :  { %v543_v51 = vpack.c.bf16 %v502_v31, %v501_v3  ;;  %v533_v39 = vpack.c.bf16 %v482_v5, %v481_v25  ;;  %v503_v11 = vmul.f32 %v5879_v34, %v5525_v41  ;;  %v483_v12 = vmul.f32 %v5879_v34, %v5462_v57 }
 0x3ef   :  { %v5948_v15 = vpop.eup %5063  ;;  %v510_v43 = vmul.f32 %v5915_v2, %v5551_v56  ;;  %v489_v41 = vmul.f32 %v5873_v27, %v5492_v19  ;;  %v512_v49 = vmul.f32 %v5885_v55, %v5551_v56  ;;  %v511_v20 = vmul.f32 %v5879_v34, %v5551_v56 }
 0x3f0   :  { %v1553_v58 = vpack.c.bf16 %v5948_v15, %v5946_v30  ;;  %v544_v42 = vpack.c.bf16 %v504_v6, %v503_v11  ;;  %v534_v44 = vpack.c.bf16 %v484_v35, %v483_v12  ;;  %v491_v59 = vmul.f32 %v5879_v34, %v5492_v19 }
 0x3f1   :  { %2114 = vrot.lane.b32.xlu1 %v535_v46, %s5237_s20  ;;  %1859 = vrot.lane.b32.xlu0 %v525_v9, %s5237_s20  ;;  %v490_v46 = vmul.f32 %v5915_v2, %v5492_v19  ;;  %v509_v9 = vmul.f32 %v5873_v27, %v5551_v56  ;;  %v518_v63 = vmul.f32 %v5915_v2, %v5579_v18 }
 0x3f2   :  { %4779 = vmatmul.mubr.msk.bf16.gmra.mrb[56].mxu0 %vm559_vm2, %v1553_v58  ;;  %v492_v58 = vmul.f32 %v5885_v55, %v5492_v19  ;;  %v498_v22 = vmul.f32 %v5915_v2, %v5518_v36  ;;  %v517_v24 = vmul.f32 %v5873_v27, %v5579_v18  ;;  %v497_v56 = vmul.f32 %v5873_v27, %v5518_v36 }
 0x3f3   :  { %4818 = vmatprep.mubr.msk.bf16.mxu0 %vm5236_vm1, %v5233_v1  ;;  %v547_v48 = vpack.c.bf16 %v510_v43, %v509_v9  ;;  %v537_v57 = vpack.c.bf16 %v490_v46, %v489_v41  ;;  %v519_v21 = vmul.f32 %v5879_v34, %v5579_v18  ;;  %v499_v47 = vmul.f32 %v5879_v34, %v5518_v36 }
 0x3f4   :  { %v551_v61 = vpack.c.bf16 %v518_v63, %v517_v24  ;;  %v541_v19 = vpack.c.bf16 %v498_v22, %v497_v56  ;;  %v508_v5 = vmul.f32 %v5885_v55, %v5544_v52  ;;  %v514_v3 = vmul.f32 %v5915_v2, %v5571_v13 }
 0x3f5   :  { %2116 = vrot.lane.b32.xlu1 %v536_v32, %s5237_s20  ;;  %1910 = vrot.lane.b32.xlu0 %v527_v62, %s5237_s20  ;;  %v548_v32 = vpack.c.bf16 %v512_v49, %v511_v20  ;;  %v538_v62 = vpack.c.bf16 %v492_v58, %v491_v59  ;;  %v513_v25 = vmul.f32 %v5873_v27, %v5571_v13 }
 0x3f6   :  { %v515_v6 = vmul.f32 %v5879_v34, %v5571_v13 }
 0x3f9   :  { %2216 = vrot.lane.b32.xlu1 %v539_v8, %s5237_s20  ;;  %1961 = vrot.lane.b32.xlu0 %v529_v17, %s5237_s20  ;;  %v520_v8 = vmul.f32 %v5885_v55, %v5579_v18  ;;  %v500_v17 = vmul.f32 %v5885_v55, %v5518_v36  ;;  %v507_v36 = vmul.f32 %v5879_v34, %v5544_v52 }
 0x3fb   :  { %v552_v40 = vpack.c.bf16 %v520_v8, %v519_v21  ;;  %v542_v7 = vpack.c.bf16 %v500_v17, %v499_v47  ;;  %v546_v18 = vpack.c.bf16 %v508_v5, %v507_v36 }
 0x3fd   :  { %2218 = vrot.lane.b32.xlu1 %v540_v38, %s5237_s20  ;;  %1963 = vrot.lane.b32.xlu0 %v530_v10, %s5237_s20  ;;  %v506_v38 = vmul.f32 %v5915_v2, %v5544_v52  ;;  %v505_v10 = vmul.f32 %v5873_v27, %v5544_v52 }
 0x3ff   :  { %v545_v31 = vpack.c.bf16 %v506_v38, %v505_v10 }
 0x401   :  { %2318 = vrot.lane.b32.xlu1 %v543_v51, %s5237_s20  ;;  %2063 = vrot.lane.b32.xlu0 %v533_v39, %s5237_s20  ;;  %v549_v51 = vpack.c.bf16 %v514_v3, %v513_v25  ;;  %v516_v39 = vmul.f32 %v5885_v55, %v5571_v13 }
 0x403   :  { %v550_v35 = vpack.c.bf16 %v516_v39, %v515_v6 }
 0x405   :  { %2320 = vrot.lane.b32.xlu1 %v544_v42, %s5237_s20  ;;  %2065 = vrot.lane.b32.xlu0 %v534_v44, %s5237_s20 }
 0x409   :  { %2420 = vrot.lane.b32.xlu1 %v547_v48, %s5237_s20  ;;  %2165 = vrot.lane.b32.xlu0 %v537_v57, %s5237_s20 }
 0x40d   :  { %2422 = vrot.lane.b32.xlu1 %v548_v32, %s5237_s20  ;;  %2167 = vrot.lane.b32.xlu0 %v538_v62, %s5237_s20 }
 0x411   :  { %2522 = vrot.lane.b32.xlu1 %v551_v61, %s5237_s20  ;;  %2267 = vrot.lane.b32.xlu0 %v541_v19, %s5237_s20 }
 0x415   :  { %2524 = vrot.lane.b32.xlu1 %v552_v40, %s5237_s20  ;;  %2269 = vrot.lane.b32.xlu0 %v542_v7, %s5237_s20 }
 0x419   :  { %2369 = vrot.lane.b32.xlu0 %v545_v31, %s5237_s20 }
 0x41d   :  { %2371 = vrot.lane.b32.xlu0 %v546_v18, %s5237_s20 }
 0x421   :  { %2471 = vrot.lane.b32.xlu0 %v549_v51, %s5237_s20 }
 0x425   :  { %2473 = vrot.lane.b32.xlu0 %v550_v35, %s5237_s20 }
 0x44b   :  { %v1760_v2 = vpop.permute.xlu1 %1759 }
 0x44f   :  { %v1811_v49 = vpop.permute.xlu1 %1810 }
 0x453   :  { %v1862_v62 = vpop.permute.xlu1 %1861 }
 0x457   :  { %v1913_v22 = vpop.permute.xlu1 %1912 }
 0x45b   :  { %v1758_v52 = vpop.permute.xlu0 %1757  ;;  %v2013_v21 = vpop.permute.xlu1 %2012 }
 0x45c   :  { %4783 = vmatpush3.bf16.msra.mxu1 %v1758_v52 }
 0x45d   :  { %4784 = vmatprep.subr.bf16.mxu1 %v5233_v1 }
 0x45f   :  { %v1809_v11 = vpop.permute.xlu0 %1808  ;;  %v2015_v10 = vpop.permute.xlu1 %2014 }
 0x460   :  { %4785 = vmatpush3.bf16.msra.mxu1 %v1760_v2 }
 0x461   :  { %4790 = vmatprep.subr.bf16.mxu1 %v5233_v1 }
 0x463   :  { %v1860_v27 = vpop.permute.xlu0 %1859  ;;  %v2115_v36 = vpop.permute.xlu1 %2114 }
 0x465   :  { %v4768_v12 = vpop.f32.mrb[44].mxu0 }
 0x466   :  { %v1628_v55 = vpop.f32.mrb[45].mxu0  ;;  %v1693_v41 = vmax.f32 %v4768_v12, 1e-20 }
 0x467   :  { %v1691_v42 = vmax.f32 %v1628_v55, 1e-20  ;;  %v4769_v44 = vpop.f32.mrb[46].mxu0  ;;  %v1911_v43 = vpop.permute.xlu0 %1910 }
 0x468   :  { %v1631_v46 = vpop.f32.mrb[47].mxu0  ;;  %v1694_v59 = vmax.f32 %v4769_v44, 1e-20  ;;  %v2117_v2 = vpop.permute.xlu1 %2116 }
 0x469   :  { %5065 = vrcp.f32 %v1691_v42  ;;  %v1692_v13 = vmax.f32 %v1631_v46, 1e-20 }
 0x46b   :  { %v1962_v34 = vpop.permute.xlu0 %1961  ;;  %5067 = vrcp.f32 %v1692_v13 }
 0x46c   :  { %4815 = vmatpush3.bf16.msra.mxu0 %v1962_v34  ;;  %5069 = vrcp.f32 %v1693_v41  ;;  %v2217_v12 = vpop.permute.xlu1 %2216 }
 0x46d   :  { %4816 = vmatprep.subr.bf16.mxu0 %v5233_v1  ;;  %5071 = vrcp.f32 %v1694_v59 }
 0x46f   :  { %v1964_v9 = vpop.permute.xlu0 %1963 }
 0x470   :  { %4817 = vmatpush3.bf16.msra.mxu0 %v1964_v9  ;;  %v2219_v42 = vpop.permute.xlu1 %2218 }
 0x471   :  { %4830 = vmatprep.subr.bf16.mxu0 %v5233_v1 }
 0x473   :  { %v5066_v48 = vpop.eup %5065  ;;  %v2064_v5 = vpop.permute.xlu0 %2063 }
 0x474   :  { %v1723_v57 = vmul.f32 %v5066_v48, %v5828_v14 }
 0x475   :  { %v5068_v20 = vpop.eup %5067 }
 0x476   :  { %v1739_v58 = vpack.c.bf16 %v1723_v57, %v1723_v57  ;;  %v1724_v32 = vmul.f32 %v5068_v20, %v5830_v16  ;;  %v5070_v63 = vpop.eup %5069 }
 0x477   :  { %v1725_v24 = vmul.f32 %v5070_v63, %v5837_v33  ;;  %v5072_v19 = vpop.eup %5071  ;;  %v2066_v6 = vpop.permute.xlu0 %2065 }
 0x478   :  { %4787 = vmatmul.mubr.msk.bf16.vlgmr.msra.gmra.mrb[36].mxu1 %vm559_vm2, %v1739_v58  ;;  %v1740_v14 = vpack.c.bf16 %v1724_v32, %v1724_v32  ;;  %v1726_v33 = vmul.f32 %v5072_v19, %v5839_v4 }
 0x479   :  { %4791 = vmatpush3.bf16.msra.mxu1 %v1809_v11  ;;  %4794 = vmatprep.mubr.msk.bf16.mxu1 %vm5236_vm1, %v5233_v1  ;;  %v1741_v61 = vpack.c.bf16 %v1725_v24, %v1725_v24 }
 0x47a   :  { %4792 = vmatprep.subr.bf16.mxu1 %v5233_v1  ;;  %v1742_v31 = vpack.c.bf16 %v1726_v33, %v1726_v33 }
 0x47b   :  { %v2166_v11 = vpop.permute.xlu0 %2165 }
 0x47d   :  { %4793 = vmatpush3.bf16.msra.mxu1 %v1811_v49  ;;  %v2319_v49 = vpop.permute.xlu1 %2318 }
 0x47e   :  { %4798 = vmatprep.subr.bf16.mxu1 %v5233_v1 }
 0x480   :  { %4795 = vmatmul.mubr.msk.bf16.vlgmr.msra.gmra.mrb[40].mxu1 %vm559_vm2, %v1740_v14 }
 0x481   :  { %4799 = vmatpush3.bf16.msra.mxu1 %v1860_v27  ;;  %4802 = vmatprep.mubr.msk.bf16.mxu1 %vm5236_vm1, %v5233_v1  ;;  %v2321_v24 = vpop.permute.xlu1 %2320 }
 0x482   :  { %4800 = vmatprep.subr.bf16.mxu1 %v5233_v1 }
 0x485   :  { %4801 = vmatpush3.bf16.msra.mxu1 %v1862_v62  ;;  %v4772_v16 = vpop.f32.mrb[48].mxu0 }
 0x486   :  { %v1644_v56 = vpop.f32.mrb[49].mxu0  ;;  %4806 = vmatprep.subr.bf16.mxu1 %v5233_v1  ;;  %v1697_v40 = vmax.f32 %v4772_v16, 1e-20 }
 0x487   :  { %v1695_v8 = vmax.f32 %v1644_v56, 1e-20  ;;  %v4773_v17 = vpop.f32.mrb[50].mxu0 }
 0x488   :  { %v1647_v47 = vpop.f32.mrb[51].mxu0  ;;  %4803 = vmatmul.mubr.msk.bf16.vlgmr.msra.gmra.mrb[44].mxu1 %vm559_vm2, %v1741_v61  ;;  %v1698_v38 = vmax.f32 %v4773_v17, 1e-20  ;;  %v2421_v61 = vpop.permute.xlu1 %2420 }
 0x489   :  { %5073 = vrcp.f32 %v1695_v8  ;;  %v1696_v7 = vmax.f32 %v1647_v47, 1e-20  ;;  %4807 = vmatpush3.bf16.msra.mxu1 %v1911_v43  ;;  %4810 = vmatprep.mubr.msk.bf16.mxu1 %vm5236_vm1, %v5233_v1 }
 0x48a   :  { %4808 = vmatprep.subr.bf16.mxu1 %v5233_v1 }
 0x48b   :  { %5075 = vrcp.f32 %v1696_v7 }
 0x48c   :  { %5077 = vrcp.f32 %v1697_v40  ;;  %v2423_v8 = vpop.permute.xlu1 %2422 }
 0x48d   :  { %4809 = vmatpush3.bf16.msra.mxu1 %v1913_v22  ;;  %5079 = vrcp.f32 %v1698_v38 }
 0x48e   :  { %4822 = vmatprep.subr.bf16.mxu1 %v5233_v1 }
 0x490   :  { %4811 = vmatmul.mubr.msk.bf16.vlgmr.msra.gmra.mrb[48].mxu1 %vm559_vm2, %v1742_v31 }
 0x491   :  { %4823 = vmatpush3.bf16.msra.mxu1 %v2013_v21  ;;  %4826 = vmatprep.mubr.msk.bf16.mxu1 %vm5236_vm1, %v5233_v1 }
 0x492   :  { %4824 = vmatprep.subr.bf16.mxu1 %v5233_v1 }
 0x493   :  { %v5074_v4 = vpop.eup %5073 }
 0x494   :  { %v1727_v18 = vmul.f32 %v5074_v4, %v5846_v45 }
 0x495   :  { %v5076_v3 = vpop.eup %5075  ;;  %4825 = vmatpush3.bf16.msra.mxu1 %v2015_v10 }
 0x496   :  { %v1743_v25 = vpack.c.bf16 %v1727_v18, %v1727_v18  ;;  %v1728_v51 = vmul.f32 %v5076_v3, %v5848_v37  ;;  %4838 = vmatprep.subr.bf16.mxu1 %v5233_v1  ;;  %v5078_v39 = vpop.eup %5077 }
 0x497   :  { %v5080_v52 = vpop.eup %5079  ;;  %v1729_v45 = vmul.f32 %v5078_v39, %v5855_v60 }
 0x498   :  { %4819 = vmatmul.mubr.msk.bf16.vlgmr.msra.gmra.mrb[60].mxu0 %vm559_vm2, %v1743_v25  ;;  %v1744_v35 = vpack.c.bf16 %v1728_v51, %v1728_v51  ;;  %v1730_v37 = vmul.f32 %v5080_v52, %v5857_v50  ;;  %v2168_v50 = vpop.permute.xlu0 %2167  ;;  %v2523_v25 = vpop.permute.xlu1 %2522 }
 0x499   :  { %4831 = vmatpush3.bf16.msra.mxu0 %v2064_v5  ;;  %4834 = vmatprep.mubr.msk.bf16.mxu0 %vm5236_vm1, %v5233_v1  ;;  %v1745_v27 = vpack.c.bf16 %v1729_v45, %v1729_v45 }
 0x49a   :  { %4827 = vmatmul.mubr.msk.bf16.vlgmr.msra.gmra.mrb[52].mxu1 %vm559_vm2, %v1744_v35  ;;  %4832 = vmatprep.subr.bf16.mxu0 %v5233_v1  ;;  %v1746_v60 = vpack.c.bf16 %v1730_v37, %v1730_v37 }
 0x49b   :  { %4839 = vmatpush3.bf16.msra.mxu1 %v2115_v36  ;;  %4842 = vmatprep.mubr.msk.bf16.mxu1 %vm5236_vm1, %v5233_v1 }
 0x49c   :  { %4840 = vmatprep.subr.bf16.mxu1 %v5233_v1  ;;  %v2268_v48 = vpop.permute.xlu0 %2267  ;;  %v2525_v35 = vpop.permute.xlu1 %2524 }
 0x49d   :  { %4833 = vmatpush3.bf16.msra.mxu0 %v2066_v6 }
 0x49e   :  { %4846 = vmatprep.subr.bf16.mxu0 %v5233_v1 }
 0x49f   :  { %4841 = vmatpush3.bf16.msra.mxu1 %v2117_v2  ;;  %v5019_v2 = vld [vmem:[%s6903_s2 + $0x28] sm:$0xff]  }
 0x4a0   :  { %4835 = vmatmul.mubr.msk.bf16.vlgmr.msra.gmra.mrb[64].mxu0 %vm559_vm2, %v1745_v27  ;;  %4854 = vmatprep.subr.bf16.mxu1 %v5233_v1  ;;  %v2270_v14 = vpop.permute.xlu0 %2269 }
 0x4a1   :  { %4847 = vmatpush3.bf16.msra.mxu0 %v2166_v11  ;;  %4850 = vmatprep.mubr.msk.bf16.mxu0 %vm5236_vm1, %v5233_v1 }
 0x4a2   :  { %4843 = vmatmul.mubr.msk.bf16.vlgmr.msra.gmra.mrb[56].mxu1 %vm559_vm2, %v1746_v60  ;;  %4848 = vmatprep.subr.bf16.mxu0 %v5233_v1 }
 0x4a3   :  { %4855 = vmatpush3.bf16.msra.mxu1 %v2217_v12  ;;  %4858 = vmatprep.mubr.msk.bf16.mxu1 %vm5236_vm1, %v5233_v1 }
 0x4a4   :  { %4856 = vmatprep.subr.bf16.mxu1 %v5233_v1 }
 0x4a5   :  { %4849 = vmatpush3.bf16.msra.mxu0 %v2168_v50  ;;  %v4776_v55 = vpop.f32.mrb[52].mxu0 }
 0x4a6   :  { %v1660_v44 = vpop.f32.mrb[53].mxu0  ;;  %4862 = vmatprep.subr.bf16.mxu0 %v5233_v1  ;;  %v1701_v34 = vmax.f32 %v4776_v55, 1e-20 }
 0x4a7   :  { %v1699_v43 = vmax.f32 %v1660_v44, 1e-20  ;;  %4857 = vmatpush3.bf16.msra.mxu1 %v2219_v42  ;;  %v4777_v46 = vpop.f32.mrb[54].mxu0 }
 0x4a8   :  { %v1663_v13 = vpop.f32.mrb[55].mxu0  ;;  %4870 = vmatprep.subr.bf16.mxu1 %v5233_v1  ;;  %v1702_v41 = vmax.f32 %v4777_v46, 1e-20 }
 0x4a9   :  { %5081 = vrcp.f32 %v1699_v43  ;;  %v1700_v9 = vmax.f32 %v1663_v13, 1e-20 }
 0x4ab   :  { %5083 = vrcp.f32 %v1700_v9 }
 0x4ac   :  { %5085 = vrcp.f32 %v1701_v34 }
 0x4ad   :  { %5087 = vrcp.f32 %v1702_v41 }
 0x4b3   :  { %v5082_v57 = vpop.eup %5081 }
 0x4b4   :  { %v1731_v58 = vmul.f32 %v5082_v57, %v5864_v23 }
 0x4b5   :  { %v5084_v20 = vpop.eup %5083 }
 0x4b6   :  { %v1732_v59 = vmul.f32 %v5084_v20, %v5866_v0  ;;  %v1747_v32 = vpack.c.bf16 %v1731_v58, %v1731_v58  ;;  %v5086_v62 = vpop.eup %5085  ;;  %v2370_v0 = vpop.permute.xlu0 %2369 }
 0x4b7   :  { %v5088_v22 = vpop.eup %5087  ;;  %v1733_v16 = vmul.f32 %v5086_v62, %v5875_v28 }
 0x4b8   :  { %4851 = vmatmul.mubr.msk.bf16.vlgmr.msra.gmra.mrb[68].mxu0 %vm559_vm2, %v1747_v32  ;;  %v1748_v63 = vpack.c.bf16 %v1732_v59, %v1732_v59  ;;  %v1734_v23 = vmul.f32 %v5088_v22, %v5877_v29 }
 0x4b9   :  { %4863 = vmatpush3.bf16.msra.mxu0 %v2268_v48  ;;  %4866 = vmatprep.mubr.msk.bf16.mxu0 %vm5236_vm1, %v5233_v1  ;;  %v1749_v56 = vpack.c.bf16 %v1733_v16, %v1733_v16 }
 0x4ba   :  { %4859 = vmatmul.mubr.msk.bf16.vlgmr.msra.gmra.mrb[60].mxu1 %vm559_vm2, %v1748_v63  ;;  %4864 = vmatprep.subr.bf16.mxu0 %v5233_v1  ;;  %v1750_v28 = vpack.c.bf16 %v1734_v23, %v1734_v23  ;;  %v2372_v29 = vpop.permute.xlu0 %2371 }
 0x4bb   :  { %4871 = vmatpush3.bf16.msra.mxu1 %v2319_v49  ;;  %4874 = vmatprep.mubr.msk.bf16.mxu1 %vm5236_vm1, %v5233_v1 }
 0x4bc   :  { %4872 = vmatprep.subr.bf16.mxu1 %v5233_v1 }
 0x4bd   :  { %4865 = vmatpush3.bf16.msra.mxu0 %v2270_v14 }
 0x4be   :  { %4878 = vmatprep.subr.bf16.mxu0 %v5233_v1  ;;  %v2472_v4 = vpop.permute.xlu0 %2471 }
 0x4bf   :  { %4873 = vmatpush3.bf16.msra.mxu1 %v2321_v24 }
 0x4c0   :  { %4867 = vmatmul.mubr.msk.bf16.vlgmr.msra.gmra.mrb[72].mxu0 %vm559_vm2, %v1749_v56  ;;  %4886 = vmatprep.subr.bf16.mxu1 %v5233_v1 }
 0x4c1   :  { %4879 = vmatpush3.bf16.msra.mxu0 %v2370_v0  ;;  %4882 = vmatprep.mubr.msk.bf16.mxu0 %vm5236_vm1, %v5233_v1 }
 0x4c2   :  { %4875 = vmatmul.mubr.msk.bf16.vlgmr.msra.gmra.mrb[64].mxu1 %vm559_vm2, %v1750_v28  ;;  %4880 = vmatprep.subr.bf16.mxu0 %v5233_v1 }
 0x4c3   :  { %4887 = vmatpush3.bf16.msra.mxu1 %v2421_v61  ;;  %4890 = vmatprep.mubr.msk.bf16.mxu1 %vm5236_vm1, %v5233_v1 }
 0x4c4   :  { %4888 = vmatprep.subr.bf16.mxu1 %v5233_v1 }
 0x4c5   :  { %4881 = vmatpush3.bf16.msra.mxu0 %v2372_v29  ;;  %v4780_v19 = vpop.f32.mrb[56].mxu0 }
 0x4c6   :  { %v1676_v17 = vpop.f32.mrb[57].mxu0  ;;  %4894 = vmatprep.subr.bf16.mxu0 %v5233_v1  ;;  %v1705_v7 = vmax.f32 %v4780_v19, 1e-20 }
 0x4c7   :  { %v1703_v21 = vmax.f32 %v1676_v17, 1e-20  ;;  %4889 = vmatpush3.bf16.msra.mxu1 %v2423_v8  ;;  %v4781_v47 = vpop.f32.mrb[58].mxu0 }
 0x4c8   :  { %v1679_v40 = vpop.f32.mrb[59].mxu0  ;;  %4902 = vmatprep.subr.bf16.mxu1 %v5233_v1  ;;  %v1706_v38 = vmax.f32 %v4781_v47, 1e-20 }
 0x4c9   :  { %5089 = vrcp.f32 %v1703_v21  ;;  %v1704_v33 = vmax.f32 %v1679_v40, 1e-20 }
 0x4cb   :  { %5091 = vrcp.f32 %v1704_v33 }
 0x4cc   :  { %5093 = vrcp.f32 %v1705_v7 }
 0x4cd   :  { %5095 = vrcp.f32 %v1706_v38 }
 0x4d3   :  { %v5090_v10 = vpop.eup %5089 }
 0x4d4   :  { %v1735_v31 = vmul.f32 %v5090_v10, %v5902_v53  ;;  %v2474_v53 = vpop.permute.xlu0 %2473 }
 0x4d5   :  { %v5092_v5 = vpop.eup %5091 }
 0x4d6   :  { %v1736_v36 = vmul.f32 %v5092_v5, %v5904_v54  ;;  %v1751_v18 = vpack.c.bf16 %v1735_v31, %v1735_v31  ;;  %v5094_v3 = vpop.eup %5093 }
 0x4d7   :  { %v5096_v39 = vpop.eup %5095  ;;  %v1737_v6 = vmul.f32 %v5094_v3, %v5946_v30  ;;  %v5018_v30 = vld [vmem:[%s6903_s2 + $0x20] sm:$0xff]  }
 0x4d8   :  { %4883 = vmatmul.mubr.msk.bf16.vlgmr.msra.gmra.mrb[76].mxu0 %vm559_vm2, %v1751_v18  ;;  %v1752_v51 = vpack.c.bf16 %v1736_v36, %v1736_v36  ;;  %v1738_v54 = vmul.f32 %v5096_v39, %v5948_v15 }
 0x4d9   :  { %4895 = vmatpush3.bf16.msra.mxu0 %v2472_v4  ;;  %4898 = vmatprep.mubr.msk.bf16.mxu0 %vm5236_vm1, %v5233_v1  ;;  %v1753_v52 = vpack.c.bf16 %v1737_v6, %v1737_v6 }
 0x4da   :  { %4891 = vmatmul.mubr.msk.bf16.vlgmr.msra.gmra.mrb[68].mxu1 %vm559_vm2, %v1752_v51  ;;  %4896 = vmatprep.subr.bf16.mxu0 %v5233_v1  ;;  %v1754_v45 = vpack.c.bf16 %v1738_v54, %v1738_v54 }
 0x4db   :  { %4903 = vmatpush3.bf16.msra.mxu1 %v2523_v25  ;;  %4906 = vmatprep.mubr.msk.bf16.mxu1 %vm5236_vm1, %v5233_v1 }
 0x4dc   :  { %4904 = vmatprep.subr.bf16.mxu1 %v5233_v1 }
 0x4dd   :  { %4897 = vmatpush3.bf16.msra.mxu0 %v2474_v53 }
 0x4de   :  { %4910 = vmatprep.subr.bf16.mxu0 %v5018_v30 }
 0x4df   :  { %4905 = vmatpush3.bf16.msra.mxu1 %v2525_v35 }
 0x4e0   :  { %4899 = vmatmul.mubr.msk.bf16.vlgmr.msra.gmra.mrb[80].mxu0 %vm559_vm2, %v1753_v52 }
 0x4e1   :  { %4911 = vmatpush3.bf16.msra.mxu0 %v5018_v30 }
 0x4e2   :  { %4907 = vmatmul.mubr.msk.bf16.vlgmr.msra.gmra.mrb[72].mxu1 %vm559_vm2, %v1754_v45  ;;  %4912 = vmatprep.subr.bf16.mxu0 %v5019_v2 }
 0x4e5   :  { %4913 = vmatpush3.bf16.msra.mxu0 %v5019_v2 }
 0x54b   :  { %v1800_v15 = vpop.f32.mrb[36].mxu1 }
 0x54c   :  { %v4788_v37 = vpop.f32.mrb[37].mxu1 }
 0x54d   :  { %v1803_v11 = vpop.f32.mrb[38].mxu1 }
 0x54e   :  { %v4789_v27 = vpop.f32.mrb[39].mxu1 }
 0x553   :  { %v1851_v12 = vpop.f32.mrb[40].mxu1 }
 0x554   :  { %v2571_v60 = vpack.c.bf16 %v1851_v12, %v1800_v15  ;;  %v4796_v50 = vpop.f32.mrb[41].mxu1 }
 0x555   :  { %v1854_v55 = vpop.f32.mrb[42].mxu1 }
 0x556   :  { %v4797_v42 = vpop.f32.mrb[43].mxu1  ;;  %4914 = vmatprep.mubr.msk.bf16.mxu0 %vm559_vm2, %v2571_v60 }
 0x55b   :  { %v1902_v44 = vpop.f32.mrb[44].mxu1 }
 0x55c   :  { %v4804_v43 = vpop.f32.mrb[45].mxu1 }
 0x55d   :  { %v1905_v46 = vpop.f32.mrb[46].mxu1  ;;  %v5020_v43 = vld [vmem:[%s6903_s2 + $0x30] sm:$0xff]  }
 0x55e   :  { %v4805_v13 = vpop.f32.mrb[47].mxu1  ;;  %4930 = vmatprep.subr.bf16.mxu1 %v5020_v43  ;;  %v5021_v46 = vld [vmem:[%s6903_s2 + $0x38] sm:$0xff]  }
 0x55f   :  { %4931 = vmatpush3.bf16.msra.mxu1 %v5020_v43  ;;  %v5022_v13 = vld [vmem:[%s6903_s2 + $0x40] sm:$0xff]  }
 0x560   :  { %4932 = vmatprep.subr.bf16.mxu1 %v5021_v46  ;;  %4950 = vmatprep.subr.bf16.mxu0 %v5022_v13 }
 0x563   :  { %v1953_v34 = vpop.f32.mrb[48].mxu1  ;;  %4933 = vmatpush3.bf16.msra.mxu1 %v5021_v46 }
 0x564   :  { %v2572_v9 = vpack.c.bf16 %v1953_v34, %v1902_v44  ;;  %v4812_v41 = vpop.f32.mrb[49].mxu1  ;;  %4974 = vmatprep.subr.bf16.mxu1 %v5233_v1  ;;  %v5023_v34 = vld [vmem:[%s6903_s2 + $0x48] sm:$0xff]  }
 0x565   :  { %v1956_v48 = vpop.f32.mrb[50].mxu1  ;;  %v4398_v41 = vld [vmem:[#allocation2 + $0x8] ss:$0 sm:$0xff] }
 0x566   :  { %v4813_v57 = vpop.f32.mrb[51].mxu1  ;;  %4915 = vmatmul.mubr.msk.bf16.vlgmr.msra.gmra.mrb[84].mxu0 %vm559_vm2, %v2572_v9 }
 0x567   :  { %4951 = vmatpush3.bf16.msra.mxu0 %v5022_v13 }
 0x568   :  { %4952 = vmatprep.subr.bf16.mxu0 %v5023_v34 }
 0x56b   :  { %v2004_v49 = vpop.f32.mrb[60].mxu0  ;;  %4953 = vmatpush3.bf16.msra.mxu0 %v5023_v34 }
 0x56c   :  { %v4820_v58 = vpop.f32.mrb[61].mxu0 }
 0x56d   :  { %v2007_v20 = vpop.f32.mrb[62].mxu0  ;;  %v2055_v59 = vpop.f32.mrb[52].mxu1 }
 0x56e   :  { %v2573_v32 = vpack.c.bf16 %v2055_v59, %v2004_v49  ;;  %v4821_v62 = vpop.f32.mrb[63].mxu0  ;;  %v4828_v14 = vpop.f32.mrb[53].mxu1 }
 0x56f   :  { %v2058_v63 = vpop.f32.mrb[54].mxu1 }
 0x570   :  { %v4829_v22 = vpop.f32.mrb[55].mxu1  ;;  %4918 = vmatprep.mubr.msk.bf16.mxu0 %vm559_vm2, %v2573_v32 }
 0x573   :  { %v2106_v24 = vpop.f32.mrb[64].mxu0 }
 0x574   :  { %v4836_v16 = vpop.f32.mrb[65].mxu0 }
 0x575   :  { %v2109_v23 = vpop.f32.mrb[66].mxu0  ;;  %v2157_v0 = vpop.f32.mrb[56].mxu1 }
 0x576   :  { %v2574_v56 = vpack.c.bf16 %v2157_v0, %v2106_v24  ;;  %v4837_v61 = vpop.f32.mrb[67].mxu0  ;;  %v4844_v28 = vpop.f32.mrb[57].mxu1 }
 0x577   :  { %v2160_v29 = vpop.f32.mrb[58].mxu1 }
 0x578   :  { %v4845_v19 = vpop.f32.mrb[59].mxu1  ;;  %4919 = vmatmul.mubr.msk.bf16.gmra.mrb[88].mxu0 %vm559_vm2, %v2574_v56 }
 0x58b   :  { %v2208_v8 = vpop.f32.mrb[68].mxu0 }
 0x58c   :  { %v4852_v17 = vpop.f32.mrb[69].mxu0 }
 0x58d   :  { %v2211_v21 = vpop.f32.mrb[70].mxu0  ;;  %v2259_v47 = vpop.f32.mrb[60].mxu1 }
 0x58e   :  { %v2575_v40 = vpack.c.bf16 %v2259_v47, %v2208_v8  ;;  %v4853_v7 = vpop.f32.mrb[71].mxu0  ;;  %v4860_v33 = vpop.f32.mrb[61].mxu1 }
 0x58f   :  { %v2262_v38 = vpop.f32.mrb[62].mxu1 }
 0x590   :  { %v4861_v10 = vpop.f32.mrb[63].mxu1  ;;  %4922 = vmatprep.mubr.msk.bf16.mxu0 %vm559_vm2, %v2575_v40 }
 0x593   :  { %v2310_v31 = vpop.f32.mrb[72].mxu0 }
 0x594   :  { %v4868_v5 = vpop.f32.mrb[73].mxu0 }
 0x595   :  { %v2313_v4 = vpop.f32.mrb[74].mxu0  ;;  %v2361_v36 = vpop.f32.mrb[64].mxu1 }
 0x596   :  { %v2576_v18 = vpack.c.bf16 %v2361_v36, %v2310_v31  ;;  %v4869_v3 = vpop.f32.mrb[75].mxu0  ;;  %v4876_v25 = vpop.f32.mrb[65].mxu1 }
 0x597   :  { %v2364_v51 = vpop.f32.mrb[66].mxu1 }
 0x598   :  { %v4877_v39 = vpop.f32.mrb[67].mxu1  ;;  %4923 = vmatmul.mubr.msk.bf16.gmra.mrb[92].mxu0 %vm559_vm2, %v2576_v18 }
 0x5ab   :  { %v2412_v6 = vpop.f32.mrb[76].mxu0 }
 0x5ac   :  { %v4884_v53 = vpop.f32.mrb[77].mxu0 }
 0x5ad   :  { %v2415_v54 = vpop.f32.mrb[78].mxu0  ;;  %v2463_v35 = vpop.f32.mrb[68].mxu1  ;;  %v5024_v53 = vld [vmem:[%s6903_s2 + $0x50] sm:$0xff]  }
 0x5ae   :  { %v2577_v52 = vpack.c.bf16 %v2463_v35, %v2412_v6  ;;  %v4885_v30 = vpop.f32.mrb[79].mxu0  ;;  %v4892_v2 = vpop.f32.mrb[69].mxu1  ;;  %v5025_v54 = vld [vmem:[%s6903_s2 + $0x58] sm:$0xff]   ;;  %4954 = vmatprep.subr.bf16.mxu0 %v5024_v53 }
 0x5af   :  { %v2466_v45 = vpop.f32.mrb[70].mxu1  ;;  %4955 = vmatpush3.bf16.msra.mxu0 %v5024_v53  ;;  %v4409_v35 = vld [vmem:[#allocation2 + $0x10] ss:$0 sm:$0xff] }
 0x5b0   :  { %v4893_v15 = vpop.f32.mrb[71].mxu1  ;;  %4926 = vmatprep.mubr.msk.bf16.mxu0 %vm559_vm2, %v2577_v52  ;;  %4956 = vmatprep.subr.bf16.mxu0 %v5025_v54 }
 0x5b3   :  { %v2514_v37 = vpop.f32.mrb[80].mxu0  ;;  %4957 = vmatpush3.bf16.msra.mxu0 %v5025_v54 }
 0x5b4   :  { %v4900_v11 = vpop.f32.mrb[81].mxu0 }
 0x5b5   :  { %v2517_v27 = vpop.f32.mrb[82].mxu0  ;;  %v2565_v12 = vpop.f32.mrb[72].mxu1 }
 0x5b6   :  { %v2578_v60 = vpack.c.bf16 %v2565_v12, %v2514_v37  ;;  %v4901_v50 = vpop.f32.mrb[83].mxu0  ;;  %v4908_v55 = vpop.f32.mrb[73].mxu1 }
 0x5b7   :  { %v2568_v42 = vpop.f32.mrb[74].mxu1 }
 0x5b8   :  { %v4909_v44 = vpop.f32.mrb[75].mxu1  ;;  %4927 = vmatmul.mubr.msk.bf16.gmra.mrb[96].mxu0 %vm559_vm2, %v2578_v60 }
 0x639   :  { %v4916_v9 = vpop.f32.mrb[84].mxu0 }
 0x63a   :  { %v2658_v48 = vpop.f32.mrb[85].mxu0  ;;  %v6190_v32 = vadd.f32 %v4916_v9, %v4398_v41 }
 0x63b   :  { %v4917_v57 = vpop.f32.mrb[86].mxu0  ;;  %v6186_v20 = vadd.f32 %v4398_v41, %v2658_v48 }
 0x63c   :  { %v6184_v49 = vadd.f32 %v4917_v57, %v4398_v41  ;;  %v2661_v58 = vpop.f32.mrb[87].mxu0 }
 0x63d   :  { %v6188_v59 = vadd.f32 %v4398_v41, %v2661_v58 }
 0x63e   :  { %v2722_v14 = vpack.c.bf16 %v6184_v49, %v6190_v32 }
 0x63f   :  { %v2721_v62 = vpack.c.bf16 %v6188_v59, %v6186_v20 }
 0x641   :  { %4934 = vmatprep.mubr.msk.bf16.mxu1 %vm559_vm2, %v2721_v62 }
 0x642   :  { %4935 = vmatmul.mubr.msk.bf16.vlgmr.msra.gmra.mrb[76].mxu1 %vm559_vm2, %v2722_v14 }
 0x64b   :  { %v4920_v63 = vpop.f32.mrb[88].mxu0 }
 0x64c   :  { %v2674_v22 = vpop.f32.mrb[89].mxu0  ;;  %v6204_v61 = vadd.f32 %v4920_v63, %v4398_v41 }
 0x64d   :  { %v4921_v24 = vpop.f32.mrb[90].mxu0  ;;  %v6200_v0 = vadd.f32 %v4398_v41, %v2674_v22 }
 0x64e   :  { %v6198_v16 = vadd.f32 %v4921_v24, %v4398_v41  ;;  %v2677_v23 = vpop.f32.mrb[91].mxu0 }
 0x64f   :  { %v6202_v56 = vadd.f32 %v4398_v41, %v2677_v23 }
 0x650   :  { %v2724_v29 = vpack.c.bf16 %v6198_v16, %v6204_v61 }
 0x651   :  { %v2723_v28 = vpack.c.bf16 %v6202_v56, %v6200_v0 }
 0x653   :  { %4938 = vmatprep.mubr.msk.bf16.mxu1 %vm559_vm2, %v2723_v28 }
 0x654   :  { %4939 = vmatmul.mubr.msk.bf16.gmra.mrb[80].mxu1 %vm559_vm2, %v2724_v29 }
 0x66b   :  { %v4924_v19 = vpop.f32.mrb[92].mxu0 }
 0x66c   :  { %v2690_v8 = vpop.f32.mrb[93].mxu0  ;;  %v6218_v33 = vadd.f32 %v4924_v19, %v4398_v41 }
 0x66d   :  { %v4925_v17 = vpop.f32.mrb[94].mxu0  ;;  %v6214_v40 = vadd.f32 %v4398_v41, %v2690_v8 }
 0x66e   :  { %v6212_v21 = vadd.f32 %v4925_v17, %v4398_v41  ;;  %v2693_v47 = vpop.f32.mrb[95].mxu0 }
 0x66f   :  { %v6216_v7 = vadd.f32 %v4398_v41, %v2693_v47 }
 0x670   :  { %v2726_v10 = vpack.c.bf16 %v6212_v21, %v6218_v33 }
 0x671   :  { %v2725_v38 = vpack.c.bf16 %v6216_v7, %v6214_v40 }
 0x673   :  { %4942 = vmatprep.mubr.msk.bf16.mxu1 %vm559_vm2, %v2725_v38 }
 0x674   :  { %4943 = vmatmul.mubr.msk.bf16.gmra.mrb[84].mxu1 %vm559_vm2, %v2726_v10 }
 0x68b   :  { %v4928_v31 = vpop.f32.mrb[96].mxu0 }
 0x68c   :  { %v2706_v5 = vpop.f32.mrb[97].mxu0  ;;  %v6232_v51 = vadd.f32 %v4928_v31, %v4398_v41 }
 0x68d   :  { %v4929_v4 = vpop.f32.mrb[98].mxu0  ;;  %v6228_v3 = vadd.f32 %v4398_v41, %v2706_v5 }
 0x68e   :  { %v6226_v36 = vadd.f32 %v4929_v4, %v4398_v41  ;;  %v2709_v18 = vpop.f32.mrb[99].mxu0 }
 0x68f   :  { %v6230_v25 = vadd.f32 %v4398_v41, %v2709_v18 }
 0x690   :  { %v2728_v6 = vpack.c.bf16 %v6226_v36, %v6232_v51 }
 0x691   :  { %v2727_v39 = vpack.c.bf16 %v6230_v25, %v6228_v3 }
 0x693   :  { %4946 = vmatprep.mubr.msk.bf16.mxu1 %vm559_vm2, %v2727_v39 }
 0x694   :  { %4947 = vmatmul.mubr.msk.bf16.gmra.mrb[88].mxu1 %vm559_vm2, %v2728_v6 }
 0x695   :  { %4976 = vmatprep.mubr.msk.bf16.mxu1 %vm5236_vm1, %v5233_v1 }
 0x715   :  { %v4936_v52 = vpop.f32.mrb[76].mxu1 }
 0x716   :  { %v2817_v30 = vadd.f32 %v4936_v52, %v4409_v35  ;;  %v2808_v2 = vpop.f32.mrb[77].mxu1 }
 0x717   :  { %v2809_v45 = vadd.f32 %v4409_v35, %v2808_v2  ;;  %v4937_v15 = vpop.f32.mrb[78].mxu1 }
 0x718   :  { %v2820_v37 = vadd.f32 %v4937_v15, %v4409_v35  ;;  %v2811_v11 = vpop.f32.mrb[79].mxu1  ;;  %v2873_v12 = vmax.f32 %v2817_v30, 0.0 }
 0x719   :  { %v2812_v27 = vadd.f32 %v4409_v35, %v2811_v11  ;;  %v2871_v50 = vmax.f32 %v2809_v45, 0.0 }
 0x71a   :  { %v2874_v60 = vmax.f32 %v2820_v37, 0.0 }
 0x71b   :  { %v2872_v55 = vmax.f32 %v2812_v27, 0.0 }
 0x71c   :  { %v2888_v42 = vpack.c.bf16 %v2874_v60, %v2873_v12 }
 0x71d   :  { %v2887_v44 = vpack.c.bf16 %v2872_v55, %v2871_v50  ;;  %v5026_v55 = vld [vmem:[%s6903_s2 + $0x60] sm:$0xff]  }
 0x71e   :  { %4975 = vmatpush3.bf16.msra.mxu1 %v5026_v55 }
 0x71f   :  { %4958 = vmatprep.mubr.msk.bf16.mxu0 %vm191_vm4, %v2887_v44  ;;  %4980 = vmatprep.subr.bf16.mxu1 %v5233_v1 }
 0x720   :  { %4959 = vmatmul.mubr.msk.bf16.vlgmr.msra.gmra.mrb[100].mxu0 %vm191_vm4, %v2888_v42  ;;  %v3320_v42 = vld [vmem:[%s6902_s1] sm:$0xff] }
 0x727   :  { %v4940_v43 = vpop.f32.mrb[80].mxu1 }
 0x728   :  { %v2833_v46 = vadd.f32 %v4940_v43, %v4409_v35  ;;  %v2824_v13 = vpop.f32.mrb[81].mxu1  ;;  %v6268_v43 = vld [vmem:[#allocation2 + $0x18] ss:$0 sm:$0xff] }
 0x729   :  { %v2825_v34 = vadd.f32 %v4409_v35, %v2824_v13  ;;  %v4941_v9 = vpop.f32.mrb[82].mxu1 }
 0x72a   :  { %v2836_v41 = vadd.f32 %v4941_v9, %v4409_v35  ;;  %v2827_v48 = vpop.f32.mrb[83].mxu1  ;;  %v2877_v58 = vmax.f32 %v2833_v46, 0.0 }
 0x72b   :  { %v2828_v57 = vadd.f32 %v4409_v35, %v2827_v48  ;;  %v2875_v14 = vmax.f32 %v2825_v34, 0.0 }
 0x72c   :  { %v2878_v62 = vmax.f32 %v2836_v41, 0.0 }
 0x72d   :  { %v2876_v63 = vmax.f32 %v2828_v57, 0.0 }
 0x72e   :  { %v2890_v22 = vpack.c.bf16 %v2878_v62, %v2877_v58 }
 0x72f   :  { %v2889_v24 = vpack.c.bf16 %v2876_v63, %v2875_v14 }
 0x731   :  { %4962 = vmatprep.mubr.msk.bf16.mxu0 %vm191_vm4, %v2889_v24 }
 0x732   :  { %4963 = vmatmul.mubr.msk.bf16.gmra.mrb[104].mxu0 %vm191_vm4, %v2890_v22 }
 0x747   :  { %v4944_v23 = vpop.f32.mrb[84].mxu1 }
 0x748   :  { %v2849_v28 = vadd.f32 %v4944_v23, %v4409_v35  ;;  %v2840_v29 = vpop.f32.mrb[85].mxu1 }
 0x749   :  { %v2841_v19 = vadd.f32 %v4409_v35, %v2840_v29  ;;  %v4945_v8 = vpop.f32.mrb[86].mxu1 }
 0x74a   :  { %v2852_v17 = vadd.f32 %v4945_v8, %v4409_v35  ;;  %v2843_v47 = vpop.f32.mrb[87].mxu1  ;;  %v2881_v10 = vmax.f32 %v2849_v28, 0.0 }
 0x74b   :  { %v2844_v38 = vadd.f32 %v4409_v35, %v2843_v47  ;;  %v2879_v5 = vmax.f32 %v2841_v19, 0.0 }
 0x74c   :  { %v2882_v31 = vmax.f32 %v2852_v17, 0.0 }
 0x74d   :  { %v2880_v4 = vmax.f32 %v2844_v38, 0.0 }
 0x74e   :  { %v2892_v18 = vpack.c.bf16 %v2882_v31, %v2881_v10 }
 0x74f   :  { %v2891_v39 = vpack.c.bf16 %v2880_v4, %v2879_v5 }
 0x751   :  { %4966 = vmatprep.mubr.msk.bf16.mxu0 %vm191_vm4, %v2891_v39 }
 0x752   :  { %4967 = vmatmul.mubr.msk.bf16.gmra.mrb[108].mxu0 %vm191_vm4, %v2892_v18 }
 0x767   :  { %v4948_v6 = vpop.f32.mrb[88].mxu1 }
 0x768   :  { %v2865_v53 = vadd.f32 %v4948_v6, %v4409_v35  ;;  %v2856_v54 = vpop.f32.mrb[89].mxu1 }
 0x769   :  { %v2857_v52 = vadd.f32 %v4409_v35, %v2856_v54  ;;  %v4949_v30 = vpop.f32.mrb[90].mxu1 }
 0x76a   :  { %v2868_v2 = vadd.f32 %v4949_v30, %v4409_v35  ;;  %v2859_v45 = vpop.f32.mrb[91].mxu1  ;;  %v2885_v37 = vmax.f32 %v2865_v53, 0.0 }
 0x76b   :  { %v2860_v15 = vadd.f32 %v4409_v35, %v2859_v45  ;;  %v2883_v27 = vmax.f32 %v2857_v52, 0.0  ;;  %v3321_v35 = vld [vmem:[%s6902_s1 + $0x8] sm:$0xff] }
 0x76c   :  { %v2886_v11 = vmax.f32 %v2868_v2, 0.0  ;;  %v3322_v44 = vpack.c.bf16 %v3321_v35, %v3320_v42 }
 0x76d   :  { %v2884_v12 = vmax.f32 %v2860_v15, 0.0 }
 0x76e   :  { %v2894_v60 = vpack.c.bf16 %v2886_v11, %v2885_v37  ;;  %4977 = vmatmul.mubr.msk.bf16.vlgmr.msra.gmra.mrb[92].mxu1 %vm3336_vm3, %v3322_v44 }
 0x76f   :  { %v2893_v50 = vpack.c.bf16 %v2884_v12, %v2883_v27  ;;  %4984 = vmatprep.mubr.msk.bf16.mxu1 %vm5236_vm1, %v5233_v1 }
 0x771   :  { %4970 = vmatprep.mubr.msk.bf16.mxu0 %vm191_vm4, %v2893_v50 }
 0x772   :  { %4971 = vmatmul.mubr.msk.bf16.gmra.mrb[112].mxu0 %vm191_vm4, %v2894_v60 }
 0x7f3   :  { %v4960_v46 = vpop.f32.mrb[100].mxu0 }
 0x7f4   :  { %v2999_v13 = vadd.f32 %v4960_v46, %v6268_v43  ;;  %v2990_v34 = vpop.f32.mrb[101].mxu0 }
 0x7f5   :  { %v2991_v9 = vadd.f32 %v6268_v43, %v2990_v34  ;;  %v4961_v41 = vpop.f32.mrb[102].mxu0 }
 0x7f6   :  { %v6273_v48 = vadd.f32 %v2999_v13, %v6190_v32  ;;  %v3002_v57 = vadd.f32 %v4961_v41, %v6268_v43  ;;  %v2993_v58 = vpop.f32.mrb[103].mxu0 }
 0x7f7   :  { %v6277_v62 = vadd.f32 %v2991_v9, %v6186_v20  ;;  %v2994_v63 = vadd.f32 %v6268_v43, %v2993_v58 }
 0x7f8   :  { %v6280_v14 = vadd.f32 %v3002_v57, %v6184_v49  ;;  %v3077_v22 = vsel %vm559_vm2, %v6273_v48, 0.0 }
 0x7f9   :  { %3078 = vadd.xlane.f32.xlu1 %v3077_v22  ;;  %v3071_v24 = vsel %vm559_vm2, %v6277_v62, 0.0  ;;  %v6288_v32 = vadd.f32 %v2994_v63, %v6188_v59 }
 0x7fa   :  { %3072 = vadd.xlane.f32.xlu0 %v3071_v24  ;;  %v3080_v20 = vsel %vm559_vm2, %v6280_v14, 0.0 }
 0x7fb   :  { %v3074_v49 = vsel %vm559_vm2, %v6288_v32, 0.0 }
 0x7fd   :  { %3081 = vadd.xlane.f32.xlu1 %v3080_v20 }
 0x801   :  { %3075 = vadd.xlane.f32.xlu1 %v3074_v49 }
 0x805   :  { %v4964_v23 = vpop.f32.mrb[104].mxu0 }
 0x806   :  { %v3015_v28 = vadd.f32 %v4964_v23, %v6268_v43  ;;  %v3006_v29 = vpop.f32.mrb[105].mxu0 }
 0x807   :  { %v3007_v19 = vadd.f32 %v6268_v43, %v3006_v29  ;;  %v4965_v8 = vpop.f32.mrb[106].mxu0 }
 0x808   :  { %v6297_v17 = vadd.f32 %v3015_v28, %v6204_v61  ;;  %v3009_v59 = vpop.f32.mrb[107].mxu0  ;;  %v3018_v31 = vadd.f32 %v4965_v8, %v6268_v43 }
 0x809   :  { %v6300_v47 = vadd.f32 %v3007_v19, %v6200_v0  ;;  %v3010_v38 = vadd.f32 %v6268_v43, %v3009_v59 }
 0x80a   :  { %v3089_v10 = vsel %vm559_vm2, %v6297_v17, 0.0  ;;  %v6312_v61 = vadd.f32 %v3018_v31, %v6198_v16 }
 0x80b   :  { %3090 = vadd.xlane.f32.xlu1 %v3089_v10  ;;  %v6307_v5 = vadd.f32 %v3010_v38, %v6202_v56  ;;  %v3083_v4 = vsel %vm559_vm2, %v6300_v47, 0.0 }
 0x80c   :  { %v3092_v18 = vsel %vm559_vm2, %v6312_v61, 0.0 }
 0x80d   :  { %v3086_v0 = vsel %vm559_vm2, %v6307_v5, 0.0 }
 0x80f   :  { %3084 = vadd.xlane.f32.xlu1 %v3083_v4 }
 0x813   :  { %3087 = vadd.xlane.f32.xlu1 %v3086_v0 }
 0x817   :  { %3093 = vadd.xlane.f32.xlu1 %v3092_v18 }
 0x825   :  { %v4968_v39 = vpop.f32.mrb[108].mxu0 }
 0x826   :  { %v3031_v6 = vadd.f32 %v4968_v39, %v6268_v43  ;;  %v3022_v56 = vpop.f32.mrb[109].mxu0 }
 0x827   :  { %v3023_v53 = vadd.f32 %v6268_v43, %v3022_v56  ;;  %v4969_v54 = vpop.f32.mrb[110].mxu0 }
 0x828   :  { %v6321_v52 = vadd.f32 %v3031_v6, %v6218_v33  ;;  %v3025_v16 = vpop.f32.mrb[111].mxu0  ;;  %v3034_v2 = vadd.f32 %v4969_v54, %v6268_v43 }
 0x829   :  { %v6324_v30 = vadd.f32 %v3023_v53, %v6214_v40  ;;  %v3026_v37 = vadd.f32 %v6268_v43, %v3025_v16 }
 0x82a   :  { %v3101_v45 = vsel %vm559_vm2, %v6321_v52, 0.0  ;;  %v6330_v15 = vadd.f32 %v3034_v2, %v6212_v21 }
 0x82b   :  { %3102 = vadd.xlane.f32.xlu0 %v3101_v45  ;;  %v3095_v11 = vsel %vm559_vm2, %v6324_v30, 0.0  ;;  %v6336_v33 = vadd.f32 %v3026_v37, %v6216_v7 }
 0x82c   :  { %v3104_v40 = vsel %vm559_vm2, %v6330_v15, 0.0 }
 0x82d   :  { %v3098_v27 = vsel %vm559_vm2, %v6336_v33, 0.0 }
 0x82f   :  { %3096 = vadd.xlane.f32.xlu0 %v3095_v11 }
 0x833   :  { %3105 = vadd.xlane.f32.xlu0 %v3104_v40 }
 0x837   :  { %3099 = vadd.xlane.f32.xlu0 %v3098_v27 }
 0x841   :  { %v6395_v6 = vpop.f32.mrb[92].mxu1 }
 0x842   :  { %v4978_v56 = vpop.f32.mrb[93].mxu1 }
 0x845   :  { %v4972_v12 = vpop.f32.mrb[112].mxu0 }
 0x846   :  { %v3047_v21 = vadd.f32 %v4972_v12, %v6268_v43  ;;  %v3038_v60 = vpop.f32.mrb[113].mxu0 }
 0x847   :  { %v3039_v50 = vadd.f32 %v6268_v43, %v3038_v60  ;;  %v4973_v55 = vpop.f32.mrb[114].mxu0 }
 0x848   :  { %v6345_v42 = vadd.f32 %v3047_v21, %v6232_v51  ;;  %v3041_v7 = vpop.f32.mrb[115].mxu0  ;;  %v3050_v13 = vadd.f32 %v4973_v55, %v6268_v43 }
 0x849   :  { %v6348_v35 = vadd.f32 %v3039_v50, %v6228_v3  ;;  %v3042_v44 = vadd.f32 %v6268_v43, %v3041_v7 }
 0x84a   :  { %v3113_v46 = vsel %vm559_vm2, %v6345_v42, 0.0  ;;  %v6360_v51 = vadd.f32 %v3050_v13, %v6226_v36 }
 0x84b   :  { %3114 = vadd.xlane.f32.xlu0 %v3113_v46  ;;  %v6355_v34 = vadd.f32 %v3042_v44, %v6230_v25  ;;  %v3107_v9 = vsel %vm559_vm2, %v6348_v35, 0.0 }
 0x84c   :  { %v3116_v41 = vsel %vm559_vm2, %v6360_v51, 0.0 }
 0x84d   :  { %v3110_v3 = vsel %vm559_vm2, %v6355_v34, 0.0 }
 0x84f   :  { %3108 = vadd.xlane.f32.xlu0 %v3107_v9 }
 0x853   :  { %3111 = vadd.xlane.f32.xlu0 %v3110_v3 }
 0x857   :  { %3117 = vadd.xlane.f32.xlu0 %v3116_v41 }
 0x886   :  { %v3079_v57 = vpop.xlane.xlu1 %3078 }
 0x887   :  { %v3122_v43 = vmul.f32 0.03125, %v3079_v57  ;;  %v3073_v58 = vpop.xlane.xlu0 %3072 }
 0x888   :  { %v3120_v25 = vmul.f32 0.03125, %v3073_v58 }
 0x889   :  { %v6367_v63 = vsub.f32 %v6273_v48, %v3122_v43 }
 0x88a   :  { %v6370_v22 = vsub.f32 %v6277_v62, %v3120_v25  ;;  %v3082_v36 = vpop.xlane.xlu1 %3081  ;;  %v6438_v25 = vpop.f32.mrb[94].mxu1 }
 0x88b   :  { %v3123_v24 = vmul.f32 0.03125, %v3082_v36  ;;  %v3154_v20 = vmul.f32 %v6367_v63, %v6367_v63 }
 0x88c   :  { %v3152_v28 = vmul.f32 %v6370_v22, %v6370_v22 }
 0x88d   :  { %v6375_v49 = vsub.f32 %v6280_v14, %v3123_v24  ;;  %v3174_v23 = vsel %vm559_vm2, %v3154_v20, 0.0 }
 0x88e   :  { %3175 = vadd.xlane.f32.xlu1 %v3174_v23  ;;  %v3076_v29 = vpop.xlane.xlu1 %3075  ;;  %v3168_v62 = vsel %vm559_vm2, %v3152_v28, 0.0 }
 0x88f   :  { %v3121_v48 = vmul.f32 0.03125, %v3076_v29  ;;  %v3155_v8 = vmul.f32 %v6375_v49, %v6375_v49 }
 0x891   :  { %v6381_v19 = vsub.f32 %v6288_v32, %v3121_v48  ;;  %v3177_v38 = vsel %vm559_vm2, %v3155_v8, 0.0 }
 0x892   :  { %3169 = vadd.xlane.f32.xlu1 %v3168_v62 }
 0x893   :  { %v3153_v14 = vmul.f32 %v6381_v19, %v6381_v19 }
 0x895   :  { %v3171_v59 = vsel %vm559_vm2, %v3153_v14, 0.0 }
 0x896   :  { %3172 = vadd.xlane.f32.xlu0 %v3171_v59  ;;  %3178 = vadd.xlane.f32.xlu1 %v3177_v38 }
 0x898   :  { %v3091_v10 = vpop.xlane.xlu1 %3090 }
 0x899   :  { %v3126_v37 = vmul.f32 0.03125, %v3091_v10 }
 0x89b   :  { %v6410_v21 = vsub.f32 %v6297_v17, %v3126_v37 }
 0x89c   :  { %v3085_v31 = vpop.xlane.xlu1 %3084 }
 0x89d   :  { %v3124_v4 = vmul.f32 0.03125, %v3085_v31 }
 0x89f   :  { %v6391_v32 = vsub.f32 %v6300_v47, %v3124_v4 }
 0x8a0   :  { %v3088_v0 = vpop.xlane.xlu1 %3087 }
 0x8a1   :  { %v3125_v18 = vmul.f32 0.03125, %v3088_v0  ;;  %v3156_v39 = vmul.f32 %v6391_v32, %v6391_v32 }
 0x8a3   :  { %v6398_v53 = vsub.f32 %v6307_v5, %v3125_v18  ;;  %v3180_v54 = vsel %vm559_vm2, %v3156_v39, 0.0 }
 0x8a4   :  { %3181 = vadd.xlane.f32.xlu1 %v3180_v54  ;;  %v3094_v40 = vpop.xlane.xlu1 %3093  ;;  %v6466_v54 = vld [vmem:[#allocation2 + $0x30] ss:$0 sm:$0xff] }
 0x8a5   :  { %v3157_v16 = vmul.f32 %v6398_v53, %v6398_v53  ;;  %v3127_v60 = vmul.f32 0.03125, %v3094_v40 }
 0x8a7   :  { %v3183_v47 = vsel %vm559_vm2, %v3157_v16, 0.0  ;;  %v6419_v46 = vsub.f32 %v6312_v61, %v3127_v60  ;;  %v3375_v16 = vadd.f32 %v6466_v54, %v6395_v6 }
 0x8a8   :  { %3184 = vadd.xlane.f32.xlu1 %v3183_v47  ;;  %v5238_v47 = vmov 1966171168  }
 0x8a9   :  { %5097 = vtanh.f32 %v3375_v16 }
 0x8b8   :  { %v3103_v2 = vpop.xlane.xlu0 %3102 }
 0x8b9   :  { %v3130_v45 = vmul.f32 0.03125, %v3103_v2  ;;  %v3387_v2 = vunpack.c.l.s4 %v5238_v47 }
 0x8bb   :  { %v6405_v11 = vsub.f32 %v6321_v52, %v3130_v45  ;;  %v3388_v45 = vunpack.c.0.s8 %v3387_v2 }
 0x8bc   :  { %v3097_v27 = vpop.xlane.xlu0 %3096 }
 0x8bd   :  { %v3128_v12 = vmul.f32 0.03125, %v3097_v27  ;;  %v3162_v5 = vmul.f32 %v6405_v11, %v6405_v11 }
 0x8bf   :  { %v6413_v50 = vsub.f32 %v6324_v30, %v3128_v12  ;;  %v3198_v55 = vsel %vm559_vm2, %v3162_v5, 0.0  ;;  %v3158_v30 = vmul.f32 %v6410_v21, %v6410_v21  ;;  %v6473_v12 = vpop.eup %5097 }
 0x8c0   :  { %3199 = vadd.xlane.f32.xlu0 %v3198_v55  ;;  %v3106_v7 = vpop.xlane.xlu0 %3105 }
 0x8c1   :  { %v3131_v44 = vmul.f32 0.03125, %v3106_v7  ;;  %v3160_v52 = vmul.f32 %v6413_v50, %v6413_v50  ;;  %v3186_v61 = vsel %vm559_vm2, %v3158_v30, 0.0 }
 0x8c3   :  { %v6422_v13 = vsub.f32 %v6330_v15, %v3131_v44  ;;  %v3192_v17 = vsel %vm559_vm2, %v3160_v52, 0.0  ;;  %v3159_v15 = vmul.f32 %v6419_v46, %v6419_v46 }
 0x8c4   :  { %3193 = vadd.xlane.f32.xlu1 %v3192_v17  ;;  %v3100_v9 = vpop.xlane.xlu0 %3099 }
 0x8c5   :  { %v3129_v3 = vmul.f32 0.03125, %v3100_v9  ;;  %v3163_v41 = vmul.f32 %v6422_v13, %v6422_v13  ;;  %v3189_v36 = vsel %vm559_vm2, %v3159_v15, 0.0 }
 0x8c7   :  { %v6430_v57 = vsub.f32 %v6336_v33, %v3129_v3  ;;  %v3201_v43 = vsel %vm559_vm2, %v3163_v41, 0.0  ;;  %v4979_v33 = vpop.f32.mrb[95].mxu1 }
 0x8c8   :  { %3187 = vadd.xlane.f32.xlu1 %v3186_v61  ;;  %3202 = vadd.xlane.f32.xlu0 %v3201_v43 }
 0x8c9   :  { %v3161_v58 = vmul.f32 %v6430_v57, %v6430_v57 }
 0x8cb   :  { %v3195_v24 = vsel %vm559_vm2, %v3161_v58, 0.0  ;;  %v6480_v58 = vld [vmem:[#allocation2 + $0x20] ss:$0 sm:$0xff] }
 0x8cc   :  { %3190 = vadd.xlane.f32.xlu1 %v3189_v36  ;;  %3196 = vadd.xlane.f32.xlu0 %v3195_v24  ;;  %v6483_v24 = vld [vmem:[#allocation2 + $0x28] ss:$0 sm:$0xff] }
 0x8d8   :  { %v3115_v20 = vpop.xlane.xlu0 %3114 }
 0x8d9   :  { %v3134_v23 = vmul.f32 0.03125, %v3115_v20 }
 0x8db   :  { %v6443_v28 = vsub.f32 %v6345_v42, %v3134_v23 }
 0x8dc   :  { %v3109_v29 = vpop.xlane.xlu0 %3108 }
 0x8dd   :  { %v3132_v48 = vmul.f32 0.03125, %v3109_v29  ;;  %v3166_v62 = vmul.f32 %v6443_v28, %v6443_v28 }
 0x8df   :  { %v6448_v8 = vsub.f32 %v6348_v35, %v3132_v48  ;;  %v3210_v14 = vsel %vm559_vm2, %v3166_v62, 0.0 }
 0x8e0   :  { %3211 = vadd.xlane.f32.xlu0 %v3210_v14  ;;  %v3112_v59 = vpop.xlane.xlu0 %3111 }
 0x8e1   :  { %v3133_v38 = vmul.f32 0.03125, %v3112_v59  ;;  %v3164_v10 = vmul.f32 %v6448_v8, %v6448_v8 }
 0x8e3   :  { %v6454_v31 = vsub.f32 %v6355_v34, %v3133_v38  ;;  %v3204_v42 = vsel %vm559_vm2, %v3164_v10, 0.0 }
 0x8e4   :  { %3205 = vadd.xlane.f32.xlu0 %v3204_v42  ;;  %v3118_v4 = vpop.xlane.xlu0 %3117 }
 0x8e5   :  { %v3135_v0 = vmul.f32 0.03125, %v3118_v4  ;;  %v3165_v35 = vmul.f32 %v6454_v31, %v6454_v31 }
 0x8e7   :  { %v6460_v18 = vsub.f32 %v6360_v51, %v3135_v0  ;;  %v3207_v39 = vsel %vm559_vm2, %v3165_v35, 0.0  ;;  %v3390_v51 = vshrl.u32 %v48_v26, 7 }
 0x8e8   :  { %3208 = vadd.xlane.f32.xlu0 %v3207_v39 }
 0x8e9   :  { %v3167_v56 = vmul.f32 %v6460_v18, %v6460_v18  ;;  %v6471_v27 = vsub.s32 %v3388_v45, %v3390_v51  ;;  %v6478_v61 = vsub.s32 0, %v3390_v51 }
 0x8eb   :  { %v3213_v34 = vsel %vm559_vm2, %v3167_v56, 0.0  ;;  %v3392_v7 = vrot.slane %v6473_v12, %v6471_v27 }
 0x8ec   :  { %3214 = vadd.xlane.f32.xlu0 %v3213_v34 }
 0x8ed   :  { %v3408_v26 = vrot.slane %v3392_v7, %v6471_v27  ;;  %v3400_v43 = vcombine.high %v3392_v7, %v3392_v7 }
 0x8ef   :  { %v3430_v41 = vcombine.high %v3408_v26, %v3408_v26  ;;  %v3422_v23 = vrot.slane %v3400_v43, %v6471_v27 }
 0x8f1   :  { %v3494_v20 = vrot.slane %v3430_v41, %v6478_v61  ;;  %v3432_v10 = vcombine.high %v3422_v23, %v3422_v23 }
 0x8f3   :  { %v3498_v45 = vrot.slane %v3432_v10, %v6478_v61 }
 0x91b   :  { %v3176_v37 = vpop.xlane.xlu1 %3175 }
 0x91c   :  { %v3218_v40 = vmul.f32 0.03125, %v3176_v37 }
 0x91e   :  { %v3234_v5 = vadd.f32 1e-05, %v3218_v40  ;;  %v3490_v40 = vrot.slane %v3422_v23, %v6478_v61 }
 0x91f   :  { %v3170_v60 = vpop.xlane.xlu1 %3169 }
 0x920   :  { %5099 = vrsqrt.f32 %v3234_v5  ;;  %v3216_v55 = vmul.f32 0.03125, %v3170_v60 }
 0x922   :  { %v3232_v6 = vadd.f32 1e-05, %v3216_v55 }
 0x923   :  { %v3179_v44 = vpop.xlane.xlu1 %3178  ;;  %v3173_v52 = vpop.xlane.xlu0 %3172 }
 0x924   :  { %5101 = vrsqrt.f32 %v3232_v6  ;;  %v3219_v17 = vmul.f32 0.03125, %v3179_v44  ;;  %v3217_v30 = vmul.f32 0.03125, %v3173_v52 }
 0x926   :  { %v3235_v9 = vadd.f32 1e-05, %v3219_v17  ;;  %v3233_v3 = vadd.f32 1e-05, %v3217_v30 }
 0x928   :  { %5103 = vrsqrt.f32 %v3235_v9 }
 0x929   :  { %5105 = vrsqrt.f32 %v3233_v3  ;;  %v3378_v3 = vadd.f32 %v6466_v54, %v6438_v25 }
 0x92a   :  { %v5100_v15 = vpop.eup %5099 }
 0x92b   :  { %v3266_v36 = vmul.f32 %v5100_v15, %v6367_v63  ;;  %v3486_v63 = vrot.slane %v3408_v26, %v6478_v61 }
 0x92d   :  { %v3286_v33 = vmul.f32 %v6480_v58, %v3266_v36 }
 0x92e   :  { %v5102_v29 = vpop.eup %5101 }
 0x92f   :  { %v6489_v48 = vadd.f32 %v6483_v24, %v3286_v33  ;;  %v3264_v62 = vmul.f32 %v5102_v29, %v6370_v22 }
 0x931   :  { %v3182_v14 = vpop.xlane.xlu1 %3181  ;;  %v3565_v59 = vmul.f32 %v3494_v20, %v6489_v48  ;;  %v3284_v38 = vmul.f32 %v6480_v58, %v3264_v62 }
 0x932   :  { %v5104_v42 = vpop.eup %5103  ;;  %v3220_v4 = vmul.f32 0.03125, %v3182_v14 }
 0x933   :  { %v5106_v0 = vpop.eup %5105  ;;  %v3585_v35 = vsel %vm559_vm2, %v3565_v59, 0.0  ;;  %v6497_v39 = vadd.f32 %v6483_v24, %v3284_v38  ;;  %v3267_v56 = vmul.f32 %v5104_v42, %v6375_v49 }
 0x934   :  { %v3236_v34 = vadd.f32 1e-05, %v3220_v4  ;;  %3586 = vadd.xlane.f32.xlu1 %v3585_v35  ;;  %v3265_v22 = vmul.f32 %v5106_v0, %v6381_v19  ;;  %v3385_v19 = vcombine.high %v6473_v12, %v6473_v12 }
 0x935   :  { %v3185_v16 = vpop.xlane.xlu1 %3184  ;;  %v3563_v47 = vmul.f32 %v3486_v63, %v6497_v39  ;;  %v3287_v2 = vmul.f32 %v6480_v58, %v3267_v56 }
 0x936   :  { %5107 = vrsqrt.f32 %v3236_v34  ;;  %v3221_v51 = vmul.f32 0.03125, %v3185_v16  ;;  %v3285_v37 = vmul.f32 %v6480_v58, %v3265_v22  ;;  %v3399_v52 = vrot.slane %v3385_v19, %v6471_v27 }
 0x937   :  { %v3579_v5 = vsel %vm559_vm2, %v3563_v47, 0.0  ;;  %v6508_v49 = vadd.f32 %v6483_v24, %v3287_v2 }
 0x938   :  { %v3237_v60 = vadd.f32 1e-05, %v3221_v51  ;;  %3580 = vadd.xlane.f32.xlu1 %v3579_v5  ;;  %v6513_v55 = vadd.f32 %v6483_v24, %v3285_v37  ;;  %v6521_v12 = vrot.slane %v3399_v52, %v6471_v27  ;;  %v3401_v30 = vcombine.high %v3399_v52, %v3399_v52 }
 0x939   :  { %v3566_v7 = vmul.f32 %v3498_v45, %v6508_v49 }
 0x93a   :  { %5109 = vrsqrt.f32 %v3237_v60  ;;  %v3564_v6 = vmul.f32 %v3490_v40, %v6513_v55  ;;  %v3502_v43 = vrot.slane %v6521_v12, %v6478_v61  ;;  %v6530_v15 = vrot.slane %v3401_v30, %v6471_v27 }
 0x93b   :  { %v3588_v44 = vsel %vm559_vm2, %v3566_v7, 0.0  ;;  %5111 = vtanh.f32 %v3378_v3 }
 0x93c   :  { %3589 = vadd.xlane.f32.xlu1 %v3588_v44  ;;  %v3582_v17 = vsel %vm559_vm2, %v3564_v6, 0.0  ;;  %v3506_v25 = vrot.slane %v6530_v15, %v6478_v61 }
 0x93d   :  { %3583 = vadd.xlane.f32.xlu0 %v3582_v17 }
 0x940   :  { %v5108_v26 = vpop.eup %5107 }
 0x941   :  { %v3268_v9 = vmul.f32 %v5108_v26, %v6391_v32 }
 0x943   :  { %v3288_v41 = vmul.f32 %v6480_v58, %v3268_v9 }
 0x944   :  { %v5110_v36 = vpop.eup %5109 }
 0x945   :  { %v6533_v33 = vadd.f32 %v6483_v24, %v3288_v41  ;;  %v3269_v20 = vmul.f32 %v5110_v36, %v6398_v53  ;;  %v6546_v38 = vpop.eup %5111  ;;  %v3431_v36 = vcombine.high %v6521_v12, %v6521_v12  ;;  %v3433_v12 = vcombine.high %v6530_v15, %v6530_v15 }
 0x946   :  { %v3441_v4 = vrot.slane %v6546_v38, %v6471_v27 }
 0x947   :  { %v3567_v32 = vmul.f32 %v3502_v43, %v6533_v33  ;;  %v3289_v23 = vmul.f32 %v6480_v58, %v3269_v20 }
 0x948   :  { %v3457_v16 = vrot.slane %v3441_v4, %v6471_v27  ;;  %v3449_v6 = vcombine.high %v3441_v4, %v3441_v4 }
 0x949   :  { %v3591_v54 = vsel %vm559_vm2, %v3567_v32, 0.0  ;;  %v6542_v29 = vadd.f32 %v6483_v24, %v3289_v23 }
 0x94a   :  { %3592 = vadd.xlane.f32.xlu1 %v3591_v54  ;;  %v3479_v5 = vcombine.high %v3457_v16, %v3457_v16  ;;  %v3471_v26 = vrot.slane %v3449_v6, %v6471_v27 }
 0x94b   :  { %v3568_v62 = vmul.f32 %v3506_v25, %v6542_v29 }
 0x94c   :  { %v3526_v17 = vrot.slane %v3479_v5, %v6478_v61  ;;  %v3481_v32 = vcombine.high %v3471_v26, %v3471_v26 }
 0x94d   :  { %v3200_v14 = vpop.xlane.xlu0 %3199  ;;  %v3594_v59 = vsel %vm559_vm2, %v3568_v62, 0.0 }
 0x94e   :  { %v3226_v53 = vmul.f32 0.03125, %v3200_v14  ;;  %3595 = vadd.xlane.f32.xlu1 %v3594_v59 }
 0x950   :  { %v3242_v63 = vadd.f32 1e-05, %v3226_v53  ;;  %v3510_v53 = vrot.slane %v3431_v36, %v6478_v61 }
 0x951   :  { %v3194_v10 = vpop.xlane.xlu1 %3193 }
 0x952   :  { %5113 = vrsqrt.f32 %v3242_v63  ;;  %v3224_v42 = vmul.f32 0.03125, %v3194_v10 }
 0x954   :  { %v3240_v0 = vadd.f32 1e-05, %v3224_v42  ;;  %v3530_v42 = vrot.slane %v3481_v32, %v6478_v61 }
 0x955   :  { %v3188_v35 = vpop.xlane.xlu1 %3187  ;;  %v3203_v56 = vpop.xlane.xlu0 %3202 }
 0x956   :  { %5115 = vrsqrt.f32 %v3240_v0  ;;  %v3222_v34 = vmul.f32 0.03125, %v3188_v35  ;;  %v3227_v22 = vmul.f32 0.03125, %v3203_v56 }
 0x958   :  { %v3238_v47 = vadd.f32 1e-05, %v3222_v34  ;;  %v3243_v2 = vadd.f32 1e-05, %v3227_v22  ;;  %v3514_v22 = vrot.slane %v3433_v12, %v6478_v61 }
 0x959   :  { %v3191_v45 = vpop.xlane.xlu1 %3190  ;;  %v3197_v51 = vpop.xlane.xlu0 %3196 }
 0x95a   :  { %5117 = vrsqrt.f32 %v3238_v47  ;;  %v3223_v37 = vmul.f32 0.03125, %v3191_v45  ;;  %v3225_v40 = vmul.f32 0.03125, %v3197_v51 }
 0x95b   :  { %5119 = vrsqrt.f32 %v3243_v2  ;;  %v3522_v2 = vrot.slane %v3471_v26, %v6478_v61 }
 0x95c   :  { %v5114_v19 = vpop.eup %5113  ;;  %v3239_v60 = vadd.f32 1e-05, %v3223_v37  ;;  %v3241_v7 = vadd.f32 1e-05, %v3225_v40 }
 0x95d   :  { %v3274_v44 = vmul.f32 %v5114_v19, %v6405_v11  ;;  %v3518_v11 = vrot.slane %v3457_v16, %v6478_v61 }
 0x95e   :  { %5121 = vrsqrt.f32 %v3239_v60 }
 0x95f   :  { %5123 = vrsqrt.f32 %v3241_v7  ;;  %v3294_v52 = vmul.f32 %v6480_v58, %v3274_v44  ;;  %v3434_v7 = vcombine.high %v6546_v38, %v6546_v38 }
 0x960   :  { %v5116_v30 = vpop.eup %5115 }
 0x961   :  { %v6556_v9 = vadd.f32 %v6483_v24, %v3294_v52  ;;  %v3272_v3 = vmul.f32 %v5116_v30, %v6413_v50 }
 0x963   :  { %v3573_v41 = vmul.f32 %v3526_v17, %v6556_v9  ;;  %v3292_v43 = vmul.f32 %v6480_v58, %v3272_v3  ;;  %v3448_v3 = vrot.slane %v3434_v7, %v6471_v27 }
 0x964   :  { %v5118_v20 = vpop.eup %5117 }
 0x965   :  { %v5120_v23 = vpop.eup %5119  ;;  %v3609_v25 = vsel %vm559_vm2, %v3573_v41, 0.0  ;;  %v6566_v54 = vadd.f32 %v6483_v24, %v3292_v43  ;;  %v3270_v62 = vmul.f32 %v5118_v20, %v6410_v21  ;;  %v3464_v36 = vrot.slane %v3448_v3, %v6471_v27 }
 0x966   :  { %3610 = vadd.xlane.f32.xlu0 %v3609_v25  ;;  %v3275_v50 = vmul.f32 %v5120_v23, %v6422_v13 }
 0x967   :  { %v3571_v14 = vmul.f32 %v3518_v11, %v6566_v54  ;;  %v3290_v59 = vmul.f32 %v6480_v58, %v3270_v62  ;;  %v3480_v25 = vcombine.high %v3464_v36, %v3464_v36 }
 0x968   :  { %v5122_v63 = vpop.eup %5121  ;;  %v3295_v10 = vmul.f32 %v6480_v58, %v3275_v50 }
 0x969   :  { %v5124_v4 = vpop.eup %5123  ;;  %v3603_v21 = vsel %vm559_vm2, %v3571_v14, 0.0  ;;  %v6579_v0 = vadd.f32 %v6483_v24, %v3290_v59  ;;  %v3271_v13 = vmul.f32 %v5122_v63, %v6419_v46  ;;  %v3450_v14 = vcombine.high %v3448_v3, %v3448_v3 }
 0x96a   :  { %3604 = vadd.xlane.f32.xlu1 %v3603_v21  ;;  %v6583_v35 = vadd.f32 %v6483_v24, %v3295_v10  ;;  %v3273_v56 = vmul.f32 %v5124_v4, %v6430_v57 }
 0x96b   :  { %v3569_v15 = vmul.f32 %v3510_v53, %v6579_v0  ;;  %v3291_v34 = vmul.f32 %v6480_v58, %v3271_v13  ;;  %v3542_v53 = vrot.slane %v3480_v25, %v6478_v61  ;;  %v3534_v13 = vrot.slane %v3464_v36, %v6478_v61 }
 0x96c   :  { %v3574_v16 = vmul.f32 %v3530_v42, %v6583_v35  ;;  %v3293_v47 = vmul.f32 %v6480_v58, %v3273_v56 }
 0x96d   :  { %v3212_v45 = vpop.xlane.xlu0 %3211  ;;  %v3597_v46 = vsel %vm559_vm2, %v3569_v15, 0.0  ;;  %v6594_v51 = vadd.f32 %v6483_v24, %v3291_v34 }
 0x96e   :  { %v3230_v37 = vmul.f32 0.03125, %v3212_v45  ;;  %3598 = vadd.xlane.f32.xlu1 %v3597_v46  ;;  %v3612_v57 = vsel %vm559_vm2, %v3574_v16, 0.0  ;;  %v6598_v40 = vadd.f32 %v6483_v24, %v3293_v47 }
 0x96f   :  { %3613 = vadd.xlane.f32.xlu0 %v3612_v57  ;;  %v3570_v5 = vmul.f32 %v3514_v22, %v6594_v51 }
 0x970   :  { %v3246_v19 = vadd.f32 1e-05, %v3230_v37  ;;  %v3572_v60 = vmul.f32 %v3522_v2, %v6598_v40 }
 0x971   :  { %v3206_v6 = vpop.xlane.xlu0 %3205  ;;  %v3600_v44 = vsel %vm559_vm2, %v3570_v5, 0.0 }
 0x972   :  { %5125 = vrsqrt.f32 %v3246_v19  ;;  %v3228_v52 = vmul.f32 0.03125, %v3206_v6  ;;  %3601 = vadd.xlane.f32.xlu1 %v3600_v44  ;;  %v3606_v17 = vsel %vm559_vm2, %v3572_v60, 0.0 }
 0x973   :  { %3607 = vadd.xlane.f32.xlu0 %v3606_v17 }
 0x974   :  { %v3244_v30 = vadd.f32 1e-05, %v3228_v52 }
 0x975   :  { %v3209_v26 = vpop.xlane.xlu0 %3208 }
 0x976   :  { %5127 = vrsqrt.f32 %v3244_v30  ;;  %v3229_v41 = vmul.f32 0.03125, %v3209_v26 }
 0x978   :  { %v3245_v43 = vadd.f32 1e-05, %v3229_v41 }
 0x979   :  { %v3215_v11 = vpop.xlane.xlu0 %3214 }
 0x97a   :  { %5129 = vrsqrt.f32 %v3245_v43  ;;  %v3231_v38 = vmul.f32 0.03125, %v3215_v11 }
 0x97c   :  { %v5126_v20 = vpop.eup %5125  ;;  %v3247_v32 = vadd.f32 1e-05, %v3231_v38 }
 0x97d   :  { %v3278_v23 = vmul.f32 %v5126_v20, %v6443_v28  ;;  %v3478_v28 = vrot.slane %v3450_v14, %v6471_v27 }
 0x97e   :  { %5131 = vrsqrt.f32 %v3247_v32 }
 0x97f   :  { %v3298_v62 = vmul.f32 %v6480_v58, %v3278_v23  ;;  %v3538_v22 = vrot.slane %v3478_v28, %v6478_v61  ;;  %v3482_v2 = vcombine.high %v3478_v28, %v3478_v28  ;;  %v5028_v28 = vld [vmem:[%s6903_s2 + $0x70] sm:$0xff]  }
 0x980   :  { %v5128_v50 = vpop.eup %5127 }
 0x981   :  { %v6611_v59 = vadd.f32 %v6483_v24, %v3298_v62  ;;  %v3276_v12 = vmul.f32 %v5128_v50, %v6448_v8  ;;  %v3546_v57 = vrot.slane %v3482_v2, %v6478_v61 }
 0x983   :  { %v3577_v63 = vmul.f32 %v3542_v53, %v6611_v59  ;;  %v3296_v10 = vmul.f32 %v6480_v58, %v3276_v12  ;;  %v5027_v12 = vld [vmem:[%s6903_s2 + $0x68] sm:$0xff]  }
 0x984   :  { %v5130_v42 = vpop.eup %5129  ;;  %4981 = vmatpush3.bf16.msra.mxu1 %v5027_v12 }
 0x985   :  { %v3621_v4 = vsel %vm559_vm2, %v3577_v63, 0.0  ;;  %v6620_v21 = vadd.f32 %v6483_v24, %v3296_v10  ;;  %v3277_v56 = vmul.f32 %v5130_v42, %v6454_v31  ;;  %4982 = vmatprep.subr.bf16.mxu1 %v5233_v1 }
 0x986   :  { %3622 = vadd.xlane.f32.xlu0 %v3621_v4 }
 0x987   :  { %v3575_v15 = vmul.f32 %v3534_v13, %v6620_v21  ;;  %v3297_v8 = vmul.f32 %v6480_v58, %v3277_v56 }
 0x988   :  { %v5132_v34 = vpop.eup %5131  ;;  %4983 = vmatpush3.bf16.msra.mxu1 %v5028_v28 }
 0x989   :  { %v3615_v16 = vsel %vm559_vm2, %v3575_v15, 0.0  ;;  %v6629_v27 = vadd.f32 %v6483_v24, %v3297_v8  ;;  %v3279_v47 = vmul.f32 %v5132_v34, %v6460_v18  ;;  %4988 = vmatprep.subr.bf16.mxu1 %v5233_v1 }
 0x98a   :  { %3616 = vadd.xlane.f32.xlu0 %v3615_v16 }
 0x98b   :  { %v3576_v45 = vmul.f32 %v3538_v22, %v6629_v27  ;;  %v3299_v31 = vmul.f32 %v6480_v58, %v3279_v47 }
 0x98d   :  { %v3618_v46 = vsel %vm559_vm2, %v3576_v45, 0.0  ;;  %v6636_v37 = vadd.f32 %v6483_v24, %v3299_v31 }
 0x98e   :  { %3619 = vadd.xlane.f32.xlu0 %v3618_v46 }
 0x98f   :  { %v3578_v5 = vmul.f32 %v3546_v57, %v6636_v37 }
 0x991   :  { %v3624_v19 = vsel %vm559_vm2, %v3578_v5, 0.0 }
 0x992   :  { %3625 = vadd.xlane.f32.xlu0 %v3624_v19 }
 0x9c1   :  { %v3587_v18 = vpop.xlane.xlu1 %3586 }
 0x9c2   :  { %v3639_v60 = vrot.slane %v3587_v18, 4 }
 0x9c4   :  { %v3640_v7 = vmax.f32 %v3587_v18, %v3639_v60 }
 0x9c5   :  { %v3581_v6 = vpop.xlane.xlu1 %3580 }
 0x9c6   :  { %v3641_v44 = vrot.slane %v3640_v7, 2  ;;  %v3627_v52 = vrot.slane %v3581_v6, 4 }
 0x9c8   :  { %v3642_v58 = vmax.f32 %v3640_v7, %v3641_v44  ;;  %v3628_v17 = vmax.f32 %v3581_v6, %v3627_v52 }
 0x9c9   :  { %v3590_v30 = vpop.xlane.xlu1 %3589 }
 0x9ca   :  { %v3643_v26 = vrot.slane %v3642_v58, 1  ;;  %v3629_v24 = vrot.slane %v3628_v17, 2  ;;  %v3645_v3 = vrot.slane %v3590_v30, 4  ;;  %v3584_v41 = vpop.xlane.xlu0 %3583 }
 0x9cb   :  { %v3633_v61 = vrot.slane %v3584_v41, 4 }
 0x9cc   :  { %v3644_v43 = vmax.f32 %v3642_v58, %v3643_v26  ;;  %v3630_v11 = vmax.f32 %v3628_v17, %v3629_v24  ;;  %v3646_v36 = vmax.f32 %v3590_v30, %v3645_v3 }
 0x9cd   :  { %v3634_v38 = vmax.f32 %v3584_v41, %v3633_v61 }
 0x9ce   :  { %v3725_v20 = vsub.f32 %v3587_v18, %v3644_v43  ;;  %v3631_v32 = vrot.slane %v3630_v11, 1  ;;  %v3647_v23 = vrot.slane %v3646_v36, 2 }
 0x9cf   :  { %v3635_v25 = vrot.slane %v3634_v38, 2 }
 0x9d0   :  { %v3743_v62 = vmul.f32 1.442695, %v3725_v20  ;;  %v3632_v50 = vmax.f32 %v3630_v11, %v3631_v32  ;;  %v3648_v14 = vmax.f32 %v3646_v36, %v3647_v23 }
 0x9d1   :  { %v3636_v53 = vmax.f32 %v3634_v38, %v3635_v25 }
 0x9d2   :  { %5133 = vpow2.f32 %v3743_v62  ;;  %v3723_v63 = vsub.f32 %v3581_v6, %v3632_v50  ;;  %v3649_v10 = vrot.slane %v3648_v14, 1 }
 0x9d3   :  { %v3637_v42 = vrot.slane %v3636_v53, 1 }
 0x9d4   :  { %v3739_v4 = vmul.f32 1.442695, %v3723_v63  ;;  %v3650_v13 = vmax.f32 %v3648_v14, %v3649_v10 }
 0x9d5   :  { %v3638_v56 = vmax.f32 %v3636_v53, %v3637_v42 }
 0x9d6   :  { %5135 = vpow2.f32 %v3739_v4  ;;  %v3726_v15 = vsub.f32 %v3590_v30, %v3650_v13 }
 0x9d7   :  { %v3724_v8 = vsub.f32 %v3584_v41, %v3638_v56  ;;  %v3593_v34 = vpop.xlane.xlu1 %3592 }
 0x9d8   :  { %v3745_v22 = vmul.f32 1.442695, %v3726_v15  ;;  %v3651_v16 = vrot.slane %v3593_v34, 4 }
 0x9d9   :  { %v3741_v47 = vmul.f32 1.442695, %v3724_v8 }
 0x9da   :  { %5137 = vpow2.f32 %v3745_v22  ;;  %v3652_v2 = vmax.f32 %v3593_v34, %v3651_v16 }
 0x9db   :  { %5139 = vpow2.f32 %v3741_v47  ;;  %v3596_v45 = vpop.xlane.xlu1 %3595 }
 0x9dc   :  { %v5134_v31 = vpop.eup %5133  ;;  %v3653_v46 = vrot.slane %v3652_v2, 2  ;;  %v3657_v57 = vrot.slane %v3596_v45, 4 }
 0x9dd   :  { %v3783_v5 = vrot.slane %v5134_v31, 4 }
 0x9de   :  { %v3654_v19 = vmax.f32 %v3652_v2, %v3653_v46  ;;  %v3658_v18 = vmax.f32 %v3596_v45, %v3657_v57 }
 0x9df   :  { %v3784_v60 = vadd.f32 %v5134_v31, %v3783_v5 }
 0x9e0   :  { %v5136_v7 = vpop.eup %5135  ;;  %v3655_v6 = vrot.slane %v3654_v19, 1  ;;  %v3659_v44 = vrot.slane %v3658_v18, 2 }
 0x9e1   :  { %v3785_v52 = vrot.slane %v3784_v60, 2  ;;  %v3771_v58 = vrot.slane %v5136_v7, 4 }
 0x9e2   :  { %v3656_v17 = vmax.f32 %v3654_v19, %v3655_v6  ;;  %v3660_v30 = vmax.f32 %v3658_v18, %v3659_v44 }
 0x9e3   :  { %v3786_v26 = vadd.f32 %v3785_v52, %v3784_v60  ;;  %v3772_v24 = vadd.f32 %v5136_v7, %v3771_v58 }
 0x9e4   :  { %v6649_v3 = vpop.eup %5137  ;;  %v3727_v41 = vsub.f32 %v3593_v34, %v3656_v17  ;;  %v3661_v61 = vrot.slane %v3660_v30, 1 }
 0x9e5   :  { %v5140_v43 = vpop.eup %5139  ;;  %v3787_v11 = vrot.slane %v3786_v26, 1  ;;  %v3773_v36 = vrot.slane %v3772_v24, 2  ;;  %v3789_v38 = vrot.slane %v6649_v3, 4 }
 0x9e6   :  { %v3777_v20 = vrot.slane %v5140_v43, 4  ;;  %v3747_v32 = vmul.f32 1.442695, %v3727_v41  ;;  %v3662_v23 = vmax.f32 %v3660_v30, %v3661_v61 }
 0x9e7   :  { %v3788_v25 = vadd.f32 %v3787_v11, %v3786_v26  ;;  %v3774_v62 = vadd.f32 %v3773_v36, %v3772_v24  ;;  %v3790_v50 = vadd.f32 %v6649_v3, %v3789_v38 }
 0x9e8   :  { %v3778_v14 = vadd.f32 %v5140_v43, %v3777_v20  ;;  %5141 = vpow2.f32 %v3747_v32  ;;  %v3728_v53 = vsub.f32 %v3596_v45, %v3662_v23 }
 0x9e9   :  { %v3775_v12 = vrot.slane %v3774_v62, 1  ;;  %v3791_v63 = vrot.slane %v3790_v50, 2  ;;  %5143 = vrcp.f32 %v3788_v25 }
 0x9ea   :  { %v3779_v10 = vrot.slane %v3778_v14, 2  ;;  %v3749_v42 = vmul.f32 1.442695, %v3728_v53 }
 0x9eb   :  { %v3776_v28 = vadd.f32 %v3775_v12, %v3774_v62  ;;  %v3792_v4 = vadd.f32 %v3791_v63, %v3790_v50 }
 0x9ec   :  { %v3780_v13 = vadd.f32 %v3779_v10, %v3778_v14  ;;  %5145 = vpow2.f32 %v3749_v42 }
 0x9ed   :  { %5147 = vrcp.f32 %v3776_v28  ;;  %v3793_v56 = vrot.slane %v3792_v4, 1 }
 0x9ee   :  { %v3781_v15 = vrot.slane %v3780_v13, 1 }
 0x9ef   :  { %v3794_v8 = vadd.f32 %v3793_v56, %v3792_v4 }
 0x9f0   :  { %v3782_v34 = vadd.f32 %v3781_v15, %v3780_v13 }
 0x9f2   :  { %v6653_v22 = vpop.eup %5141  ;;  %5149 = vrcp.f32 %v3782_v34 }
 0x9f3   :  { %v3795_v16 = vrot.slane %v6653_v22, 4  ;;  %v3611_v47 = vpop.xlane.xlu0 %3610  ;;  %5151 = vrcp.f32 %v3794_v8  ;;  %v5144_v45 = vpop.eup %5143 }
 0x9f4   :  { %v3687_v2 = vrot.slane %v3611_v47, 4  ;;  %v3872_v44 = vmul.f32 %v5144_v45, %v5134_v31 }
 0x9f5   :  { %v3796_v46 = vadd.f32 %v6653_v22, %v3795_v16 }
 0x9f6   :  { %v6657_v57 = vpop.eup %5145  ;;  %v3688_v5 = vmax.f32 %v3611_v47, %v3687_v2  ;;  %v3901_v20 = vmul.f32 %v3872_v44, %v6489_v48 }
 0x9f7   :  { %v5148_v19 = vpop.eup %5147  ;;  %v3797_v18 = vrot.slane %v3796_v46, 2  ;;  %v3801_v60 = vrot.slane %v6657_v57, 4  ;;  %v3605_v6 = vpop.xlane.xlu1 %3604 }
 0x9f8   :  { %v3689_v52 = vrot.slane %v3688_v5, 2  ;;  %v3675_v58 = vrot.slane %v3605_v6, 4  ;;  %v3868_v17 = vmul.f32 %v5148_v19, %v5136_v7 }
 0x9f9   :  { %v3798_v30 = vadd.f32 %v3797_v18, %v3796_v46  ;;  %v3802_v26 = vadd.f32 %v6657_v57, %v3801_v60 }
 0x9fa   :  { %v3690_v24 = vmax.f32 %v3688_v5, %v3689_v52  ;;  %v3676_v41 = vmax.f32 %v3605_v6, %v3675_v58  ;;  %v3899_v31 = vmul.f32 %v3868_v17, %v6497_v39  ;;  %v3929_v39 = vsel %vm559_vm2, %v3901_v20, 0.0 }
 0x9fb   :  { %v3799_v61 = vrot.slane %v3798_v30, 1  ;;  %v3803_v11 = vrot.slane %v3802_v26, 2  ;;  %v6661_v36 = vpop.xlane.xlu1 %3598  ;;  %v3930_v58 = vrot.slane %v3929_v39, 4 }
 0x9fc   :  { %v5150_v38 = vpop.eup %5149  ;;  %v3691_v32 = vrot.slane %v3690_v24, 1  ;;  %v3677_v23 = vrot.slane %v3676_v41, 2  ;;  %v6664_v25 = vpop.xlane.xlu0 %3613  ;;  %v3663_v63 = vrot.slane %v6661_v36, 4 }
 0x9fd   :  { %v3870_v62 = vmul.f32 %v5150_v38, %v5140_v43  ;;  %v3800_v7 = vadd.f32 %v3799_v61, %v3798_v30  ;;  %v3804_v50 = vadd.f32 %v3803_v11, %v3802_v26  ;;  %v5152_v14 = vpop.eup %5151  ;;  %v3915_v43 = vsel %vm559_vm2, %v3899_v31, 0.0 }
 0x9fe   :  { %v3692_v53 = vmax.f32 %v3690_v24, %v3691_v32  ;;  %v3678_v12 = vmax.f32 %v3676_v41, %v3677_v23  ;;  %v3664_v4 = vmax.f32 %v6661_v36, %v3663_v63  ;;  %v3874_v15 = vmul.f32 %v5152_v14, %v6649_v3 }
 0x9ff   :  { %v3900_v10 = vmul.f32 %v3870_v62, %v6513_v55  ;;  %5153 = vrcp.f32 %v3800_v7  ;;  %v3805_v42 = vrot.slane %v3804_v50, 1  ;;  %v6670_v13 = vpop.xlane.xlu1 %3601  ;;  %v3916_v5 = vrot.slane %v3915_v43, 4 }
 0xa00   :  { %v3733_v28 = vsub.f32 %v3611_v47, %v3692_v53  ;;  %v3679_v48 = vrot.slane %v3678_v12, 1  ;;  %v6672_v56 = vpop.xlane.xlu0 %3607  ;;  %v3665_v2 = vrot.slane %v3664_v4, 2  ;;  %v3693_v47 = vrot.slane %v6664_v25, 4 }
 0xa01   :  { %v3806_v8 = vadd.f32 %v3805_v42, %v3804_v50  ;;  %v3922_v34 = vsel %vm559_vm2, %v3900_v10, 0.0  ;;  %v3669_v45 = vrot.slane %v6670_v13, 4  ;;  %v3681_v46 = vrot.slane %v6672_v56, 4 }
 0xa02   :  { %v3759_v55 = vmul.f32 1.442695, %v3733_v28  ;;  %v3680_v16 = vmax.f32 %v3678_v12, %v3679_v48  ;;  %v3666_v18 = vmax.f32 %v3664_v4, %v3665_v2  ;;  %v3923_v60 = vrot.slane %v3922_v34, 4 }
 0xa03   :  { %5155 = vrcp.f32 %v3806_v8  ;;  %v3694_v3 = vmax.f32 %v6664_v25, %v3693_v47  ;;  %v3670_v44 = vmax.f32 %v6670_v13, %v3669_v45  ;;  %v3682_v52 = vmax.f32 %v6672_v56, %v3681_v46 }
 0xa04   :  { %5157 = vpow2.f32 %v3759_v55  ;;  %v3731_v19 = vsub.f32 %v3605_v6, %v3680_v16  ;;  %v3667_v30 = vrot.slane %v3666_v18, 1  ;;  %v3917_v61 = vadd.f32 %v3916_v5, %v3915_v43 }
 0xa05   :  { %v3695_v26 = vrot.slane %v3694_v3, 2  ;;  %v3671_v24 = vrot.slane %v3670_v44, 2  ;;  %v3683_v41 = vrot.slane %v3682_v52, 2  ;;  %v3902_v11 = vmul.f32 %v3874_v15, %v6508_v49 }
 0xa06   :  { %v3755_v17 = vmul.f32 1.442695, %v3731_v19  ;;  %v3668_v38 = vmax.f32 %v3666_v18, %v3667_v30  ;;  %v3924_v20 = vadd.f32 %v3923_v60, %v3922_v34  ;;  %v3931_v62 = vadd.f32 %v3930_v58, %v3929_v39 }
 0xa07   :  { %v3696_v32 = vmax.f32 %v3694_v3, %v3695_v26  ;;  %v3672_v23 = vmax.f32 %v3670_v44, %v3671_v24  ;;  %v3684_v31 = vmax.f32 %v3682_v52, %v3683_v41  ;;  %v3918_v63 = vrot.slane %v3917_v61, 2 }
 0xa08   :  { %5159 = vpow2.f32 %v3755_v17  ;;  %v3729_v50 = vsub.f32 %v6661_v36, %v3668_v38  ;;  %v3936_v10 = vsel %vm559_vm2, %v3902_v11, 0.0  ;;  %v3925_v48 = vrot.slane %v3924_v20, 2 }
 0xa09   :  { %v5154_v6 = vpop.eup %5153  ;;  %v3697_v14 = vrot.slane %v3696_v32, 1  ;;  %v3673_v53 = vrot.slane %v3672_v23, 1  ;;  %v3685_v12 = vrot.slane %v3684_v31, 1  ;;  %v3932_v36 = vrot.slane %v3931_v62, 2 }
 0xa0a   :  { %v3876_v7 = vmul.f32 %v5154_v6, %v6653_v22  ;;  %v3751_v42 = vmul.f32 1.442695, %v3729_v50  ;;  %v3937_v2 = vrot.slane %v3936_v10, 4  ;;  %v3919_v60 = vadd.f32 %v3918_v63, %v3917_v61 }
 0xa0b   :  { %v3698_v4 = vmax.f32 %v3696_v32, %v3697_v14  ;;  %v3674_v43 = vmax.f32 %v3672_v23, %v3673_v53  ;;  %v3686_v15 = vmax.f32 %v3684_v31, %v3685_v12  ;;  %v3926_v3 = vadd.f32 %v3925_v48, %v3924_v20 }
 0xa0c   :  { %v3903_v49 = vmul.f32 %v3876_v7, %v6533_v33  ;;  %5161 = vpow2.f32 %v3751_v42  ;;  %v3938_v52 = vadd.f32 %v3937_v2, %v3936_v10  ;;  %v3920_v41 = vrot.slane %v3919_v60, 1 }
 0xa0d   :  { %v5156_v28 = vpop.eup %5155  ;;  %v3734_v55 = vsub.f32 %v6664_v25, %v3698_v4  ;;  %v3730_v33 = vsub.f32 %v6670_v13, %v3674_v43  ;;  %v3732_v16 = vsub.f32 %v6672_v56, %v3686_v15  ;;  %v3933_v56 = vadd.f32 %v3932_v36, %v3931_v62 }
 0xa0e   :  { %v6689_v8 = vpop.eup %5157  ;;  %v3878_v22 = vmul.f32 %v5156_v28, %v6657_v57  ;;  %v3943_v39 = vsel %vm559_vm2, %v3903_v49, 0.0  ;;  %v3927_v61 = vrot.slane %v3926_v3, 1  ;;  %v3939_v7 = vrot.slane %v3938_v52, 2 }
 0xa0f   :  { %v3831_v34 = vrot.slane %v6689_v8, 4  ;;  %v3944_v45 = vrot.slane %v3943_v39, 4  ;;  %v3761_v5 = vmul.f32 1.442695, %v3734_v55  ;;  %v3753_v57 = vmul.f32 1.442695, %v3730_v33 }
 0xa10   :  { %v3904_v47 = vmul.f32 %v3878_v22, %v6542_v29  ;;  %v3757_v19 = vmul.f32 1.442695, %v3732_v16  ;;  %v3934_v62 = vrot.slane %v3933_v56, 1  ;;  %v6715_v49 = vadd.f32 %v3920_v41, %v3919_v60 }
 0xa11   :  { %v3832_v46 = vadd.f32 %v6689_v8, %v3831_v34  ;;  %5163 = vpow2.f32 %v3761_v5  ;;  %v3945_v26 = vadd.f32 %v3944_v45, %v3943_v39  ;;  %v6717_v42 = vadd.f32 %v3927_v61, %v3926_v3 }
 0xa12   :  { %v6699_v18 = vpop.eup %5159  ;;  %5165 = vpow2.f32 %v3753_v57  ;;  %v3950_v58 = vsel %vm559_vm2, %v3904_v47, 0.0  ;;  %v6723_v39 = vadd.f32 %v3934_v62, %v3933_v56  ;;  %v6727_v16 = vadd.f32 %v3939_v7, %v3938_v52 }
 0xa13   :  { %v3833_v44 = vrot.slane %v3832_v46, 2  ;;  %v3819_v25 = vrot.slane %v6699_v18, 4  ;;  %v6702_v13 = vpop.xlane.xlu0 %3622  ;;  %5167 = vpow2.f32 %v3757_v19  ;;  %v3951_v20 = vrot.slane %v3950_v58, 4 }
 0xa14   :  { %v3711_v29 = vrot.slane %v6702_v13, 4  ;;  %v3946_v12 = vrot.slane %v3945_v26, 2 }
 0xa15   :  { %v3834_v17 = vadd.f32 %v3833_v44, %v3832_v46  ;;  %v3820_v30 = vadd.f32 %v6699_v18, %v3819_v25  ;;  %v3952_v43 = vadd.f32 %v3951_v20, %v3950_v58 }
 0xa16   :  { %v3712_v24 = vmax.f32 %v6702_v13, %v3711_v29  ;;  %v6710_v32 = vpop.eup %5161  ;;  %v6729_v2 = vadd.f32 %v3946_v12, %v3945_v26 }
 0xa17   :  { %v3835_v11 = vrot.slane %v3834_v17, 1  ;;  %v3821_v38 = vrot.slane %v3820_v30, 2  ;;  %v6708_v6 = vpop.xlane.xlu0 %3616  ;;  %v3807_v53 = vrot.slane %v6710_v32, 4  ;;  %v3953_v25 = vrot.slane %v3952_v43, 2 }
 0xa18   :  { %v3713_v23 = vrot.slane %v3712_v24, 2  ;;  %v3699_v31 = vrot.slane %v6708_v6, 4 }
 0xa19   :  { %v3836_v50 = vadd.f32 %v3835_v11, %v3834_v17  ;;  %v3822_v14 = vadd.f32 %v3821_v38, %v3820_v30  ;;  %v3808_v48 = vadd.f32 %v6710_v32, %v3807_v53 }
 0xa1a   :  { %v3714_v63 = vmax.f32 %v3712_v24, %v3713_v23  ;;  %v3700_v10 = vmax.f32 %v6708_v6, %v3699_v31 }
 0xa1b   :  { %5169 = vrcp.f32 %v3836_v50  ;;  %v3823_v28 = vrot.slane %v3822_v14, 1  ;;  %v6720_v4 = vpop.xlane.xlu0 %3619  ;;  %v6725_v34 = vpop.eup %5163  ;;  %v3809_v33 = vrot.slane %v3808_v48, 2 }
 0xa1c   :  { %v3715_v15 = vrot.slane %v3714_v63, 1  ;;  %v3701_v22 = vrot.slane %v3700_v10, 2  ;;  %v3705_v36 = vrot.slane %v6720_v4, 4  ;;  %v6731_v47 = vpop.eup %5165  ;;  %v3837_v45 = vrot.slane %v6725_v34, 4 }
 0xa1d   :  { %v3824_v55 = vadd.f32 %v3823_v28, %v3822_v14  ;;  %v6735_v19 = vpop.eup %5167  ;;  %v3810_v60 = vadd.f32 %v3809_v33, %v3808_v48  ;;  %v3813_v3 = vrot.slane %v6731_v47, 4  ;;  %v3954_v33 = vadd.f32 %v3953_v25, %v3952_v43 }
 0xa1e   :  { %v3716_v46 = vmax.f32 %v3714_v63, %v3715_v15  ;;  %v3702_v5 = vmax.f32 %v3700_v10, %v3701_v22  ;;  %v3706_v57 = vmax.f32 %v6720_v4, %v3705_v36  ;;  %v3838_v56 = vadd.f32 %v6725_v34, %v3837_v45 }
 0xa1f   :  { %5171 = vrcp.f32 %v3824_v55  ;;  %v6738_v44 = vpop.xlane.xlu0 %3625  ;;  %v3825_v29 = vrot.slane %v6735_v19, 4  ;;  %v3811_v17 = vrot.slane %v3810_v60, 1  ;;  %v3814_v30 = vadd.f32 %v6731_v47, %v3813_v3 }
 0xa20   :  { %v3737_v52 = vsub.f32 %v6702_v13, %v3716_v46  ;;  %v3703_v58 = vrot.slane %v3702_v5, 1  ;;  %v3707_v26 = vrot.slane %v3706_v57, 2  ;;  %v3717_v24 = vrot.slane %v6738_v44, 4 }
 0xa21   :  { %v3839_v41 = vrot.slane %v3838_v56, 2  ;;  %v3826_v61 = vadd.f32 %v6735_v19, %v3825_v29  ;;  %v3812_v20 = vadd.f32 %v3811_v17, %v3810_v60  ;;  %v3815_v23 = vrot.slane %v3814_v30, 2 }
 0xa22   :  { %v3767_v11 = vmul.f32 1.442695, %v3737_v52  ;;  %v3704_v38 = vmax.f32 %v3702_v5, %v3703_v58  ;;  %v3708_v31 = vmax.f32 %v3706_v57, %v3707_v26  ;;  %v3718_v62 = vmax.f32 %v6738_v44, %v3717_v24 }
 0xa23   :  { %v3840_v13 = vadd.f32 %v3839_v41, %v3838_v56  ;;  %v3827_v7 = vrot.slane %v3826_v61, 2  ;;  %v3816_v53 = vadd.f32 %v3815_v23, %v3814_v30  ;;  %v3941_v56 = vrot.slane %v6727_v16, 1 }
 0xa24   :  { %5173 = vpow2.f32 %v3767_v11  ;;  %v3735_v50 = vsub.f32 %v6708_v6, %v3704_v38  ;;  %v3709_v12 = vrot.slane %v3708_v31, 1  ;;  %v3719_v63 = vrot.slane %v3718_v62, 2 }
 0xa25   :  { %v5170_v14 = vpop.eup %5169  ;;  %5175 = vrcp.f32 %v3812_v20  ;;  %v3841_v28 = vrot.slane %v3840_v13, 1  ;;  %v3828_v48 = vadd.f32 %v3827_v7, %v3826_v61  ;;  %v3817_v22 = vrot.slane %v3816_v53, 1 }
 0xa26   :  { %v3888_v10 = vmul.f32 %v5170_v14, %v6689_v8  ;;  %v3763_v15 = vmul.f32 1.442695, %v3735_v50  ;;  %v3710_v36 = vmax.f32 %v3708_v31, %v3709_v12  ;;  %v3720_v55 = vmax.f32 %v3718_v62, %v3719_v63 }
 0xa27   :  { %v3842_v46 = vadd.f32 %v3841_v28, %v3840_v13  ;;  %v3829_v5 = vrot.slane %v3828_v48, 1  ;;  %v3818_v57 = vadd.f32 %v3817_v22, %v3816_v53  ;;  %v3948_v52 = vrot.slane %v6729_v2, 1 }
 0xa28   :  { %v3909_v45 = vmul.f32 %v3888_v10, %v6556_v9  ;;  %5177 = vpow2.f32 %v3763_v15  ;;  %v3736_v60 = vsub.f32 %v6720_v4, %v3710_v36  ;;  %v3721_v3 = vrot.slane %v3720_v55, 1 }
 0xa29   :  { %v5172_v6 = vpop.eup %5171  ;;  %5179 = vrcp.f32 %v3842_v46  ;;  %v3830_v29 = vadd.f32 %v3829_v5, %v3828_v48  ;;  %v3955_v17 = vrot.slane %v3954_v33, 1  ;;  %v4262_v4 = vsel %vm4084_vm5, %v6717_v42, %v6715_v49 }
 0xa2a   :  { %v3884_v8 = vmul.f32 %v5172_v6, %v6699_v18  ;;  %v3985_v43 = vsel %vm559_vm2, %v3909_v45, 0.0  ;;  %5181 = vrcp.f32 %v3818_v57  ;;  %v3765_v9 = vmul.f32 1.442695, %v3736_v60 }
 0xa2b   :  { %v3722_v25 = vmax.f32 %v3720_v55, %v3721_v3  ;;  %5183 = vrcp.f32 %v3830_v29  ;;  %v6761_v30 = vadd.f32 %v3941_v56, %v6727_v16  ;;  %v3986_v24 = vrot.slane %v3985_v43, 4 }
 0xa2c   :  { %v3907_v58 = vmul.f32 %v3884_v8, %v6566_v54  ;;  %5185 = vpow2.f32 %v3765_v9  ;;  %v6767_v54 = vadd.f32 %v3948_v52, %v6729_v2  ;;  %v4263_v61 = vsel %vm4086_vm6, %v6723_v39, %v4262_v4 }
 0xa2d   :  { %v3738_v18 = vsub.f32 %v6738_v44, %v3722_v25  ;;  %v6773_v23 = vadd.f32 %v3955_v17, %v3954_v33  ;;  %v4264_v31 = vsel %vm4088_vm7, %v6761_v30, %v4263_v61  ;;  %v3987_v13 = vadd.f32 %v3986_v24, %v3985_v43 }
 0xa2e   :  { %v6763_v26 = vpop.eup %5173  ;;  %v3971_v41 = vsel %vm559_vm2, %v3907_v58, 0.0  ;;  %v4265_v50 = vsel %vm4090_vm8, %v6767_v54, %v4264_v31 }
 0xa2f   :  { %v5176_v11 = vpop.eup %5175  ;;  %v3855_v38 = vrot.slane %v6763_v26, 4  ;;  %v3769_v20 = vmul.f32 1.442695, %v3738_v18  ;;  %v3972_v44 = vrot.slane %v3971_v41, 4  ;;  %v4266_v10 = vsel %vm4092_vm9, %v6773_v23, %v4265_v50 }
 0xa30   :  { %v3880_v16 = vmul.f32 %v5176_v11, %v6710_v32  ;;  %v3988_v33 = vrot.slane %v3987_v13, 2 }
 0xa31   :  { %v3856_v62 = vadd.f32 %v6763_v26, %v3855_v38  ;;  %5187 = vpow2.f32 %v3769_v20  ;;  %v3973_v12 = vadd.f32 %v3972_v44, %v3971_v41 }
 0xa32   :  { %v6778_v2 = vpop.eup %5177  ;;  %v3905_v7 = vmul.f32 %v3880_v16, %v6579_v0 }
 0xa33   :  { %v3857_v14 = vrot.slane %v3856_v62, 2  ;;  %v3843_v32 = vrot.slane %v6778_v2, 4  ;;  %v5180_v53 = vpop.eup %5179  ;;  %v3974_v60 = vrot.slane %v3973_v12, 2 }
 0xa34   :  { %v3957_v63 = vsel %vm559_vm2, %v3905_v7, 0.0  ;;  %v5182_v28 = vpop.eup %5181  ;;  %v3890_v48 = vmul.f32 %v5180_v53, %v6725_v34  ;;  %v3989_v7 = vadd.f32 %v3988_v33, %v3987_v13 }
 0xa35   :  { %v3858_v15 = vadd.f32 %v3857_v14, %v3856_v62  ;;  %v3844_v22 = vadd.f32 %v6778_v2, %v3843_v32  ;;  %v3958_v0 = vrot.slane %v3957_v63, 4  ;;  %v5184_v36 = vpop.eup %5183  ;;  %v3882_v55 = vmul.f32 %v5182_v28, %v6731_v47 }
 0xa36   :  { %v6790_v45 = vpop.eup %5185  ;;  %v3910_v46 = vmul.f32 %v3890_v48, %v6583_v35  ;;  %v3886_v5 = vmul.f32 %v5184_v36, %v6735_v19  ;;  %v3975_v11 = vadd.f32 %v3974_v60, %v3973_v12 }
 0xa37   :  { %v3859_v6 = vrot.slane %v3858_v15, 1  ;;  %v3845_v57 = vrot.slane %v3844_v22, 2  ;;  %v3849_v3 = vrot.slane %v6790_v45, 4  ;;  %v3906_v34 = vmul.f32 %v3882_v55, %v6594_v51 }
 0xa38   :  { %v3959_v56 = vadd.f32 %v3958_v0, %v3957_v63  ;;  %v3992_v8 = vsel %vm559_vm2, %v3910_v46, 0.0  ;;  %v3908_v47 = vmul.f32 %v3886_v5, %v6598_v40  ;;  %v3976_v12 = vrot.slane %v3975_v11, 1 }
 0xa39   :  { %v3860_v29 = vadd.f32 %v3859_v6, %v3858_v15  ;;  %v3846_v52 = vadd.f32 %v3845_v57, %v3844_v22  ;;  %v3993_v43 = vrot.slane %v3992_v8, 4  ;;  %v3850_v35 = vadd.f32 %v6790_v45, %v3849_v3 }
 0xa3a   :  { %v3960_v9 = vrot.slane %v3959_v56, 2  ;;  %v3964_v19 = vsel %vm559_vm2, %v3906_v34, 0.0  ;;  %v3978_v58 = vsel %vm559_vm2, %v3908_v47, 0.0  ;;  %v3990_v55 = vrot.slane %v3989_v7, 1 }
 0xa3b   :  { %v6800_v25 = vpop.eup %5187  ;;  %5189 = vrcp.f32 %v3860_v29  ;;  %v3847_v51 = vrot.slane %v3846_v52, 1  ;;  %v3965_v17 = vrot.slane %v3964_v19, 4  ;;  %v3979_v4 = vrot.slane %v3978_v58, 4 }
 0xa3c   :  { %v3851_v18 = vrot.slane %v3850_v35, 2  ;;  %v3861_v24 = vrot.slane %v6800_v25, 4  ;;  %v3961_v40 = vadd.f32 %v3960_v9, %v3959_v56  ;;  %v3994_v38 = vadd.f32 %v3993_v43, %v3992_v8 }
 0xa3d   :  { %v3848_v41 = vadd.f32 %v3847_v51, %v3846_v52  ;;  %v3966_v61 = vadd.f32 %v3965_v17, %v3964_v19  ;;  %v3980_v20 = vadd.f32 %v3979_v4, %v3978_v58  ;;  %v3977_v34 = vadd.f32 %v3976_v12, %v3975_v11 }
 0xa3e   :  { %v3852_v44 = vadd.f32 %v3851_v18, %v3850_v35  ;;  %v3862_v16 = vadd.f32 %v6800_v25, %v3861_v24  ;;  %v3962_v31 = vrot.slane %v3961_v40, 1  ;;  %v3995_v50 = vrot.slane %v3994_v38, 2 }
 0xa3f   :  { %5191 = vrcp.f32 %v3848_v41  ;;  %v3967_v62 = vrot.slane %v3966_v61, 2  ;;  %v3981_v14 = vrot.slane %v3980_v20, 2  ;;  %v3991_v8 = vadd.f32 %v3990_v55, %v3989_v7 }
 0xa40   :  { %v3853_v32 = vrot.slane %v3852_v44, 1  ;;  %v3863_v53 = vrot.slane %v3862_v16, 2  ;;  %v6805_v63 = vadd.f32 %v3962_v31, %v3961_v40  ;;  %v3996_v48 = vadd.f32 %v3995_v50, %v3994_v38 }
 0xa41   :  { %v3968_v28 = vadd.f32 %v3967_v62, %v3966_v61  ;;  %v3982_v0 = vadd.f32 %v3981_v14, %v3980_v20  ;;  %v4035_v50 = vpack.c.bf16 %v3977_v34, %v3977_v34 }
 0xa42   :  { %v3854_v15 = vadd.f32 %v3853_v32, %v3852_v44  ;;  %v3864_v22 = vadd.f32 %v3863_v53, %v3862_v16  ;;  %v4267_v46 = vsel %vm4094_vm10, %v6805_v63, %v4266_v10  ;;  %v3997_v5 = vrot.slane %v3996_v48, 1 }
 0xa43   :  { %v3969_v36 = vrot.slane %v3968_v28, 1  ;;  %v3983_v33 = vrot.slane %v3982_v0, 1  ;;  %v4029_v32 = vpack.c.bf16 %v6723_v39, %v6723_v39  ;;  %v4076_v55 = vunpack.c.l.b16 %v4035_v50  ;;  %v5029_v50 = vld [vmem:[%s6903_s2 + $0x78] sm:$0xff]  }
 0xa44   :  { %5193 = vrcp.f32 %v3854_v15  ;;  %v3865_v13 = vrot.slane %v3864_v22, 1  ;;  %v6817_v29 = vadd.f32 %v3997_v5, %v3996_v48 }
 0xa45   :  { %v5190_v6 = vpop.eup %5189  ;;  %v6809_v57 = vadd.f32 %v3969_v36, %v3968_v28  ;;  %v3984_v56 = vadd.f32 %v3983_v33, %v3982_v0 }
 0xa46   :  { %v3896_v60 = vmul.f32 %v5190_v6, %v6763_v26  ;;  %v3866_v3 = vadd.f32 %v3865_v13, %v3864_v22  ;;  %v4038_v39 = vpack.c.bf16 %v6817_v29, %v6817_v29 }
 0xa47   :  { %v6814_v47 = vsel %vm4096_vm11, %v6809_v57, %v4267_v46  ;;  %v4269_v52 = vsel %vm4084_vm5, %v3984_v56, %v3977_v34  ;;  %v4036_v16 = vpack.c.bf16 %v3984_v56, %v3984_v56  ;;  %v4070_v46 = vunpack.c.l.b16 %v4029_v32  ;;  %v5031_v32 = vld [vmem:[%s6903_s2 + $0x88] sm:$0xff]  }
 0xa48   :  { %5195 = vrcp.f32 %v3866_v3  ;;  %v3913_v10 = vmul.f32 %v3896_v60, %v6611_v59  ;;  %v4270_v35 = vsel %vm4086_vm6, %v3991_v8, %v4269_v52  ;;  %v4030_v34 = vpack.c.bf16 %v6761_v30, %v6761_v30 }
 0xa49   :  { %v5192_v43 = vpop.eup %5191  ;;  %v4271_v19 = vsel %vm4088_vm7, %v6817_v29, %v4270_v35  ;;  %v4077_v48 = vunpack.c.l.b16 %v4036_v16  ;;  %v4031_v56 = vpack.c.bf16 %v6767_v54, %v6767_v54  ;;  %v4033_v29 = vpack.c.bf16 %v6805_v63, %v6805_v63 }
 0xa4a   :  { %v3892_v26 = vmul.f32 %v5192_v43, %v6778_v2  ;;  %v4013_v9 = vsel %vm559_vm2, %v3913_v10, 0.0  ;;  %v4032_v43 = vpack.c.bf16 %v6773_v23, %v6773_v23  ;;  %v4079_v54 = vunpack.c.l.b16 %v4038_v39 }
 0xa4b   :  { %v4014_v58 = vrot.slane %v4013_v9, 4  ;;  %v4098_v60 = vsel %vm4084_vm5, %v4077_v48, %v4076_v55 }
 0xa4c   :  { %v3911_v51 = vmul.f32 %v3892_v26, %v6620_v21  ;;  %v4028_v21 = vpack.c.bf16 %v6717_v42, %v6717_v42  ;;  %v4034_v26 = vpack.c.bf16 %v6809_v57, %v6809_v57 }
 0xa4d   :  { %v4015_v17 = vadd.f32 %v4014_v58, %v4013_v9 }
 0xa4e   :  { %v5194_v4 = vpop.eup %5193  ;;  %v3999_v59 = vsel %vm559_vm2, %v3911_v51, 0.0  ;;  %v4069_v53 = vunpack.c.l.b16 %v4028_v21 }
 0xa4f   :  { %v3894_v18 = vmul.f32 %v5194_v4, %v6790_v45  ;;  %v4000_v24 = vrot.slane %v3999_v59, 4  ;;  %v4016_v61 = vrot.slane %v4015_v17, 2  ;;  %v4071_v4 = vunpack.c.l.b16 %v4030_v34 }
 0xa51   :  { %v3912_v40 = vmul.f32 %v3894_v18, %v6629_v27  ;;  %v4001_v41 = vadd.f32 %v4000_v24, %v3999_v59  ;;  %v4017_v45 = vadd.f32 %v4016_v61, %v4015_v17  ;;  %v4027_v27 = vpack.c.bf16 %v6715_v49, %v6715_v49 }
 0xa52   :  { %v5196_v2 = vpop.eup %5195  ;;  %v4072_v59 = vunpack.c.l.b16 %v4031_v56  ;;  %v4073_v24 = vunpack.c.l.b16 %v4032_v43 }
 0xa53   :  { %v3898_v11 = vmul.f32 %v5196_v2, %v6800_v25  ;;  %v4002_v38 = vrot.slane %v4001_v41, 2  ;;  %v4006_v20 = vsel %vm559_vm2, %v3912_v40, 0.0  ;;  %v4018_v22 = vrot.slane %v4017_v45, 1 }
 0xa54   :  { %v4007_v44 = vrot.slane %v4006_v20, 4  ;;  %v4068_v12 = vunpack.c.l.b16 %v4027_v27 }
 0xa55   :  { %v3914_v31 = vmul.f32 %v3898_v11, %v6636_v37  ;;  %v4003_v62 = vadd.f32 %v4002_v38, %v4001_v41  ;;  %v4037_v37 = vpack.c.bf16 %v3991_v8, %v3991_v8  ;;  %v4019_v3 = vadd.f32 %v4018_v22, %v4017_v45 }
 0xa56   :  { %v4008_v7 = vadd.f32 %v4007_v44, %v4006_v20  ;;  %v4085_v13 = vsel %vm4084_vm5, %v4069_v53, %v4068_v12  ;;  %v4074_v41 = vunpack.c.l.b16 %v4033_v29  ;;  %v4075_v11 = vunpack.c.l.b16 %v4034_v26  ;;  %v5032_v53 = vld [vmem:[%s6903_s2 + $0x90] sm:$0xff]  }
 0xa57   :  { %v4004_v14 = vrot.slane %v4003_v62, 1  ;;  %v4020_v25 = vsel %vm559_vm2, %v3914_v31, 0.0  ;;  %v4078_v8 = vunpack.c.l.b16 %v4037_v37  ;;  %v4087_v35 = vsel %vm4086_vm6, %v4070_v46, %v4085_v13 }
 0xa58   :  { %v4009_v28 = vrot.slane %v4008_v7, 2  ;;  %v4021_v42 = vrot.slane %v4020_v25, 4  ;;  %v4041_v17 = vpack.c.bf16 %v4019_v3, %v4019_v3  ;;  %v4089_v57 = vsel %vm4088_vm7, %v4071_v4, %v4087_v35 }
 0xa59   :  { %v4005_v15 = vadd.f32 %v4004_v14, %v4003_v62  ;;  %v4099_v30 = vsel %vm4086_vm6, %v4078_v8, %v4098_v60  ;;  %v4091_v44 = vsel %vm4090_vm8, %v4072_v59, %v4089_v57  ;;  %v4448_v59 = vld [vmem:[#allocation2 + $0x48] ss:$0 sm:$0xff] }
 0xa5a   :  { %v4010_v0 = vadd.f32 %v4009_v28, %v4008_v7  ;;  %v4022_v36 = vadd.f32 %v4021_v42, %v4020_v25  ;;  %v4100_v63 = vsel %vm4088_vm7, %v4079_v54, %v4099_v30  ;;  %v4082_v21 = vunpack.c.l.b16 %v4041_v17  ;;  %v5030_v25 = vld [vmem:[%s6903_s2 + $0x80] sm:$0xff]  }
 0xa5b   :  { %v4039_v49 = vpack.c.bf16 %v4005_v15, %v4005_v15  ;;  %v4272_v33 = vsel %vm4090_vm8, %v4005_v15, %v4271_v19  ;;  %v4093_v31 = vsel %vm4092_vm9, %v4073_v24, %v4091_v44  ;;  %v4438_v28 = vld [vmem:[#allocation2 + $0x38] ss:$0 sm:$0xff]  ;;  %v4449_v24 = vld [vmem:[#allocation2 + $0x50] ss:$0 sm:$0xff] }
 0xa5c   :  { %v4011_v5 = vrot.slane %v4010_v0, 1  ;;  %v4023_v6 = vrot.slane %v4022_v36, 2  ;;  %v4095_v62 = vsel %vm4094_vm10, %v4074_v41, %v4093_v31 }
 0xa5d   :  { %v4080_v9 = vunpack.c.l.b16 %v4039_v49  ;;  %v4097_v27 = vsel %vm4096_vm11, %v4075_v11, %v4095_v62  ;;  %v4442_v49 = vld [vmem:[#allocation2 + $0x40] ss:$0 sm:$0xff] }
 0xa5e   :  { %v4012_v10 = vadd.f32 %v4011_v5, %v4010_v0  ;;  %v4024_v52 = vadd.f32 %v4023_v6, %v4022_v36 }
 0xa5f   :  { %v4101_v61 = vsel %vm4090_vm8, %v4080_v9, %v4100_v63 }
 0xa60   :  { %v4025_v19 = vrot.slane %v4024_v52, 1  ;;  %v4040_v58 = vpack.c.bf16 %v4012_v10, %v4012_v10  ;;  %v4273_v51 = vsel %vm4092_vm9, %v4012_v10, %v4272_v33 }
 0xa61   :  { %v4274_v23 = vsel %vm4094_vm10, %v4019_v3, %v4273_v51 }
 0xa62   :  { %v4026_v18 = vadd.f32 %v4025_v19, %v4024_v52  ;;  %v4081_v40 = vunpack.c.l.b16 %v4040_v58 }
 0xa64   :  { %v4042_v2 = vpack.c.bf16 %v4026_v18, %v4026_v18  ;;  %v4102_v38 = vsel %vm4092_vm9, %v4081_v40, %v4101_v61  ;;  %v4275_v20 = vsel %vm4096_vm11, %v4026_v18, %v4274_v23 }
 0xa65   :  { %v4103_v45 = vsel %vm4094_vm10, %v4082_v21, %v4102_v38 }
 0xa66   :  { %v4083_v16 = vunpack.c.l.b16 %v4042_v2 }
 0xa68   :  { %v4104_v7 = vsel %vm4096_vm11, %v4083_v16, %v4103_v45 }
 0xa69   :  { %v4105_v14 = vpack.c.b16 %v4104_v7, %v4097_v27 }
 0xa6b   :  { %4985 = vmatmul.mubr.msk.bf16.vlgmr.msra.gmra.mrb[96].mxu1 %vm559_vm2, %v4105_v14 }
 0xa6c   :  { %4989 = vmatpush3.bf16.msra.mxu1 %v5029_v50  ;;  %4996 = vmatprep.mubr.msk.bf16.mxu1 %vm5236_vm1, %v5233_v1 }
 0xa6d   :  { %4990 = vmatprep.subr.bf16.mxu1 %v5233_v1 }
 0xa70   :  { %4991 = vmatpush3.bf16.msra.mxu1 %v5030_v25 }
 0xa71   :  { %4992 = vmatprep.subr.bf16.mxu1 %v5233_v1 }
 0xa74   :  { %4993 = vmatpush3.bf16.msra.mxu1 %v5031_v32 }
 0xa75   :  { %4994 = vmatprep.subr.bf16.mxu1 %v5233_v1 }
 0xa78   :  { %4995 = vmatpush3.bf16.msra.mxu1 %v5032_v53 }
 0xb3e   :  { %v4155_v42 = vpop.f32.mrb[96].mxu1 }
 0xb3f   :  { %v4156_v48 = vadd.f32 %v4438_v28, %v4155_v42  ;;  %v4986_v15 = vpop.f32.mrb[97].mxu1 }
 0xb40   :  { %v4158_v22 = vpop.f32.mrb[98].mxu1 }
 0xb41   :  { %v4159_v37 = vadd.f32 %v4438_v28, %v4158_v22  ;;  %v4987_v12 = vpop.f32.mrb[99].mxu1  ;;  %v4162_v0 = vmax.f32 %v4156_v48, 0.0 }
 0xb43   :  { %v4163_v36 = vmax.f32 %v4159_v37, 0.0 }
 0xb45   :  { %v4164_v55 = vpack.c.bf16 %v4163_v36, %v4162_v0 }
 0xb47   :  { %4997 = vmatmul.mubr.msk.bf16.vlgmr.msra.gmra.mrb[100].mxu1 %vm191_vm4, %v4164_v55 }
 0xc1a   :  { %v4239_v46 = vpop.f32.mrb[100].mxu1 }
 0xc1b   :  { %v4240_v13 = vadd.f32 %v4442_v49, %v4239_v46  ;;  %v4998_v33 = vpop.f32.mrb[101].mxu1 }
 0xc1c   :  { %v4242_v5 = vpop.f32.mrb[102].mxu1 }
 0xc1d   :  { %v4278_v1 = vadd.f32 %v6814_v47, %v4240_v13  ;;  %v4243_v6 = vadd.f32 %v4442_v49, %v4242_v5  ;;  %v4999_v39 = vpop.f32.mrb[103].mxu1 }
 0xc1f   :  { %v4279_v60 = vadd.f32 %v4275_v20, %v4243_v6  ;;  %v4282_v3 = vsel %vm559_vm2, %v4278_v1, 0.0 }
 0xc20   :  { %4283 = vadd.xlane.f32.xlu1 %v4282_v3 }
 0xc21   :  { %v4285_v34 = vsel %vm559_vm2, %v4279_v60, 0.0 }
 0xc22   :  { %4286 = vadd.xlane.f32.xlu0 %v4285_v34 }
 0xcad   :  { %v4284_v56 = vpop.xlane.xlu1 %4283 }
 0xcae   :  { %v4288_v8 = vmul.f32 0.03125, %v4284_v56 }
 0xcaf   :  { %v4287_v10 = vpop.xlane.xlu0 %4286 }
 0xcb0   :  { %v4290_v52 = vsub.f32 %v4278_v1, %v4288_v8  ;;  %v4289_v43 = vmul.f32 0.03125, %v4287_v10 }
 0xcb2   :  { %v4291_v35 = vsub.f32 %v4279_v60, %v4289_v43  ;;  %v4292_v29 = vmul.f32 %v4290_v52, %v4290_v52 }
 0xcb4   :  { %v4294_v26 = vsel %vm559_vm2, %v4292_v29, 0.0  ;;  %v4293_v9 = vmul.f32 %v4291_v35, %v4291_v35 }
 0xcb5   :  { %4295 = vadd.xlane.f32.xlu1 %v4294_v26 }
 0xcb6   :  { %v4297_v47 = vsel %vm559_vm2, %v4293_v9, 0.0 }
 0xcb7   :  { %4298 = vadd.xlane.f32.xlu0 %v4297_v47 }
 0xd42   :  { %v4296_v30 = vpop.xlane.xlu1 %4295 }
 0xd43   :  { %v4300_v19 = vmul.f32 0.03125, %v4296_v30 }
 0xd44   :  { %v4299_v58 = vpop.xlane.xlu0 %4298 }
 0xd45   :  { %v4302_v54 = vadd.f32 1e-05, %v4300_v19  ;;  %v4301_v51 = vmul.f32 0.03125, %v4299_v58 }
 0xd47   :  { %5197 = vrsqrt.f32 %v4302_v54  ;;  %v4303_v17 = vadd.f32 1e-05, %v4301_v51 }
 0xd49   :  { %5199 = vrsqrt.f32 %v4303_v17 }
 0xd51   :  { %v5198_v4 = vpop.eup %5197 }
 0xd52   :  { %v4306_v23 = vmul.f32 %v5198_v4, %v4290_v52 }
 0xd53   :  { %v5200_v18 = vpop.eup %5199 }
 0xd54   :  { %v4312_v40 = vmul.f32 %v4448_v59, %v4306_v23  ;;  %v4307_v63 = vmul.f32 %v5200_v18, %v4291_v35 }
 0xd56   :  { %v4318_v41 = vadd.f32 %v4449_v24, %v4312_v40  ;;  %v4313_v57 = vmul.f32 %v4448_v59, %v4307_v63 }
 0xd58   :  { %4320 = vst.msk [vmem:[%s6905_s4] sm:$0xff] %vm559_vm2, %v4318_v41  ;;  %v4319_v61 = vadd.f32 %v4449_v24, %v4313_v57 }
 0xd5a   :  { %4321 = vst.msk [vmem:[%s6905_s4 + $0x8] sm:$0xff] %vm559_vm2, %v4319_v61 }
 0xd5b   :  { %4326 = vsyncpa [#allocation3], 1 }

</bundles_post_ra>
